<compile_context>
chip_gen: v6e
topology: v6e:2x2x1
jax: 0.10.0
libtpu: 0.0.40
codegen_flags: <defaults>
</compile_context>

<pallas_src>
import functools
import math

import jax
import jax.numpy as jnp
from jax.experimental import pallas as pl
from jax.experimental.pallas import tpu as pltpu

F32 = jnp.float32
STAT_LANES = 8  # compact per-node stat slab: [det_tgt, det_gen, trace, z, degree, 0, 0, 0]

# Whole-array VMEM blocks: everything is KiB-scale at these shapes.
# TODO(synk): for large graphs the dense (N,N) adjacencies must be tiled with a
# (dst "parallel", src "arbitrary") grid and an explicit vmem_limit_bytes
# (v7x has 64 MiB VMEM vs 128 MiB on v5e/v6e), and matmul operands should be
# cast to bf16 with f32 accumulation; whole-array blocks are only valid at small N.
VMEM = pl.BlockSpec(memory_space=pltpu.MemorySpace.VMEM)

# ---- packed square-weight slab rows (each (H, H)) --------------------------- #
(W_GCN, W_POST_AGG, W_PNA_LIN,
 W_GEN0, W_GEN1, W_GEN2, W_GEN3,
 W_DEG1, W_DEG2, W_DEG3,
 W_FEA1, W_FEA2, W_FEA_LIN2, NUM_WSQ) = range(14)

# ---- packed bias / BN-affine slab rows (each (H,), zero padded) -------------- #
(B_LIN, B_GCN, B_SAGE, B_POST, B_PNA_LIN, B_MEAN, B_SIG,
 B_GEN0, B_GEN1, B_GEN2, B_GEN3,
 B_DEG0, B_DEG1, B_DEG2, B_DEG3, B_DEG_LIN2W, B_DEG_LIN2B,
 B_DEG_G0, B_DEG_BE0, B_DEG_G1, B_DEG_BE1, B_DEG_G2, B_DEG_BE2,
 B_FEA0, B_FEA1, B_FEA2, B_FEA_LIN2,
 B_FEA_G0, B_FEA_BE0, B_FEA_G1, B_FEA_BE1, NUM_BSL) = range(32)


def _dot(a, b):
    return jnp.dot(a, b, preferred_element_type=jnp.float32)


# ------------------------- the single fused kernel --------------------------- #
def _gadnr_fused_kernel(x_ref, agcn_ref, madj_ref, z_ref,
                        linw_ref, wh0_ref, wh1_ref, wsq_ref, bsl_ref,
                        h0_ref, feat_ref, stats_ref,
                        *, hid, sample_size, sample_time):
    n = x_ref.shape[0]
    bsl = bsl_ref[...]

    def b(i):                                   # (1, H) bias / gamma / beta row
        return bsl[i:i + 1, :]

    def bn_relu(y, gi, bi):                      # training-mode BatchNorm1d + ReLU
        mu = jnp.mean(y, axis=0, keepdims=True)
        var = jnp.mean(jnp.square(y - mu), axis=0, keepdims=True)
        return jnp.maximum((y - mu) * jax.lax.rsqrt(var + 1e-5) * b(gi) + b(bi), 0.0)

    # ---- encoder: nn.Linear + 1-layer GCN backbone -------------------------- #
    h0 = _dot(x_ref[...], linw_ref[...]) + b(B_LIN)
    h1 = _dot(agcn_ref[...], _dot(h0, wsq_ref[W_GCN])) + b(B_GCN)
    h0_ref[...] = h0

    # ---- neighborhood statistics (SAGE-mean target, PNA-std), lane-packed --- #
    # h0p = h0 @ [sage_l | sage_r | pre_nn(neigh half) | post_nn(x_i half)]
    madj = madj_ref[...]
    h0p = _dot(h0, wh0_ref[...])                                   # (N, 4H), 128 lanes
    q = h0p[:, 2 * hid:3 * hid]
    magg = _dot(madj, h0p)                                         # mean over neighbors
    mq2 = _dot(madj, q * q)
    # SAGEConv(aggr='mean'): lin_l(mean_j h0_j) + lin_r(h0_i); linearity lets the
    # lin_l projection ride in the packed h0 pass (madj @ (h0 @ W) == (madj @ h0) @ W).
    tmean = magg[:, :hid] + b(B_SAGE) + h0p[:, hid:2 * hid]
    # PNA 'std' aggregator: x_i half of pre_nn (and its bias) is constant over the
    # neighbors and cancels in the variance -> only the neighbor half q matters.
    mq = magg[:, 2 * hid:3 * hid]
    std_agg = jnp.sqrt(jnp.maximum(mq2 - mq * mq, 0.0) + 1e-5)
    post = h0p[:, 3 * hid:] + _dot(std_agg, wsq_ref[W_POST_AGG]) + b(B_POST)
    s = _dot(post, wsq_ref[W_PNA_LIN]) + b(B_PNA_LIN)              # std_neigh

    # ---- all h1 consumers in one 128-lane matmul ----------------------------- #
    # h1p = h1 @ [mlp_mean | mlp_sigma | deg_dec.L0 | fea_dec.L0]
    h1p = _dot(h1, wh1_ref[...])
    gm = h1p[:, :hid] + b(B_MEAN)
    gs = jnp.exp(h1p[:, hid:2 * hid] + b(B_SIG))
    deg_h = bn_relu(h1p[:, 2 * hid:3 * hid] + b(B_DEG0), B_DEG_G0, B_DEG_BE0)
    fea_h = bn_relu(h1p[:, 3 * hid:] + b(B_FEA0), B_FEA_G0, B_FEA_BE0)

    # ---- degree decoder FNN_GAD_NR(H, H, 1, 4), out padded onto lane 0 ------- #
    deg_h = bn_relu(_dot(deg_h, wsq_ref[W_DEG1]) + b(B_DEG1), B_DEG_G1, B_DEG_BE1)
    deg_h = bn_relu(_dot(deg_h, wsq_ref[W_DEG2]) + b(B_DEG2), B_DEG_G2, B_DEG_BE2)
    deg_y = jnp.maximum(_dot(deg_h, wsq_ref[W_DEG3]) + b(B_DEG3), 0.0)     # FNN relu
    deg = jnp.maximum(deg_y * b(B_DEG_LIN2W) + b(B_DEG_LIN2B), 0.0)        # lin2 + outer relu
    deg_col = deg[:, 0:1]

    # ---- feature decoder FNN_GAD_NR(H, H, H, 3) ------------------------------ #
    fea_h = bn_relu(_dot(fea_h, wsq_ref[W_FEA1]) + b(B_FEA1), B_FEA_G1, B_FEA_BE1)
    fea_y = _dot(fea_h, wsq_ref[W_FEA2]) + b(B_FEA2)
    feat_ref[...] = _dot(jnp.maximum(fea_y, 0.0), wsq_ref[W_FEA_LIN2]) + b(B_FEA_LIN2)

    # ---- generator: all sample_time*sample_size draws in one batched MXU pass - #
    ts = sample_time * sample_size
    gm_rep = jnp.concatenate([gm] * ts, axis=0)                    # (T*S*N, H)
    gs_rep = jnp.concatenate([gs] * ts, axis=0)
    g = gm_rep + gs_rep * z_ref[...]                               # reparameterization
    for wi, bi in ((W_GEN0, B_GEN0), (W_GEN1, B_GEN1), (W_GEN2, B_GEN2)):
        g = jnp.maximum(_dot(g, wsq_ref[wi]) + b(bi), 0.0)
    nh = _dot(g, wsq_ref[W_GEN3]) + b(B_GEN3)                      # (T*S*N, H)

    # ---- closed-form KL statistics ------------------------------------------- #
    ss = jnp.sum(s * s, axis=1, keepdims=True)                     # ||std_neigh||^2
    det_target = 1.0 + ss                                          # det(I + s s^T)
    inv_ss = 1.0 / float(sample_size)
    ddof = float(max(sample_size - 1, 1))                          # torch.std unbiased
    lane = jax.lax.broadcasted_iota(jnp.int32, (n, stats_ref.shape[-1]), 1)
    # TODO(synk): on v7x the sample_time loop could be split across the 2 TensorCores
    # with a parallel grid axis; kept inside the single launch here because the
    # workload at these shapes is launch-overhead bound, not compute bound.
    for t in range(sample_time):
        nh_s = [nh[(t * sample_size + k) * n:(t * sample_size + k + 1) * n, :]
                for k in range(sample_size)]
        g_mean = sum(nh_s) * inv_ss
        g_var = sum(jnp.square(u - g_mean) for u in nh_s) / ddof
        g_std = jnp.sqrt(g_var)
        tt = jnp.sum(g_std * g_std, axis=1, keepdims=True)
        det_gen = 1.0 + inv_ss * tt                                # matrix-det lemma
        alpha = inv_ss * pl.reciprocal(det_gen, approx=True)       # Sherman-Morrison
        st = jnp.sum(s * g_std, axis=1, keepdims=True)
        trace = ss - alpha * st * st + float(hid) - alpha * tt
        diff = g_mean - tmean
        dgt = jnp.sum(diff * g_std, axis=1, keepdims=True)
        zq = jnp.sum(diff * diff, axis=1, keepdims=True) - alpha * dgt * dgt
        stats_ref[t] = (jnp.where(lane == 0, det_target, 0.0)
                        + jnp.where(lane == 1, det_gen, 0.0)
                        + jnp.where(lane == 2, trace, 0.0)
                        + jnp.where(lane == 3, zq, 0.0)
                        + jnp.where(lane == 4, deg_col, 0.0))


# ------------------------------ forward wrapper ------------------------------- #
def gadnr_forward(packed, x, a_gcn, mean_adj, rng, *, hid, sample_size, sample_time):
    n = x.shape[0]
    z = jax.random.normal(rng, (sample_time * sample_size * n, hid), dtype=F32)
    h0, feat, stats = pl.pallas_call(
        functools.partial(_gadnr_fused_kernel, hid=hid,
                          sample_size=sample_size, sample_time=sample_time),
        out_shape=(jax.ShapeDtypeStruct((n, hid), F32),
                   jax.ShapeDtypeStruct((n, hid), F32),
                   jax.ShapeDtypeStruct((sample_time, n, STAT_LANES), F32)),
        in_specs=[VMEM] * 9,
        out_specs=(VMEM, VMEM, VMEM),
    )(x, a_gcn, mean_adj, z,
      packed["lin_w"], packed["w_h0"], packed["w_h1"], packed["wsq"], packed["bsl"])

    degree_logits = stats[0, :, 4:5]
    # Feature decoder is deterministic (dropout=0, batch-stat BN) -> identical on
    # every sample_time iteration: compute once, replicate.
    feat_recon_list = [feat] * sample_time
    neigh_recon_list = [(stats[t, :, 0], stats[t, :, 1], hid,
                         stats[t, :, 2], stats[t, :, 3]) for t in range(sample_time)]
    return h0, degree_logits, feat_recon_list, neigh_recon_list


# --------------------------- parameter initialization ------------------------- #
def _init_linear(key, din, dout):
    kw, kb = jax.random.split(key)
    lim = 1.0 / math.sqrt(din)
    w = jax.random.uniform(kw, (din, dout), F32, -lim, lim)
    b = jax.random.uniform(kb, (dout,), F32, -lim, lim)
    return {"w": w, "b": b}


def _init_fnn(keys, din, dhid, dout, num_layers):
    dims = [din] + [dhid] * (num_layers - 1) + [dout]
    mlp = [_init_linear(next(keys), dims[i], dims[i + 1]) for i in range(num_layers)]
    bns = [{"gamma": jnp.ones((dhid,), F32), "beta": jnp.zeros((dhid,), F32)}
           for _ in range(num_layers - 1)]
    lin2 = _init_linear(next(keys), dout, dout)
    return {"mlp": mlp, "bn": bns, "lin2": lin2}


def init_params(key, in_dim, hid_dim, deg_dec_layers=4, fea_dec_layers=3):
    keys = iter(jax.random.split(key, 64))
    p = {}
    p["lin"] = _init_linear(next(keys), in_dim, hid_dim)            # nn.Linear(in, hid)
    p["gcn"] = _init_linear(next(keys), hid_dim, hid_dim)           # GCNConv weight + bias
    p["sage_l"] = _init_linear(next(keys), hid_dim, hid_dim)        # SAGEConv.lin_l (bias)
    p["sage_r"] = {"w": _init_linear(next(keys), hid_dim, hid_dim)["w"]}  # lin_r, no bias
    p["pna_pre"] = _init_linear(next(keys), 2 * hid_dim, hid_dim)   # pre_nn Linear(2H,H)
    p["pna_post"] = _init_linear(next(keys), 2 * hid_dim, hid_dim)  # post_nn Linear(2H,H)
    p["pna_lin"] = _init_linear(next(keys), hid_dim, hid_dim)       # PNAConv.lin
    p["mlp_mean"] = _init_linear(next(keys), hid_dim, hid_dim)
    p["mlp_sigma"] = _init_linear(next(keys), hid_dim, hid_dim)
    p["mlp_gen"] = [_init_linear(next(keys), hid_dim, hid_dim) for _ in range(4)]
    p["deg_dec"] = _init_fnn(keys, hid_dim, hid_dim, 1, deg_dec_layers)
    p["fea_dec"] = _init_fnn(keys, hid_dim, hid_dim, hid_dim, fea_dec_layers)
    return p


def pack_params(p, hid):
    """Pack all weights into 5 arrays (2 wide matmul slabs, 1 square-weight slab,
    1 bias slab, the input Linear) to minimize per-call DMA / ref count."""
    def row(v):
        v = jnp.asarray(v, F32).reshape(-1)
        return jnp.pad(v, (0, hid - v.shape[0]))

    w_h0 = jnp.concatenate([p["sage_l"]["w"], p["sage_r"]["w"],
                            p["pna_pre"]["w"][hid:, :],
                            p["pna_post"]["w"][:hid, :]], axis=1)
    w_h1 = jnp.concatenate([p["mlp_mean"]["w"], p["mlp_sigma"]["w"],
                            p["deg_dec"]["mlp"][0]["w"],
                            p["fea_dec"]["mlp"][0]["w"]], axis=1)

    wsq = [None] * NUM_WSQ
    wsq[W_GCN] = p["gcn"]["w"]
    wsq[W_POST_AGG] = p["pna_post"]["w"][hid:, :]
    wsq[W_PNA_LIN] = p["pna_lin"]["w"]
    for i, wi in enumerate((W_GEN0, W_GEN1, W_GEN2, W_GEN3)):
        wsq[wi] = p["mlp_gen"][i]["w"]
    wsq[W_DEG1] = p["deg_dec"]["mlp"][1]["w"]
    wsq[W_DEG2] = p["deg_dec"]["mlp"][2]["w"]
    wsq[W_DEG3] = jnp.pad(p["deg_dec"]["mlp"][3]["w"], ((0, 0), (0, hid - 1)))
    wsq[W_FEA1] = p["fea_dec"]["mlp"][1]["w"]
    wsq[W_FEA2] = p["fea_dec"]["mlp"][2]["w"]
    wsq[W_FEA_LIN2] = p["fea_dec"]["lin2"]["w"]
    wsq = jnp.stack(wsq, axis=0)

    bsl = [None] * NUM_BSL
    bsl[B_LIN] = row(p["lin"]["b"]); bsl[B_GCN] = row(p["gcn"]["b"])
    bsl[B_SAGE] = row(p["sage_l"]["b"]); bsl[B_POST] = row(p["pna_post"]["b"])
    bsl[B_PNA_LIN] = row(p["pna_lin"]["b"])
    bsl[B_MEAN] = row(p["mlp_mean"]["b"]); bsl[B_SIG] = row(p["mlp_sigma"]["b"])
    for i, bi in enumerate((B_GEN0, B_GEN1, B_GEN2, B_GEN3)):
        bsl[bi] = row(p["mlp_gen"][i]["b"])
    for i, bi in enumerate((B_DEG0, B_DEG1, B_DEG2, B_DEG3)):
        bsl[bi] = row(p["deg_dec"]["mlp"][i]["b"])
    bsl[B_DEG_LIN2W] = row(p["deg_dec"]["lin2"]["w"])   # (1,1) scalar on lane 0
    bsl[B_DEG_LIN2B] = row(p["deg_dec"]["lin2"]["b"])
    for i, (gi, bi) in enumerate(((B_DEG_G0, B_DEG_BE0), (B_DEG_G1, B_DEG_BE1),
                                  (B_DEG_G2, B_DEG_BE2))):
        bsl[gi] = row(p["deg_dec"]["bn"][i]["gamma"])
        bsl[bi] = row(p["deg_dec"]["bn"][i]["beta"])
    for i, bi in enumerate((B_FEA0, B_FEA1, B_FEA2)):
        bsl[bi] = row(p["fea_dec"]["mlp"][i]["b"])
    bsl[B_FEA_LIN2] = row(p["fea_dec"]["lin2"]["b"])
    for i, (gi, bi) in enumerate(((B_FEA_G0, B_FEA_BE0), (B_FEA_G1, B_FEA_BE1))):
        bsl[gi] = row(p["fea_dec"]["bn"][i]["gamma"])
        bsl[bi] = row(p["fea_dec"]["bn"][i]["beta"])
    bsl = jnp.stack(bsl, axis=0)

    return {"lin_w": p["lin"]["w"], "w_h0": w_h0, "w_h1": w_h1, "wsq": wsq, "bsl": bsl}


# ------------------------------ graph preprocessing --------------------------- #
def build_gcn_adj(edge_index, n):
    # gcn_norm with add_remaining_self_loops: drop existing self loops, add I.
    src, dst = edge_index[0], edge_index[1]
    w = jnp.where(src != dst, 1.0, 0.0).astype(F32)
    a = jnp.zeros((n, n), F32).at[dst, src].add(w)
    a = a + jnp.eye(n, dtype=F32)
    deg = jnp.sum(a, axis=1)
    dinv = jnp.where(deg > 0, 1.0 / jnp.sqrt(deg), 0.0)
    return dinv[:, None] * a * dinv[None, :]


def build_mean_adj(edge_index, n):
    src, dst = edge_index[0], edge_index[1]
    a = jnp.zeros((n, n), F32).at[dst, src].add(1.0)
    deg = jnp.sum(a, axis=1, keepdims=True)
    return jnp.where(deg > 0, a / jnp.maximum(deg, 1.0), 0.0)


# ------------------------------------- main ------------------------------------ #
if __name__ == "__main__":
    N, IN_DIM, HID = 24, 16, 32
    SAMPLE_SIZE, SAMPLE_TIME = 2, 3

    root = jax.random.PRNGKey(0)
    k_param, k_x, k_sample = jax.random.split(root, 3)
    params = init_params(k_param, IN_DIM, HID)
    packed = pack_params(params, HID)

    x = jax.random.normal(k_x, (N, IN_DIM), dtype=F32)
    # row-wise L1 normalization, mirroring process_graph's F.normalize(p=1, dim=1)
    x = x / jnp.maximum(jnp.sum(jnp.abs(x), axis=1, keepdims=True), 1e-12)

    # undirected ring + chord graph, plus self loops (as process_graph would add)
    srcs, dsts = [], []
    for i in range(N):
        for j in ((i + 1) % N, (i + 5) % N):
            srcs += [i, j]
            dsts += [j, i]
        srcs.append(i)
        dsts.append(i)
    edge_index = jnp.array([srcs, dsts], dtype=jnp.int32)

    # Static-graph preprocessing hoisted OUT of the jitted per-step forward.
    a_gcn = build_gcn_adj(edge_index, N)
    mean_adj = build_mean_adj(edge_index, N)

    fwd = jax.jit(functools.partial(gadnr_forward, hid=HID,
                                    sample_size=SAMPLE_SIZE, sample_time=SAMPLE_TIME))
    out = fwd(packed, x, a_gcn, mean_adj, k_sample)
    out = jax.block_until_ready(out)

    center_h0, degree_logits, feat_recon_list, neigh_recon_list = out
    assert center_h0.shape == (N, HID)
    assert degree_logits.shape == (N, 1)
    assert len(feat_recon_list) == SAMPLE_TIME and feat_recon_list[0].shape == (N, HID)
    assert len(neigh_recon_list) == SAMPLE_TIME
    det_t, det_g, hdim, trace_t, zq = neigh_recon_list[0]
    assert det_t.shape == (N,) and det_g.shape == (N,)
    assert hdim == HID and trace_t.shape == (N,) and zq.shape == (N,)
    for t in range(SAMPLE_TIME):
        vals = neigh_recon_list[t]
        assert all(bool(jnp.all(jnp.isfinite(a)))
                   for a in (vals[0], vals[1], vals[3], vals[4]))
    assert bool(jnp.all(jnp.isfinite(degree_logits)))
    assert bool(jnp.all(jnp.isfinite(feat_recon_list[0])))
    print("KERNEL_OK")
</pallas_src>

<mosaic_0001>
module attributes {stable_mosaic.version = 11 : i64} {
  func.func @_gadnr_fused_kernel(%arg0: memref<24x16xf32, #tpu.memory_space<vmem>>, %arg1: memref<24x24xf32, #tpu.memory_space<vmem>>, %arg2: memref<24x24xf32, #tpu.memory_space<vmem>>, %arg3: memref<144x32xf32, #tpu.memory_space<vmem>>, %arg4: memref<16x32xf32, #tpu.memory_space<vmem>>, %arg5: memref<32x128xf32, #tpu.memory_space<vmem>>, %arg6: memref<32x128xf32, #tpu.memory_space<vmem>>, %arg7: memref<13x32x32xf32, #tpu.memory_space<vmem>>, %arg8: memref<31x32xf32, #tpu.memory_space<vmem>>, %arg9: memref<24x32xf32, #tpu.memory_space<vmem>>, %arg10: memref<24x32xf32, #tpu.memory_space<vmem>>, %arg11: memref<3x24x8xf32, #tpu.memory_space<vmem>>) attributes {dimension_semantics = [], scalar_prefetch = 0 : i64, scratch_operands = 0 : i64, tpu.core_type = #tpu.core_type<tc>} {
    %c0 = arith.constant 0 : index
    %c0_0 = arith.constant 0 : index
    %0 = vector.load %arg8[%c0, %c0_0] : memref<31x32xf32, #tpu.memory_space<vmem>>, vector<31x32xf32>
    %c0_1 = arith.constant 0 : index
    %c0_2 = arith.constant 0 : index
    %1 = vector.load %arg0[%c0_1, %c0_2] : memref<24x16xf32, #tpu.memory_space<vmem>>, vector<24x16xf32>
    %c0_3 = arith.constant 0 : index
    %c0_4 = arith.constant 0 : index
    %2 = vector.load %arg4[%c0_3, %c0_4] : memref<16x32xf32, #tpu.memory_space<vmem>>, vector<16x32xf32>
    %cst = arith.constant dense<0.000000e+00> : vector<24x32xf32>
    %3 = tpu.matmul %1, %2, %cst {dimension_numbers = #tpu.dot_dimension_numbers<[1], [0], [0], [1], [0, 0, 1, 1], [], []>} : vector<24x16xf32>, vector<16x32xf32>, vector<24x32xf32> -> vector<24x32xf32>
    %4 = vector.extract_strided_slice %0 {offsets = [0, 0], sizes = [1, 32], strides = [1, 1]} : vector<31x32xf32> to vector<1x32xf32>
    %5 = vector.broadcast %4 : vector<1x32xf32> to vector<24x32xf32>
    %6 = arith.addf %3, %5 : vector<24x32xf32>
    %c0_5 = arith.constant 0 : index
    %c0_6 = arith.constant 0 : index
    %7 = vector.load %arg1[%c0_5, %c0_6] : memref<24x24xf32, #tpu.memory_space<vmem>>, vector<24x24xf32>
    %c0_7 = arith.constant 0 : index
    %c0_8 = arith.constant 0 : index
    %c0_9 = arith.constant 0 : index
    %8 = vector.load %arg7[%c0_7, %c0_8, %c0_9] : memref<13x32x32xf32, #tpu.memory_space<vmem>>, vector<1x32x32xf32>
    %9 = vector.shape_cast %8 : vector<1x32x32xf32> to vector<32x32xf32>
    %cst_10 = arith.constant dense<0.000000e+00> : vector<24x32xf32>
    %10 = tpu.matmul %6, %9, %cst_10 {dimension_numbers = #tpu.dot_dimension_numbers<[1], [0], [0], [1], [0, 0, 1, 1], [], []>} : vector<24x32xf32>, vector<32x32xf32>, vector<24x32xf32> -> vector<24x32xf32>
    %cst_11 = arith.constant dense<0.000000e+00> : vector<24x32xf32>
    %11 = tpu.matmul %7, %10, %cst_11 {dimension_numbers = #tpu.dot_dimension_numbers<[1], [0], [0], [1], [0, 0, 1, 1], [], []>} : vector<24x24xf32>, vector<24x32xf32>, vector<24x32xf32> -> vector<24x32xf32>
    %12 = vector.extract_strided_slice %0 {offsets = [1, 0], sizes = [1, 32], strides = [1, 1]} : vector<31x32xf32> to vector<1x32xf32>
    %13 = vector.broadcast %12 : vector<1x32xf32> to vector<24x32xf32>
    %14 = arith.addf %11, %13 : vector<24x32xf32>
    %c0_12 = arith.constant 0 : index
    %c0_13 = arith.constant 0 : index
    %15 = vector.load %arg9[%c0_12, %c0_13] : memref<24x32xf32, #tpu.memory_space<vmem>>, vector<24x32xf32>
    tpu.vector_store %arg9[%c0_12, %c0_13], %6 {strides = array<i32>} : memref<24x32xf32, #tpu.memory_space<vmem>>, vector<24x32xf32>,
    %c0_14 = arith.constant 0 : index
    %c0_15 = arith.constant 0 : index
    %16 = vector.load %arg2[%c0_14, %c0_15] : memref<24x24xf32, #tpu.memory_space<vmem>>, vector<24x24xf32>
    %c0_16 = arith.constant 0 : index
    %c0_17 = arith.constant 0 : index
    %17 = vector.load %arg5[%c0_16, %c0_17] : memref<32x128xf32, #tpu.memory_space<vmem>>, vector<32x128xf32>
    %cst_18 = arith.constant dense<0.000000e+00> : vector<24x128xf32>
    %18 = tpu.matmul %6, %17, %cst_18 {dimension_numbers = #tpu.dot_dimension_numbers<[1], [0], [0], [1], [0, 0, 1, 1], [], []>} : vector<24x32xf32>, vector<32x128xf32>, vector<24x128xf32> -> vector<24x128xf32>
    %19 = vector.extract_strided_slice %18 {offsets = [0, 64], sizes = [24, 32], strides = [1, 1]} : vector<24x128xf32> to vector<24x32xf32>
    %cst_19 = arith.constant dense<0.000000e+00> : vector<24x128xf32>
    %20 = tpu.matmul %16, %18, %cst_19 {dimension_numbers = #tpu.dot_dimension_numbers<[1], [0], [0], [1], [0, 0, 1, 1], [], []>} : vector<24x24xf32>, vector<24x128xf32>, vector<24x128xf32> -> vector<24x128xf32>
    %21 = arith.mulf %19, %19 : vector<24x32xf32>
    %cst_20 = arith.constant dense<0.000000e+00> : vector<24x32xf32>
    %22 = tpu.matmul %16, %21, %cst_20 {dimension_numbers = #tpu.dot_dimension_numbers<[1], [0], [0], [1], [0, 0, 1, 1], [], []>} : vector<24x24xf32>, vector<24x32xf32>, vector<24x32xf32> -> vector<24x32xf32>
    %23 = vector.extract_strided_slice %20 {offsets = [0, 0], sizes = [24, 32], strides = [1, 1]} : vector<24x128xf32> to vector<24x32xf32>
    %24 = vector.extract_strided_slice %0 {offsets = [2, 0], sizes = [1, 32], strides = [1, 1]} : vector<31x32xf32> to vector<1x32xf32>
    %25 = vector.broadcast %24 : vector<1x32xf32> to vector<24x32xf32>
    %26 = arith.addf %23, %25 : vector<24x32xf32>
    %27 = vector.extract_strided_slice %18 {offsets = [0, 32], sizes = [24, 32], strides = [1, 1]} : vector<24x128xf32> to vector<24x32xf32>
    %28 = arith.addf %26, %27 : vector<24x32xf32>
    %29 = vector.extract_strided_slice %20 {offsets = [0, 64], sizes = [24, 32], strides = [1, 1]} : vector<24x128xf32> to vector<24x32xf32>
    %30 = arith.mulf %29, %29 : vector<24x32xf32>
    %31 = arith.subf %22, %30 : vector<24x32xf32>
    %cst_21 = arith.constant 0.000000e+00 : f32
    %32 = vector.broadcast %cst_21 : f32 to vector<24x32xf32>
    %33 = arith.maximumf %31, %32 : vector<24x32xf32>
    %cst_22 = arith.constant 9.99999974E-6 : f32
    %34 = vector.broadcast %cst_22 : f32 to vector<24x32xf32>
    %35 = arith.addf %33, %34 : vector<24x32xf32>
    %36 = math.sqrt %35 : vector<24x32xf32>
    %37 = vector.extract_strided_slice %18 {offsets = [0, 96], sizes = [24, 32], strides = [1, 1]} : vector<24x128xf32> to vector<24x32xf32>
    %c1 = arith.constant 1 : index
    %c0_23 = arith.constant 0 : index
    %c0_24 = arith.constant 0 : index
    %38 = vector.load %arg7[%c1, %c0_23, %c0_24] : memref<13x32x32xf32, #tpu.memory_space<vmem>>, vector<1x32x32xf32>
    %39 = vector.shape_cast %38 : vector<1x32x32xf32> to vector<32x32xf32>
    %cst_25 = arith.constant dense<0.000000e+00> : vector<24x32xf32>
    %40 = tpu.matmul %36, %39, %cst_25 {dimension_numbers = #tpu.dot_dimension_numbers<[1], [0], [0], [1], [0, 0, 1, 1], [], []>} : vector<24x32xf32>, vector<32x32xf32>, vector<24x32xf32> -> vector<24x32xf32>
    %41 = arith.addf %37, %40 : vector<24x32xf32>
    %42 = vector.extract_strided_slice %0 {offsets = [3, 0], sizes = [1, 32], strides = [1, 1]} : vector<31x32xf32> to vector<1x32xf32>
    %43 = vector.broadcast %42 : vector<1x32xf32> to vector<24x32xf32>
    %44 = arith.addf %41, %43 : vector<24x32xf32>
    %c2 = arith.constant 2 : index
    %c0_26 = arith.constant 0 : index
    %c0_27 = arith.constant 0 : index
    %45 = vector.load %arg7[%c2, %c0_26, %c0_27] : memref<13x32x32xf32, #tpu.memory_space<vmem>>, vector<1x32x32xf32>
    %46 = vector.shape_cast %45 : vector<1x32x32xf32> to vector<32x32xf32>
    %cst_28 = arith.constant dense<0.000000e+00> : vector<24x32xf32>
    %47 = tpu.matmul %44, %46, %cst_28 {dimension_numbers = #tpu.dot_dimension_numbers<[1], [0], [0], [1], [0, 0, 1, 1], [], []>} : vector<24x32xf32>, vector<32x32xf32>, vector<24x32xf32> -> vector<24x32xf32>
    %48 = vector.extract_strided_slice %0 {offsets = [4, 0], sizes = [1, 32], strides = [1, 1]} : vector<31x32xf32> to vector<1x32xf32>
    %49 = vector.broadcast %48 : vector<1x32xf32> to vector<24x32xf32>
    %50 = arith.addf %47, %49 : vector<24x32xf32>
    %c0_29 = arith.constant 0 : index
    %c0_30 = arith.constant 0 : index
    %51 = vector.load %arg6[%c0_29, %c0_30] : memref<32x128xf32, #tpu.memory_space<vmem>>, vector<32x128xf32>
    %cst_31 = arith.constant dense<0.000000e+00> : vector<24x128xf32>
    %52 = tpu.matmul %14, %51, %cst_31 {dimension_numbers = #tpu.dot_dimension_numbers<[1], [0], [0], [1], [0, 0, 1, 1], [], []>} : vector<24x32xf32>, vector<32x128xf32>, vector<24x128xf32> -> vector<24x128xf32>
    %53 = vector.extract_strided_slice %52 {offsets = [0, 0], sizes = [24, 32], strides = [1, 1]} : vector<24x128xf32> to vector<24x32xf32>
    %54 = vector.extract_strided_slice %0 {offsets = [5, 0], sizes = [1, 32], strides = [1, 1]} : vector<31x32xf32> to vector<1x32xf32>
    %55 = vector.broadcast %54 : vector<1x32xf32> to vector<24x32xf32>
    %56 = arith.addf %53, %55 : vector<24x32xf32>
    %57 = vector.extract_strided_slice %52 {offsets = [0, 32], sizes = [24, 32], strides = [1, 1]} : vector<24x128xf32> to vector<24x32xf32>
    %58 = vector.extract_strided_slice %0 {offsets = [6, 0], sizes = [1, 32], strides = [1, 1]} : vector<31x32xf32> to vector<1x32xf32>
    %59 = vector.broadcast %58 : vector<1x32xf32> to vector<24x32xf32>
    %60 = arith.addf %57, %59 : vector<24x32xf32>
    %61 = math.exp %60 : vector<24x32xf32>
    %62 = vector.extract_strided_slice %52 {offsets = [0, 64], sizes = [24, 32], strides = [1, 1]} : vector<24x128xf32> to vector<24x32xf32>
    %63 = vector.extract_strided_slice %0 {offsets = [11, 0], sizes = [1, 32], strides = [1, 1]} : vector<31x32xf32> to vector<1x32xf32>
    %64 = vector.broadcast %63 : vector<1x32xf32> to vector<24x32xf32>
    %65 = arith.addf %62, %64 : vector<24x32xf32>
    %cst_32 = arith.constant dense<0.000000e+00> : vector<32xf32>
    %66 = vector.multi_reduction <add>, %65, %cst_32 [0] : vector<24x32xf32> to vector<32xf32>
    %67 = vector.shape_cast %66 : vector<32xf32> to vector<1x32xf32>
    %cst_33 = arith.constant 2.400000e+01 : f32
    %68 = vector.broadcast %cst_33 : f32 to vector<1x32xf32>
    %69 = arith.divf %67, %68 : vector<1x32xf32>
    %70 = vector.broadcast %69 : vector<1x32xf32> to vector<24x32xf32>
    %71 = arith.subf %65, %70 : vector<24x32xf32>
    %72 = arith.mulf %71, %71 : vector<24x32xf32>
    %cst_34 = arith.constant dense<0.000000e+00> : vector<32xf32>
    %73 = vector.multi_reduction <add>, %72, %cst_34 [0] : vector<24x32xf32> to vector<32xf32>
    %74 = vector.shape_cast %73 : vector<32xf32> to vector<1x32xf32>
    %cst_35 = arith.constant 2.400000e+01 : f32
    %75 = vector.broadcast %cst_35 : f32 to vector<1x32xf32>
    %76 = arith.divf %74, %75 : vector<1x32xf32>
    %77 = vector.broadcast %69 : vector<1x32xf32> to vector<24x32xf32>
    %78 = arith.subf %65, %77 : vector<24x32xf32>
    %cst_36 = arith.constant 9.99999974E-6 : f32
    %79 = vector.broadcast %cst_36 : f32 to vector<1x32xf32>
    %80 = arith.addf %76, %79 : vector<1x32xf32>
    %81 = math.rsqrt %80 : vector<1x32xf32>
    %82 = vector.broadcast %81 : vector<1x32xf32> to vector<24x32xf32>
    %83 = arith.mulf %78, %82 : vector<24x32xf32>
    %84 = vector.extract_strided_slice %0 {offsets = [17, 0], sizes = [1, 32], strides = [1, 1]} : vector<31x32xf32> to vector<1x32xf32>
    %85 = vector.broadcast %84 : vector<1x32xf32> to vector<24x32xf32>
    %86 = arith.mulf %83, %85 : vector<24x32xf32>
    %87 = vector.extract_strided_slice %0 {offsets = [18, 0], sizes = [1, 32], strides = [1, 1]} : vector<31x32xf32> to vector<1x32xf32>
    %88 = vector.broadcast %87 : vector<1x32xf32> to vector<24x32xf32>
    %89 = arith.addf %86, %88 : vector<24x32xf32>
    %cst_37 = arith.constant 0.000000e+00 : f32
    %90 = vector.broadcast %cst_37 : f32 to vector<24x32xf32>
    %91 = arith.maximumf %89, %90 : vector<24x32xf32>
    %92 = vector.extract_strided_slice %52 {offsets = [0, 96], sizes = [24, 32], strides = [1, 1]} : vector<24x128xf32> to vector<24x32xf32>
    %93 = vector.extract_strided_slice %0 {offsets = [23, 0], sizes = [1, 32], strides = [1, 1]} : vector<31x32xf32> to vector<1x32xf32>
    %94 = vector.broadcast %93 : vector<1x32xf32> to vector<24x32xf32>
    %95 = arith.addf %92, %94 : vector<24x32xf32>
    %cst_38 = arith.constant dense<0.000000e+00> : vector<32xf32>
    %96 = vector.multi_reduction <add>, %95, %cst_38 [0] : vector<24x32xf32> to vector<32xf32>
    %97 = vector.shape_cast %96 : vector<32xf32> to vector<1x32xf32>
    %cst_39 = arith.constant 2.400000e+01 : f32
    %98 = vector.broadcast %cst_39 : f32 to vector<1x32xf32>
    %99 = arith.divf %97, %98 : vector<1x32xf32>
    %100 = vector.broadcast %99 : vector<1x32xf32> to vector<24x32xf32>
    %101 = arith.subf %95, %100 : vector<24x32xf32>
    %102 = arith.mulf %101, %101 : vector<24x32xf32>
    %cst_40 = arith.constant dense<0.000000e+00> : vector<32xf32>
    %103 = vector.multi_reduction <add>, %102, %cst_40 [0] : vector<24x32xf32> to vector<32xf32>
    %104 = vector.shape_cast %103 : vector<32xf32> to vector<1x32xf32>
    %cst_41 = arith.constant 2.400000e+01 : f32
    %105 = vector.broadcast %cst_41 : f32 to vector<1x32xf32>
    %106 = arith.divf %104, %105 : vector<1x32xf32>
    %107 = vector.broadcast %99 : vector<1x32xf32> to vector<24x32xf32>
    %108 = arith.subf %95, %107 : vector<24x32xf32>
    %cst_42 = arith.constant 9.99999974E-6 : f32
    %109 = vector.broadcast %cst_42 : f32 to vector<1x32xf32>
    %110 = arith.addf %106, %109 : vector<1x32xf32>
    %111 = math.rsqrt %110 : vector<1x32xf32>
    %112 = vector.broadcast %111 : vector<1x32xf32> to vector<24x32xf32>
    %113 = arith.mulf %108, %112 : vector<24x32xf32>
    %114 = vector.extract_strided_slice %0 {offsets = [27, 0], sizes = [1, 32], strides = [1, 1]} : vector<31x32xf32> to vector<1x32xf32>
    %115 = vector.broadcast %114 : vector<1x32xf32> to vector<24x32xf32>
    %116 = arith.mulf %113, %115 : vector<24x32xf32>
    %117 = vector.extract_strided_slice %0 {offsets = [28, 0], sizes = [1, 32], strides = [1, 1]} : vector<31x32xf32> to vector<1x32xf32>
    %118 = vector.broadcast %117 : vector<1x32xf32> to vector<24x32xf32>
    %119 = arith.addf %116, %118 : vector<24x32xf32>
    %cst_43 = arith.constant 0.000000e+00 : f32
    %120 = vector.broadcast %cst_43 : f32 to vector<24x32xf32>
    %121 = arith.maximumf %119, %120 : vector<24x32xf32>
    %c7 = arith.constant 7 : index
    %c0_44 = arith.constant 0 : index
    %c0_45 = arith.constant 0 : index
    %122 = vector.load %arg7[%c7, %c0_44, %c0_45] : memref<13x32x32xf32, #tpu.memory_space<vmem>>, vector<1x32x32xf32>
    %123 = vector.shape_cast %122 : vector<1x32x32xf32> to vector<32x32xf32>
    %cst_46 = arith.constant dense<0.000000e+00> : vector<24x32xf32>
    %124 = tpu.matmul %91, %123, %cst_46 {dimension_numbers = #tpu.dot_dimension_numbers<[1], [0], [0], [1], [0, 0, 1, 1], [], []>} : vector<24x32xf32>, vector<32x32xf32>, vector<24x32xf32> -> vector<24x32xf32>
    %125 = vector.extract_strided_slice %0 {offsets = [12, 0], sizes = [1, 32], strides = [1, 1]} : vector<31x32xf32> to vector<1x32xf32>
    %126 = vector.broadcast %125 : vector<1x32xf32> to vector<24x32xf32>
    %127 = arith.addf %124, %126 : vector<24x32xf32>
    %cst_47 = arith.constant dense<0.000000e+00> : vector<32xf32>
    %128 = vector.multi_reduction <add>, %127, %cst_47 [0] : vector<24x32xf32> to vector<32xf32>
    %129 = vector.shape_cast %128 : vector<32xf32> to vector<1x32xf32>
    %cst_48 = arith.constant 2.400000e+01 : f32
    %130 = vector.broadcast %cst_48 : f32 to vector<1x32xf32>
    %131 = arith.divf %129, %130 : vector<1x32xf32>
    %132 = vector.broadcast %131 : vector<1x32xf32> to vector<24x32xf32>
    %133 = arith.subf %127, %132 : vector<24x32xf32>
    %134 = arith.mulf %133, %133 : vector<24x32xf32>
    %cst_49 = arith.constant dense<0.000000e+00> : vector<32xf32>
    %135 = vector.multi_reduction <add>, %134, %cst_49 [0] : vector<24x32xf32> to vector<32xf32>
    %136 = vector.shape_cast %135 : vector<32xf32> to vector<1x32xf32>
    %cst_50 = arith.constant 2.400000e+01 : f32
    %137 = vector.broadcast %cst_50 : f32 to vector<1x32xf32>
    %138 = arith.divf %136, %137 : vector<1x32xf32>
    %139 = vector.broadcast %131 : vector<1x32xf32> to vector<24x32xf32>
    %140 = arith.subf %127, %139 : vector<24x32xf32>
    %cst_51 = arith.constant 9.99999974E-6 : f32
    %141 = vector.broadcast %cst_51 : f32 to vector<1x32xf32>
    %142 = arith.addf %138, %141 : vector<1x32xf32>
    %143 = math.rsqrt %142 : vector<1x32xf32>
    %144 = vector.broadcast %143 : vector<1x32xf32> to vector<24x32xf32>
    %145 = arith.mulf %140, %144 : vector<24x32xf32>
    %146 = vector.extract_strided_slice %0 {offsets = [19, 0], sizes = [1, 32], strides = [1, 1]} : vector<31x32xf32> to vector<1x32xf32>
    %147 = vector.broadcast %146 : vector<1x32xf32> to vector<24x32xf32>
    %148 = arith.mulf %145, %147 : vector<24x32xf32>
    %149 = vector.extract_strided_slice %0 {offsets = [20, 0], sizes = [1, 32], strides = [1, 1]} : vector<31x32xf32> to vector<1x32xf32>
    %150 = vector.broadcast %149 : vector<1x32xf32> to vector<24x32xf32>
    %151 = arith.addf %148, %150 : vector<24x32xf32>
    %cst_52 = arith.constant 0.000000e+00 : f32
    %152 = vector.broadcast %cst_52 : f32 to vector<24x32xf32>
    %153 = arith.maximumf %151, %152 : vector<24x32xf32>
    %c8 = arith.constant 8 : index
    %c0_53 = arith.constant 0 : index
    %c0_54 = arith.constant 0 : index
    %154 = vector.load %arg7[%c8, %c0_53, %c0_54] : memref<13x32x32xf32, #tpu.memory_space<vmem>>, vector<1x32x32xf32>
    %155 = vector.shape_cast %154 : vector<1x32x32xf32> to vector<32x32xf32>
    %cst_55 = arith.constant dense<0.000000e+00> : vector<24x32xf32>
    %156 = tpu.matmul %153, %155, %cst_55 {dimension_numbers = #tpu.dot_dimension_numbers<[1], [0], [0], [1], [0, 0, 1, 1], [], []>} : vector<24x32xf32>, vector<32x32xf32>, vector<24x32xf32> -> vector<24x32xf32>
    %157 = vector.extract_strided_slice %0 {offsets = [13, 0], sizes = [1, 32], strides = [1, 1]} : vector<31x32xf32> to vector<1x32xf32>
    %158 = vector.broadcast %157 : vector<1x32xf32> to vector<24x32xf32>
    %159 = arith.addf %156, %158 : vector<24x32xf32>
    %cst_56 = arith.constant dense<0.000000e+00> : vector<32xf32>
    %160 = vector.multi_reduction <add>, %159, %cst_56 [0] : vector<24x32xf32> to vector<32xf32>
    %161 = vector.shape_cast %160 : vector<32xf32> to vector<1x32xf32>
    %cst_57 = arith.constant 2.400000e+01 : f32
    %162 = vector.broadcast %cst_57 : f32 to vector<1x32xf32>
    %163 = arith.divf %161, %162 : vector<1x32xf32>
    %164 = vector.broadcast %163 : vector<1x32xf32> to vector<24x32xf32>
    %165 = arith.subf %159, %164 : vector<24x32xf32>
    %166 = arith.mulf %165, %165 : vector<24x32xf32>
    %cst_58 = arith.constant dense<0.000000e+00> : vector<32xf32>
    %167 = vector.multi_reduction <add>, %166, %cst_58 [0] : vector<24x32xf32> to vector<32xf32>
    %168 = vector.shape_cast %167 : vector<32xf32> to vector<1x32xf32>
    %cst_59 = arith.constant 2.400000e+01 : f32
    %169 = vector.broadcast %cst_59 : f32 to vector<1x32xf32>
    %170 = arith.divf %168, %169 : vector<1x32xf32>
    %171 = vector.broadcast %163 : vector<1x32xf32> to vector<24x32xf32>
    %172 = arith.subf %159, %171 : vector<24x32xf32>
    %cst_60 = arith.constant 9.99999974E-6 : f32
    %173 = vector.broadcast %cst_60 : f32 to vector<1x32xf32>
    %174 = arith.addf %170, %173 : vector<1x32xf32>
    %175 = math.rsqrt %174 : vector<1x32xf32>
    %176 = vector.broadcast %175 : vector<1x32xf32> to vector<24x32xf32>
    %177 = arith.mulf %172, %176 : vector<24x32xf32>
    %178 = vector.extract_strided_slice %0 {offsets = [21, 0], sizes = [1, 32], strides = [1, 1]} : vector<31x32xf32> to vector<1x32xf32>
    %179 = vector.broadcast %178 : vector<1x32xf32> to vector<24x32xf32>
    %180 = arith.mulf %177, %179 : vector<24x32xf32>
    %181 = vector.extract_strided_slice %0 {offsets = [22, 0], sizes = [1, 32], strides = [1, 1]} : vector<31x32xf32> to vector<1x32xf32>
    %182 = vector.broadcast %181 : vector<1x32xf32> to vector<24x32xf32>
    %183 = arith.addf %180, %182 : vector<24x32xf32>
    %cst_61 = arith.constant 0.000000e+00 : f32
    %184 = vector.broadcast %cst_61 : f32 to vector<24x32xf32>
    %185 = arith.maximumf %183, %184 : vector<24x32xf32>
    %c9 = arith.constant 9 : index
    %c0_62 = arith.constant 0 : index
    %c0_63 = arith.constant 0 : index
    %186 = vector.load %arg7[%c9, %c0_62, %c0_63] : memref<13x32x32xf32, #tpu.memory_space<vmem>>, vector<1x32x32xf32>
    %187 = vector.shape_cast %186 : vector<1x32x32xf32> to vector<32x32xf32>
    %cst_64 = arith.constant dense<0.000000e+00> : vector<24x32xf32>
    %188 = tpu.matmul %185, %187, %cst_64 {dimension_numbers = #tpu.dot_dimension_numbers<[1], [0], [0], [1], [0, 0, 1, 1], [], []>} : vector<24x32xf32>, vector<32x32xf32>, vector<24x32xf32> -> vector<24x32xf32>
    %189 = vector.extract_strided_slice %0 {offsets = [14, 0], sizes = [1, 32], strides = [1, 1]} : vector<31x32xf32> to vector<1x32xf32>
    %190 = vector.broadcast %189 : vector<1x32xf32> to vector<24x32xf32>
    %191 = arith.addf %188, %190 : vector<24x32xf32>
    %cst_65 = arith.constant 0.000000e+00 : f32
    %192 = vector.broadcast %cst_65 : f32 to vector<24x32xf32>
    %193 = arith.maximumf %191, %192 : vector<24x32xf32>
    %194 = vector.extract_strided_slice %0 {offsets = [15, 0], sizes = [1, 32], strides = [1, 1]} : vector<31x32xf32> to vector<1x32xf32>
    %195 = vector.broadcast %194 : vector<1x32xf32> to vector<24x32xf32>
    %196 = arith.mulf %193, %195 : vector<24x32xf32>
    %197 = vector.extract_strided_slice %0 {offsets = [16, 0], sizes = [1, 32], strides = [1, 1]} : vector<31x32xf32> to vector<1x32xf32>
    %198 = vector.broadcast %197 : vector<1x32xf32> to vector<24x32xf32>
    %199 = arith.addf %196, %198 : vector<24x32xf32>
    %cst_66 = arith.constant 0.000000e+00 : f32
    %200 = vector.broadcast %cst_66 : f32 to vector<24x32xf32>
    %201 = arith.maximumf %199, %200 : vector<24x32xf32>
    %202 = vector.extract_strided_slice %201 {offsets = [0, 0], sizes = [24, 1], strides = [1, 1]} : vector<24x32xf32> to vector<24x1xf32>
    %c10 = arith.constant 10 : index
    %c0_67 = arith.constant 0 : index
    %c0_68 = arith.constant 0 : index
    %203 = vector.load %arg7[%c10, %c0_67, %c0_68] : memref<13x32x32xf32, #tpu.memory_space<vmem>>, vector<1x32x32xf32>
    %204 = vector.shape_cast %203 : vector<1x32x32xf32> to vector<32x32xf32>
    %cst_69 = arith.constant dense<0.000000e+00> : vector<24x32xf32>
    %205 = tpu.matmul %121, %204, %cst_69 {dimension_numbers = #tpu.dot_dimension_numbers<[1], [0], [0], [1], [0, 0, 1, 1], [], []>} : vector<24x32xf32>, vector<32x32xf32>, vector<24x32xf32> -> vector<24x32xf32>
    %206 = vector.extract_strided_slice %0 {offsets = [24, 0], sizes = [1, 32], strides = [1, 1]} : vector<31x32xf32> to vector<1x32xf32>
    %207 = vector.broadcast %206 : vector<1x32xf32> to vector<24x32xf32>
    %208 = arith.addf %205, %207 : vector<24x32xf32>
    %cst_70 = arith.constant dense<0.000000e+00> : vector<32xf32>
    %209 = vector.multi_reduction <add>, %208, %cst_70 [0] : vector<24x32xf32> to vector<32xf32>
    %210 = vector.shape_cast %209 : vector<32xf32> to vector<1x32xf32>
    %cst_71 = arith.constant 2.400000e+01 : f32
    %211 = vector.broadcast %cst_71 : f32 to vector<1x32xf32>
    %212 = arith.divf %210, %211 : vector<1x32xf32>
    %213 = vector.broadcast %212 : vector<1x32xf32> to vector<24x32xf32>
    %214 = arith.subf %208, %213 : vector<24x32xf32>
    %215 = arith.mulf %214, %214 : vector<24x32xf32>
    %cst_72 = arith.constant dense<0.000000e+00> : vector<32xf32>
    %216 = vector.multi_reduction <add>, %215, %cst_72 [0] : vector<24x32xf32> to vector<32xf32>
    %217 = vector.shape_cast %216 : vector<32xf32> to vector<1x32xf32>
    %cst_73 = arith.constant 2.400000e+01 : f32
    %218 = vector.broadcast %cst_73 : f32 to vector<1x32xf32>
    %219 = arith.divf %217, %218 : vector<1x32xf32>
    %220 = vector.broadcast %212 : vector<1x32xf32> to vector<24x32xf32>
    %221 = arith.subf %208, %220 : vector<24x32xf32>
    %cst_74 = arith.constant 9.99999974E-6 : f32
    %222 = vector.broadcast %cst_74 : f32 to vector<1x32xf32>
    %223 = arith.addf %219, %222 : vector<1x32xf32>
    %224 = math.rsqrt %223 : vector<1x32xf32>
    %225 = vector.broadcast %224 : vector<1x32xf32> to vector<24x32xf32>
    %226 = arith.mulf %221, %225 : vector<24x32xf32>
    %227 = vector.extract_strided_slice %0 {offsets = [29, 0], sizes = [1, 32], strides = [1, 1]} : vector<31x32xf32> to vector<1x32xf32>
    %228 = vector.broadcast %227 : vector<1x32xf32> to vector<24x32xf32>
    %229 = arith.mulf %226, %228 : vector<24x32xf32>
    %230 = vector.extract_strided_slice %0 {offsets = [30, 0], sizes = [1, 32], strides = [1, 1]} : vector<31x32xf32> to vector<1x32xf32>
    %231 = vector.broadcast %230 : vector<1x32xf32> to vector<24x32xf32>
    %232 = arith.addf %229, %231 : vector<24x32xf32>
    %cst_75 = arith.constant 0.000000e+00 : f32
    %233 = vector.broadcast %cst_75 : f32 to vector<24x32xf32>
    %234 = arith.maximumf %232, %233 : vector<24x32xf32>
    %c11 = arith.constant 11 : index
    %c0_76 = arith.constant 0 : index
    %c0_77 = arith.constant 0 : index
    %235 = vector.load %arg7[%c11, %c0_76, %c0_77] : memref<13x32x32xf32, #tpu.memory_space<vmem>>, vector<1x32x32xf32>
    %236 = vector.shape_cast %235 : vector<1x32x32xf32> to vector<32x32xf32>
    %cst_78 = arith.constant dense<0.000000e+00> : vector<24x32xf32>
    %237 = tpu.matmul %234, %236, %cst_78 {dimension_numbers = #tpu.dot_dimension_numbers<[1], [0], [0], [1], [0, 0, 1, 1], [], []>} : vector<24x32xf32>, vector<32x32xf32>, vector<24x32xf32> -> vector<24x32xf32>
    %238 = vector.extract_strided_slice %0 {offsets = [25, 0], sizes = [1, 32], strides = [1, 1]} : vector<31x32xf32> to vector<1x32xf32>
    %239 = vector.broadcast %238 : vector<1x32xf32> to vector<24x32xf32>
    %240 = arith.addf %237, %239 : vector<24x32xf32>
    %cst_79 = arith.constant 0.000000e+00 : f32
    %241 = vector.broadcast %cst_79 : f32 to vector<24x32xf32>
    %242 = arith.maximumf %240, %241 : vector<24x32xf32>
    %c12 = arith.constant 12 : index
    %c0_80 = arith.constant 0 : index
    %c0_81 = arith.constant 0 : index
    %243 = vector.load %arg7[%c12, %c0_80, %c0_81] : memref<13x32x32xf32, #tpu.memory_space<vmem>>, vector<1x32x32xf32>
    %244 = vector.shape_cast %243 : vector<1x32x32xf32> to vector<32x32xf32>
    %cst_82 = arith.constant dense<0.000000e+00> : vector<24x32xf32>
    %245 = tpu.matmul %242, %244, %cst_82 {dimension_numbers = #tpu.dot_dimension_numbers<[1], [0], [0], [1], [0, 0, 1, 1], [], []>} : vector<24x32xf32>, vector<32x32xf32>, vector<24x32xf32> -> vector<24x32xf32>
    %246 = vector.extract_strided_slice %0 {offsets = [26, 0], sizes = [1, 32], strides = [1, 1]} : vector<31x32xf32> to vector<1x32xf32>
    %247 = vector.broadcast %246 : vector<1x32xf32> to vector<24x32xf32>
    %248 = arith.addf %245, %247 : vector<24x32xf32>
    %c0_83 = arith.constant 0 : index
    %c0_84 = arith.constant 0 : index
    %249 = vector.load %arg10[%c0_83, %c0_84] : memref<24x32xf32, #tpu.memory_space<vmem>>, vector<24x32xf32>
    tpu.vector_store %arg10[%c0_83, %c0_84], %248 {strides = array<i32>} : memref<24x32xf32, #tpu.memory_space<vmem>>, vector<24x32xf32>,
    %250 = tpu.concatenate %56, %56, %56, %56, %56, %56 in 0 : vector<24x32xf32>, vector<24x32xf32>, vector<24x32xf32>, vector<24x32xf32>, vector<24x32xf32>, vector<24x32xf32> -> vector<144x32xf32>
    %251 = tpu.concatenate %61, %61, %61, %61, %61, %61 in 0 : vector<24x32xf32>, vector<24x32xf32>, vector<24x32xf32>, vector<24x32xf32>, vector<24x32xf32>, vector<24x32xf32> -> vector<144x32xf32>
    %c0_85 = arith.constant 0 : index
    %c0_86 = arith.constant 0 : index
    %252 = vector.load %arg3[%c0_85, %c0_86] : memref<144x32xf32, #tpu.memory_space<vmem>>, vector<144x32xf32>
    %253 = arith.mulf %251, %252 : vector<144x32xf32>
    %254 = arith.addf %250, %253 : vector<144x32xf32>
    %c3 = arith.constant 3 : index
    %c0_87 = arith.constant 0 : index
    %c0_88 = arith.constant 0 : index
    %255 = vector.load %arg7[%c3, %c0_87, %c0_88] : memref<13x32x32xf32, #tpu.memory_space<vmem>>, vector<1x32x32xf32>
    %256 = vector.shape_cast %255 : vector<1x32x32xf32> to vector<32x32xf32>
    %cst_89 = arith.constant dense<0.000000e+00> : vector<144x32xf32>
    %257 = tpu.matmul %254, %256, %cst_89 {dimension_numbers = #tpu.dot_dimension_numbers<[1], [0], [0], [1], [0, 0, 1, 1], [], []>} : vector<144x32xf32>, vector<32x32xf32>, vector<144x32xf32> -> vector<144x32xf32>
    %258 = vector.extract_strided_slice %0 {offsets = [7, 0], sizes = [1, 32], strides = [1, 1]} : vector<31x32xf32> to vector<1x32xf32>
    %259 = vector.broadcast %258 : vector<1x32xf32> to vector<144x32xf32>
    %260 = arith.addf %257, %259 : vector<144x32xf32>
    %cst_90 = arith.constant 0.000000e+00 : f32
    %261 = vector.broadcast %cst_90 : f32 to vector<144x32xf32>
    %262 = arith.maximumf %260, %261 : vector<144x32xf32>
    %c4 = arith.constant 4 : index
    %c0_91 = arith.constant 0 : index
    %c0_92 = arith.constant 0 : index
    %263 = vector.load %arg7[%c4, %c0_91, %c0_92] : memref<13x32x32xf32, #tpu.memory_space<vmem>>, vector<1x32x32xf32>
    %264 = vector.shape_cast %263 : vector<1x32x32xf32> to vector<32x32xf32>
    %cst_93 = arith.constant dense<0.000000e+00> : vector<144x32xf32>
    %265 = tpu.matmul %262, %264, %cst_93 {dimension_numbers = #tpu.dot_dimension_numbers<[1], [0], [0], [1], [0, 0, 1, 1], [], []>} : vector<144x32xf32>, vector<32x32xf32>, vector<144x32xf32> -> vector<144x32xf32>
    %266 = vector.extract_strided_slice %0 {offsets = [8, 0], sizes = [1, 32], strides = [1, 1]} : vector<31x32xf32> to vector<1x32xf32>
    %267 = vector.broadcast %266 : vector<1x32xf32> to vector<144x32xf32>
    %268 = arith.addf %265, %267 : vector<144x32xf32>
    %cst_94 = arith.constant 0.000000e+00 : f32
    %269 = vector.broadcast %cst_94 : f32 to vector<144x32xf32>
    %270 = arith.maximumf %268, %269 : vector<144x32xf32>
    %c5 = arith.constant 5 : index
    %c0_95 = arith.constant 0 : index
    %c0_96 = arith.constant 0 : index
    %271 = vector.load %arg7[%c5, %c0_95, %c0_96] : memref<13x32x32xf32, #tpu.memory_space<vmem>>, vector<1x32x32xf32>
    %272 = vector.shape_cast %271 : vector<1x32x32xf32> to vector<32x32xf32>
    %cst_97 = arith.constant dense<0.000000e+00> : vector<144x32xf32>
    %273 = tpu.matmul %270, %272, %cst_97 {dimension_numbers = #tpu.dot_dimension_numbers<[1], [0], [0], [1], [0, 0, 1, 1], [], []>} : vector<144x32xf32>, vector<32x32xf32>, vector<144x32xf32> -> vector<144x32xf32>
    %274 = vector.extract_strided_slice %0 {offsets = [9, 0], sizes = [1, 32], strides = [1, 1]} : vector<31x32xf32> to vector<1x32xf32>
    %275 = vector.broadcast %274 : vector<1x32xf32> to vector<144x32xf32>
    %276 = arith.addf %273, %275 : vector<144x32xf32>
    %cst_98 = arith.constant 0.000000e+00 : f32
    %277 = vector.broadcast %cst_98 : f32 to vector<144x32xf32>
    %278 = arith.maximumf %276, %277 : vector<144x32xf32>
    %c6 = arith.constant 6 : index
    %c0_99 = arith.constant 0 : index
    %c0_100 = arith.constant 0 : index
    %279 = vector.load %arg7[%c6, %c0_99, %c0_100] : memref<13x32x32xf32, #tpu.memory_space<vmem>>, vector<1x32x32xf32>
    %280 = vector.shape_cast %279 : vector<1x32x32xf32> to vector<32x32xf32>
    %cst_101 = arith.constant dense<0.000000e+00> : vector<144x32xf32>
    %281 = tpu.matmul %278, %280, %cst_101 {dimension_numbers = #tpu.dot_dimension_numbers<[1], [0], [0], [1], [0, 0, 1, 1], [], []>} : vector<144x32xf32>, vector<32x32xf32>, vector<144x32xf32> -> vector<144x32xf32>
    %282 = vector.extract_strided_slice %0 {offsets = [10, 0], sizes = [1, 32], strides = [1, 1]} : vector<31x32xf32> to vector<1x32xf32>
    %283 = vector.broadcast %282 : vector<1x32xf32> to vector<144x32xf32>
    %284 = arith.addf %281, %283 : vector<144x32xf32>
    %285 = arith.mulf %50, %50 : vector<24x32xf32>
    %cst_102 = arith.constant dense<0.000000e+00> : vector<24xf32>
    %286 = vector.multi_reduction <add>, %285, %cst_102 [1] : vector<24x32xf32> to vector<24xf32>
    %287 = vector.shape_cast %286 : vector<24xf32> to vector<24x1xf32>
    %cst_103 = arith.constant 1.000000e+00 : f32
    %288 = vector.broadcast %cst_103 : f32 to vector<24x1xf32>
    %289 = arith.addf %288, %287 : vector<24x1xf32>
    %290 = tpu.iota {dimensions = array<i32: 1>} : vector<24x8xi32>
    %291 = vector.extract_strided_slice %284 {offsets = [0, 0], sizes = [24, 32], strides = [1, 1]} : vector<144x32xf32> to vector<24x32xf32>
    %292 = vector.extract_strided_slice %284 {offsets = [24, 0], sizes = [24, 32], strides = [1, 1]} : vector<144x32xf32> to vector<24x32xf32>
    %cst_104 = arith.constant 0.000000e+00 : f32
    %293 = vector.broadcast %cst_104 : f32 to vector<24x32xf32>
    %294 = arith.addf %293, %291 : vector<24x32xf32>
    %295 = arith.addf %294, %292 : vector<24x32xf32>
    %cst_105 = arith.constant 5.000000e-01 : f32
    %296 = vector.broadcast %cst_105 : f32 to vector<24x32xf32>
    %297 = arith.mulf %295, %296 : vector<24x32xf32>
    %298 = arith.subf %291, %297 : vector<24x32xf32>
    %299 = arith.mulf %298, %298 : vector<24x32xf32>
    %cst_106 = arith.constant 0.000000e+00 : f32
    %300 = vector.broadcast %cst_106 : f32 to vector<24x32xf32>
    %301 = arith.addf %300, %299 : vector<24x32xf32>
    %302 = arith.subf %292, %297 : vector<24x32xf32>
    %303 = arith.mulf %302, %302 : vector<24x32xf32>
    %304 = arith.addf %301, %303 : vector<24x32xf32>
    %cst_107 = arith.constant 1.000000e+00 : f32
    %305 = vector.broadcast %cst_107 : f32 to vector<24x32xf32>
    %306 = arith.divf %304, %305 : vector<24x32xf32>
    %307 = math.sqrt %306 : vector<24x32xf32>
    %308 = arith.mulf %307, %307 : vector<24x32xf32>
    %cst_108 = arith.constant dense<0.000000e+00> : vector<24xf32>
    %309 = vector.multi_reduction <add>, %308, %cst_108 [1] : vector<24x32xf32> to vector<24xf32>
    %310 = vector.shape_cast %309 : vector<24xf32> to vector<24x1xf32>
    %cst_109 = arith.constant 5.000000e-01 : f32
    %311 = vector.broadcast %cst_109 : f32 to vector<24x1xf32>
    %312 = arith.mulf %311, %310 : vector<24x1xf32>
    %cst_110 = arith.constant 1.000000e+00 : f32
    %313 = vector.broadcast %cst_110 : f32 to vector<24x1xf32>
    %314 = arith.addf %313, %312 : vector<24x1xf32>
    %315 = tpu.reciprocal %314 {approx = true} : vector<24x1xf32> -> vector<24x1xf32>
    %cst_111 = arith.constant 5.000000e-01 : f32
    %316 = vector.broadcast %cst_111 : f32 to vector<24x1xf32>
    %317 = arith.mulf %316, %315 : vector<24x1xf32>
    %318 = arith.mulf %50, %307 : vector<24x32xf32>
    %cst_112 = arith.constant dense<0.000000e+00> : vector<24xf32>
    %319 = vector.multi_reduction <add>, %318, %cst_112 [1] : vector<24x32xf32> to vector<24xf32>
    %320 = vector.shape_cast %319 : vector<24xf32> to vector<24x1xf32>
    %321 = arith.mulf %317, %320 : vector<24x1xf32>
    %322 = arith.mulf %321, %320 : vector<24x1xf32>
    %323 = arith.subf %287, %322 : vector<24x1xf32>
    %cst_113 = arith.constant 3.200000e+01 : f32
    %324 = vector.broadcast %cst_113 : f32 to vector<24x1xf32>
    %325 = arith.addf %323, %324 : vector<24x1xf32>
    %326 = arith.mulf %317, %310 : vector<24x1xf32>
    %327 = arith.subf %325, %326 : vector<24x1xf32>
    %328 = arith.subf %297, %28 : vector<24x32xf32>
    %329 = arith.mulf %328, %307 : vector<24x32xf32>
    %cst_114 = arith.constant dense<0.000000e+00> : vector<24xf32>
    %330 = vector.multi_reduction <add>, %329, %cst_114 [1] : vector<24x32xf32> to vector<24xf32>
    %331 = vector.shape_cast %330 : vector<24xf32> to vector<24x1xf32>
    %332 = arith.mulf %328, %328 : vector<24x32xf32>
    %cst_115 = arith.constant dense<0.000000e+00> : vector<24xf32>
    %333 = vector.multi_reduction <add>, %332, %cst_115 [1] : vector<24x32xf32> to vector<24xf32>
    %334 = vector.shape_cast %333 : vector<24xf32> to vector<24x1xf32>
    %335 = arith.mulf %317, %331 : vector<24x1xf32>
    %336 = arith.mulf %335, %331 : vector<24x1xf32>
    %337 = arith.subf %334, %336 : vector<24x1xf32>
    %c0_i32 = arith.constant 0 : i32
    %338 = vector.broadcast %c0_i32 : i32 to vector<24x8xi32>
    %339 = arith.cmpi eq, %290, %338 : vector<24x8xi32>
    %cst_116 = arith.constant 0.000000e+00 : f32
    %340 = vector.shape_cast %289 : vector<24x1xf32> to vector<24x1xf32>
    %341 = vector.broadcast %340 : vector<24x1xf32> to vector<24x8xf32>
    %342 = vector.broadcast %cst_116 : f32 to vector<24x8xf32>
    %343 = arith.select %339, %341, %342 : vector<24x8xi1>, vector<24x8xf32>
    %c1_i32 = arith.constant 1 : i32
    %344 = vector.broadcast %c1_i32 : i32 to vector<24x8xi32>
    %345 = arith.cmpi eq, %290, %344 : vector<24x8xi32>
    %cst_117 = arith.constant 0.000000e+00 : f32
    %346 = vector.shape_cast %314 : vector<24x1xf32> to vector<24x1xf32>
    %347 = vector.broadcast %346 : vector<24x1xf32> to vector<24x8xf32>
    %348 = vector.broadcast %cst_117 : f32 to vector<24x8xf32>
    %349 = arith.select %345, %347, %348 : vector<24x8xi1>, vector<24x8xf32>
    %350 = arith.addf %343, %349 : vector<24x8xf32>
    %c2_i32 = arith.constant 2 : i32
    %351 = vector.broadcast %c2_i32 : i32 to vector<24x8xi32>
    %352 = arith.cmpi eq, %290, %351 : vector<24x8xi32>
    %cst_118 = arith.constant 0.000000e+00 : f32
    %353 = vector.shape_cast %327 : vector<24x1xf32> to vector<24x1xf32>
    %354 = vector.broadcast %353 : vector<24x1xf32> to vector<24x8xf32>
    %355 = vector.broadcast %cst_118 : f32 to vector<24x8xf32>
    %356 = arith.select %352, %354, %355 : vector<24x8xi1>, vector<24x8xf32>
    %357 = arith.addf %350, %356 : vector<24x8xf32>
    %c3_i32 = arith.constant 3 : i32
    %358 = vector.broadcast %c3_i32 : i32 to vector<24x8xi32>
    %359 = arith.cmpi eq, %290, %358 : vector<24x8xi32>
    %cst_119 = arith.constant 0.000000e+00 : f32
    %360 = vector.shape_cast %337 : vector<24x1xf32> to vector<24x1xf32>
    %361 = vector.broadcast %360 : vector<24x1xf32> to vector<24x8xf32>
    %362 = vector.broadcast %cst_119 : f32 to vector<24x8xf32>
    %363 = arith.select %359, %361, %362 : vector<24x8xi1>, vector<24x8xf32>
    %364 = arith.addf %357, %363 : vector<24x8xf32>
    %c4_i32 = arith.constant 4 : i32
    %365 = vector.broadcast %c4_i32 : i32 to vector<24x8xi32>
    %366 = arith.cmpi eq, %290, %365 : vector<24x8xi32>
    %cst_120 = arith.constant 0.000000e+00 : f32
    %367 = vector.shape_cast %202 : vector<24x1xf32> to vector<24x1xf32>
    %368 = vector.broadcast %367 : vector<24x1xf32> to vector<24x8xf32>
    %369 = vector.broadcast %cst_120 : f32 to vector<24x8xf32>
    %370 = arith.select %366, %368, %369 : vector<24x8xi1>, vector<24x8xf32>
    %371 = arith.addf %364, %370 : vector<24x8xf32>
    %c0_121 = arith.constant 0 : index
    %c0_122 = arith.constant 0 : index
    %c0_123 = arith.constant 0 : index
    %372 = vector.load %arg11[%c0_121, %c0_122, %c0_123] : memref<3x24x8xf32, #tpu.memory_space<vmem>>, vector<1x24x8xf32>
    %373 = vector.shape_cast %372 : vector<1x24x8xf32> to vector<24x8xf32>
    %374 = vector.shape_cast %371 : vector<24x8xf32> to vector<1x24x8xf32>
    tpu.vector_store %arg11[%c0_121, %c0_122, %c0_123], %374 {strides = array<i32>} : memref<3x24x8xf32, #tpu.memory_space<vmem>>, vector<1x24x8xf32>,
    %375 = vector.extract_strided_slice %284 {offsets = [48, 0], sizes = [24, 32], strides = [1, 1]} : vector<144x32xf32> to vector<24x32xf32>
    %376 = vector.extract_strided_slice %284 {offsets = [72, 0], sizes = [24, 32], strides = [1, 1]} : vector<144x32xf32> to vector<24x32xf32>
    %cst_124 = arith.constant 0.000000e+00 : f32
    %377 = vector.broadcast %cst_124 : f32 to vector<24x32xf32>
    %378 = arith.addf %377, %375 : vector<24x32xf32>
    %379 = arith.addf %378, %376 : vector<24x32xf32>
    %cst_125 = arith.constant 5.000000e-01 : f32
    %380 = vector.broadcast %cst_125 : f32 to vector<24x32xf32>
    %381 = arith.mulf %379, %380 : vector<24x32xf32>
    %382 = arith.subf %375, %381 : vector<24x32xf32>
    %383 = arith.mulf %382, %382 : vector<24x32xf32>
    %cst_126 = arith.constant 0.000000e+00 : f32
    %384 = vector.broadcast %cst_126 : f32 to vector<24x32xf32>
    %385 = arith.addf %384, %383 : vector<24x32xf32>
    %386 = arith.subf %376, %381 : vector<24x32xf32>
    %387 = arith.mulf %386, %386 : vector<24x32xf32>
    %388 = arith.addf %385, %387 : vector<24x32xf32>
    %cst_127 = arith.constant 1.000000e+00 : f32
    %389 = vector.broadcast %cst_127 : f32 to vector<24x32xf32>
    %390 = arith.divf %388, %389 : vector<24x32xf32>
    %391 = math.sqrt %390 : vector<24x32xf32>
    %392 = arith.mulf %391, %391 : vector<24x32xf32>
    %cst_128 = arith.constant dense<0.000000e+00> : vector<24xf32>
    %393 = vector.multi_reduction <add>, %392, %cst_128 [1] : vector<24x32xf32> to vector<24xf32>
    %394 = vector.shape_cast %393 : vector<24xf32> to vector<24x1xf32>
    %cst_129 = arith.constant 5.000000e-01 : f32
    %395 = vector.broadcast %cst_129 : f32 to vector<24x1xf32>
    %396 = arith.mulf %395, %394 : vector<24x1xf32>
    %cst_130 = arith.constant 1.000000e+00 : f32
    %397 = vector.broadcast %cst_130 : f32 to vector<24x1xf32>
    %398 = arith.addf %397, %396 : vector<24x1xf32>
    %399 = tpu.reciprocal %398 {approx = true} : vector<24x1xf32> -> vector<24x1xf32>
    %cst_131 = arith.constant 5.000000e-01 : f32
    %400 = vector.broadcast %cst_131 : f32 to vector<24x1xf32>
    %401 = arith.mulf %400, %399 : vector<24x1xf32>
    %402 = arith.mulf %50, %391 : vector<24x32xf32>
    %cst_132 = arith.constant dense<0.000000e+00> : vector<24xf32>
    %403 = vector.multi_reduction <add>, %402, %cst_132 [1] : vector<24x32xf32> to vector<24xf32>
    %404 = vector.shape_cast %403 : vector<24xf32> to vector<24x1xf32>
    %405 = arith.mulf %401, %404 : vector<24x1xf32>
    %406 = arith.mulf %405, %404 : vector<24x1xf32>
    %407 = arith.subf %287, %406 : vector<24x1xf32>
    %cst_133 = arith.constant 3.200000e+01 : f32
    %408 = vector.broadcast %cst_133 : f32 to vector<24x1xf32>
    %409 = arith.addf %407, %408 : vector<24x1xf32>
    %410 = arith.mulf %401, %394 : vector<24x1xf32>
    %411 = arith.subf %409, %410 : vector<24x1xf32>
    %412 = arith.subf %381, %28 : vector<24x32xf32>
    %413 = arith.mulf %412, %391 : vector<24x32xf32>
    %cst_134 = arith.constant dense<0.000000e+00> : vector<24xf32>
    %414 = vector.multi_reduction <add>, %413, %cst_134 [1] : vector<24x32xf32> to vector<24xf32>
    %415 = vector.shape_cast %414 : vector<24xf32> to vector<24x1xf32>
    %416 = arith.mulf %412, %412 : vector<24x32xf32>
    %cst_135 = arith.constant dense<0.000000e+00> : vector<24xf32>
    %417 = vector.multi_reduction <add>, %416, %cst_135 [1] : vector<24x32xf32> to vector<24xf32>
    %418 = vector.shape_cast %417 : vector<24xf32> to vector<24x1xf32>
    %419 = arith.mulf %401, %415 : vector<24x1xf32>
    %420 = arith.mulf %419, %415 : vector<24x1xf32>
    %421 = arith.subf %418, %420 : vector<24x1xf32>
    %c0_i32_136 = arith.constant 0 : i32
    %422 = vector.broadcast %c0_i32_136 : i32 to vector<24x8xi32>
    %423 = arith.cmpi eq, %290, %422 : vector<24x8xi32>
    %cst_137 = arith.constant 0.000000e+00 : f32
    %424 = vector.shape_cast %289 : vector<24x1xf32> to vector<24x1xf32>
    %425 = vector.broadcast %424 : vector<24x1xf32> to vector<24x8xf32>
    %426 = vector.broadcast %cst_137 : f32 to vector<24x8xf32>
    %427 = arith.select %423, %425, %426 : vector<24x8xi1>, vector<24x8xf32>
    %c1_i32_138 = arith.constant 1 : i32
    %428 = vector.broadcast %c1_i32_138 : i32 to vector<24x8xi32>
    %429 = arith.cmpi eq, %290, %428 : vector<24x8xi32>
    %cst_139 = arith.constant 0.000000e+00 : f32
    %430 = vector.shape_cast %398 : vector<24x1xf32> to vector<24x1xf32>
    %431 = vector.broadcast %430 : vector<24x1xf32> to vector<24x8xf32>
    %432 = vector.broadcast %cst_139 : f32 to vector<24x8xf32>
    %433 = arith.select %429, %431, %432 : vector<24x8xi1>, vector<24x8xf32>
    %434 = arith.addf %427, %433 : vector<24x8xf32>
    %c2_i32_140 = arith.constant 2 : i32
    %435 = vector.broadcast %c2_i32_140 : i32 to vector<24x8xi32>
    %436 = arith.cmpi eq, %290, %435 : vector<24x8xi32>
    %cst_141 = arith.constant 0.000000e+00 : f32
    %437 = vector.shape_cast %411 : vector<24x1xf32> to vector<24x1xf32>
    %438 = vector.broadcast %437 : vector<24x1xf32> to vector<24x8xf32>
    %439 = vector.broadcast %cst_141 : f32 to vector<24x8xf32>
    %440 = arith.select %436, %438, %439 : vector<24x8xi1>, vector<24x8xf32>
    %441 = arith.addf %434, %440 : vector<24x8xf32>
    %c3_i32_142 = arith.constant 3 : i32
    %442 = vector.broadcast %c3_i32_142 : i32 to vector<24x8xi32>
    %443 = arith.cmpi eq, %290, %442 : vector<24x8xi32>
    %cst_143 = arith.constant 0.000000e+00 : f32
    %444 = vector.shape_cast %421 : vector<24x1xf32> to vector<24x1xf32>
    %445 = vector.broadcast %444 : vector<24x1xf32> to vector<24x8xf32>
    %446 = vector.broadcast %cst_143 : f32 to vector<24x8xf32>
    %447 = arith.select %443, %445, %446 : vector<24x8xi1>, vector<24x8xf32>
    %448 = arith.addf %441, %447 : vector<24x8xf32>
    %c4_i32_144 = arith.constant 4 : i32
    %449 = vector.broadcast %c4_i32_144 : i32 to vector<24x8xi32>
    %450 = arith.cmpi eq, %290, %449 : vector<24x8xi32>
    %cst_145 = arith.constant 0.000000e+00 : f32
    %451 = vector.shape_cast %202 : vector<24x1xf32> to vector<24x1xf32>
    %452 = vector.broadcast %451 : vector<24x1xf32> to vector<24x8xf32>
    %453 = vector.broadcast %cst_145 : f32 to vector<24x8xf32>
    %454 = arith.select %450, %452, %453 : vector<24x8xi1>, vector<24x8xf32>
    %455 = arith.addf %448, %454 : vector<24x8xf32>
    %c1_146 = arith.constant 1 : index
    %c0_147 = arith.constant 0 : index
    %c0_148 = arith.constant 0 : index
    %456 = vector.load %arg11[%c1_146, %c0_147, %c0_148] : memref<3x24x8xf32, #tpu.memory_space<vmem>>, vector<1x24x8xf32>
    %457 = vector.shape_cast %456 : vector<1x24x8xf32> to vector<24x8xf32>
    %458 = vector.shape_cast %455 : vector<24x8xf32> to vector<1x24x8xf32>
    tpu.vector_store %arg11[%c1_146, %c0_147, %c0_148], %458 {strides = array<i32>} : memref<3x24x8xf32, #tpu.memory_space<vmem>>, vector<1x24x8xf32>,
    %459 = vector.extract_strided_slice %284 {offsets = [96, 0], sizes = [24, 32], strides = [1, 1]} : vector<144x32xf32> to vector<24x32xf32>
    %460 = vector.extract_strided_slice %284 {offsets = [120, 0], sizes = [24, 32], strides = [1, 1]} : vector<144x32xf32> to vector<24x32xf32>
    %cst_149 = arith.constant 0.000000e+00 : f32
    %461 = vector.broadcast %cst_149 : f32 to vector<24x32xf32>
    %462 = arith.addf %461, %459 : vector<24x32xf32>
    %463 = arith.addf %462, %460 : vector<24x32xf32>
    %cst_150 = arith.constant 5.000000e-01 : f32
    %464 = vector.broadcast %cst_150 : f32 to vector<24x32xf32>
    %465 = arith.mulf %463, %464 : vector<24x32xf32>
    %466 = arith.subf %459, %465 : vector<24x32xf32>
    %467 = arith.mulf %466, %466 : vector<24x32xf32>
    %cst_151 = arith.constant 0.000000e+00 : f32
    %468 = vector.broadcast %cst_151 : f32 to vector<24x32xf32>
    %469 = arith.addf %468, %467 : vector<24x32xf32>
    %470 = arith.subf %460, %465 : vector<24x32xf32>
    %471 = arith.mulf %470, %470 : vector<24x32xf32>
    %472 = arith.addf %469, %471 : vector<24x32xf32>
    %cst_152 = arith.constant 1.000000e+00 : f32
    %473 = vector.broadcast %cst_152 : f32 to vector<24x32xf32>
    %474 = arith.divf %472, %473 : vector<24x32xf32>
    %475 = math.sqrt %474 : vector<24x32xf32>
    %476 = arith.mulf %475, %475 : vector<24x32xf32>
    %cst_153 = arith.constant dense<0.000000e+00> : vector<24xf32>
    %477 = vector.multi_reduction <add>, %476, %cst_153 [1] : vector<24x32xf32> to vector<24xf32>
    %478 = vector.shape_cast %477 : vector<24xf32> to vector<24x1xf32>
    %cst_154 = arith.constant 5.000000e-01 : f32
    %479 = vector.broadcast %cst_154 : f32 to vector<24x1xf32>
    %480 = arith.mulf %479, %478 : vector<24x1xf32>
    %cst_155 = arith.constant 1.000000e+00 : f32
    %481 = vector.broadcast %cst_155 : f32 to vector<24x1xf32>
    %482 = arith.addf %481, %480 : vector<24x1xf32>
    %483 = tpu.reciprocal %482 {approx = true} : vector<24x1xf32> -> vector<24x1xf32>
    %cst_156 = arith.constant 5.000000e-01 : f32
    %484 = vector.broadcast %cst_156 : f32 to vector<24x1xf32>
    %485 = arith.mulf %484, %483 : vector<24x1xf32>
    %486 = arith.mulf %50, %475 : vector<24x32xf32>
    %cst_157 = arith.constant dense<0.000000e+00> : vector<24xf32>
    %487 = vector.multi_reduction <add>, %486, %cst_157 [1] : vector<24x32xf32> to vector<24xf32>
    %488 = vector.shape_cast %487 : vector<24xf32> to vector<24x1xf32>
    %489 = arith.mulf %485, %488 : vector<24x1xf32>
    %490 = arith.mulf %489, %488 : vector<24x1xf32>
    %491 = arith.subf %287, %490 : vector<24x1xf32>
    %cst_158 = arith.constant 3.200000e+01 : f32
    %492 = vector.broadcast %cst_158 : f32 to vector<24x1xf32>
    %493 = arith.addf %491, %492 : vector<24x1xf32>
    %494 = arith.mulf %485, %478 : vector<24x1xf32>
    %495 = arith.subf %493, %494 : vector<24x1xf32>
    %496 = arith.subf %465, %28 : vector<24x32xf32>
    %497 = arith.mulf %496, %475 : vector<24x32xf32>
    %cst_159 = arith.constant dense<0.000000e+00> : vector<24xf32>
    %498 = vector.multi_reduction <add>, %497, %cst_159 [1] : vector<24x32xf32> to vector<24xf32>
    %499 = vector.shape_cast %498 : vector<24xf32> to vector<24x1xf32>
    %500 = arith.mulf %496, %496 : vector<24x32xf32>
    %cst_160 = arith.constant dense<0.000000e+00> : vector<24xf32>
    %501 = vector.multi_reduction <add>, %500, %cst_160 [1] : vector<24x32xf32> to vector<24xf32>
    %502 = vector.shape_cast %501 : vector<24xf32> to vector<24x1xf32>
    %503 = arith.mulf %485, %499 : vector<24x1xf32>
    %504 = arith.mulf %503, %499 : vector<24x1xf32>
    %505 = arith.subf %502, %504 : vector<24x1xf32>
    %c0_i32_161 = arith.constant 0 : i32
    %506 = vector.broadcast %c0_i32_161 : i32 to vector<24x8xi32>
    %507 = arith.cmpi eq, %290, %506 : vector<24x8xi32>
    %cst_162 = arith.constant 0.000000e+00 : f32
    %508 = vector.shape_cast %289 : vector<24x1xf32> to vector<24x1xf32>
    %509 = vector.broadcast %508 : vector<24x1xf32> to vector<24x8xf32>
    %510 = vector.broadcast %cst_162 : f32 to vector<24x8xf32>
    %511 = arith.select %507, %509, %510 : vector<24x8xi1>, vector<24x8xf32>
    %c1_i32_163 = arith.constant 1 : i32
    %512 = vector.broadcast %c1_i32_163 : i32 to vector<24x8xi32>
    %513 = arith.cmpi eq, %290, %512 : vector<24x8xi32>
    %cst_164 = arith.constant 0.000000e+00 : f32
    %514 = vector.shape_cast %482 : vector<24x1xf32> to vector<24x1xf32>
    %515 = vector.broadcast %514 : vector<24x1xf32> to vector<24x8xf32>
    %516 = vector.broadcast %cst_164 : f32 to vector<24x8xf32>
    %517 = arith.select %513, %515, %516 : vector<24x8xi1>, vector<24x8xf32>
    %518 = arith.addf %511, %517 : vector<24x8xf32>
    %c2_i32_165 = arith.constant 2 : i32
    %519 = vector.broadcast %c2_i32_165 : i32 to vector<24x8xi32>
    %520 = arith.cmpi eq, %290, %519 : vector<24x8xi32>
    %cst_166 = arith.constant 0.000000e+00 : f32
    %521 = vector.shape_cast %495 : vector<24x1xf32> to vector<24x1xf32>
    %522 = vector.broadcast %521 : vector<24x1xf32> to vector<24x8xf32>
    %523 = vector.broadcast %cst_166 : f32 to vector<24x8xf32>
    %524 = arith.select %520, %522, %523 : vector<24x8xi1>, vector<24x8xf32>
    %525 = arith.addf %518, %524 : vector<24x8xf32>
    %c3_i32_167 = arith.constant 3 : i32
    %526 = vector.broadcast %c3_i32_167 : i32 to vector<24x8xi32>
    %527 = arith.cmpi eq, %290, %526 : vector<24x8xi32>
    %cst_168 = arith.constant 0.000000e+00 : f32
    %528 = vector.shape_cast %505 : vector<24x1xf32> to vector<24x1xf32>
    %529 = vector.broadcast %528 : vector<24x1xf32> to vector<24x8xf32>
    %530 = vector.broadcast %cst_168 : f32 to vector<24x8xf32>
    %531 = arith.select %527, %529, %530 : vector<24x8xi1>, vector<24x8xf32>
    %532 = arith.addf %525, %531 : vector<24x8xf32>
    %c4_i32_169 = arith.constant 4 : i32
    %533 = vector.broadcast %c4_i32_169 : i32 to vector<24x8xi32>
    %534 = arith.cmpi eq, %290, %533 : vector<24x8xi32>
    %cst_170 = arith.constant 0.000000e+00 : f32
    %535 = vector.shape_cast %202 : vector<24x1xf32> to vector<24x1xf32>
    %536 = vector.broadcast %535 : vector<24x1xf32> to vector<24x8xf32>
    %537 = vector.broadcast %cst_170 : f32 to vector<24x8xf32>
    %538 = arith.select %534, %536, %537 : vector<24x8xi1>, vector<24x8xf32>
    %539 = arith.addf %532, %538 : vector<24x8xf32>
    %c2_171 = arith.constant 2 : index
    %c0_172 = arith.constant 0 : index
    %c0_173 = arith.constant 0 : index
    %540 = vector.load %arg11[%c2_171, %c0_172, %c0_173] : memref<3x24x8xf32, #tpu.memory_space<vmem>>, vector<1x24x8xf32>
    %541 = vector.shape_cast %540 : vector<1x24x8xf32> to vector<24x8xf32>
    %542 = vector.shape_cast %539 : vector<24x8xf32> to vector<1x24x8xf32>
    tpu.vector_store %arg11[%c2_171, %c0_172, %c0_173], %542 {strides = array<i32>} : memref<3x24x8xf32, #tpu.memory_space<vmem>>, vector<1x24x8xf32>,
    return
  }
}

</mosaic_0001>

<bundles_post_ra>
// kernel: gadnr_forward.1
= control target key start
LH: loop header
LB: loop body
LE: loop exit
PB: predicated region body
PF: predicated region fallthrough
CT: control target
= control target key end

     0   :  { %17 = vsyncpa [#allocation3], 0  ;;  %s5831_s0 = inlined_call_operand.vmem [shape: f32[24,16], index: 0, kind: input, shape index: {}]   ;;  %s5832_s1 = inlined_call_operand.vmem [shape: f32[24,24], index: 1, kind: input, shape index: {}]   ;;  %s5833_s2 = inlined_call_operand.vmem [shape: f32[24,24], index: 2, kind: input, shape index: {}]   ;;  %s5834_s3 = inlined_call_operand.vmem [shape: f32[144,32], index: 3, kind: input, shape index: {}]   ;;  %s5835_s4 = inlined_call_operand.vmem [shape: f32[16,32], index: 4, kind: input, shape index: {}]   ;;  %s5836_s5 = inlined_call_operand.vmem [shape: f32[32,128], index: 5, kind: input, shape index: {}]   ;;  %s5837_s6 = inlined_call_operand.vmem [shape: f32[32,128], index: 6, kind: input, shape index: {}]   ;;  %s5838_s7 = inlined_call_operand.hbm [shape: f32[13,32,32], index: 7, kind: input, shape index: {}]   ;;  %s5839_s8 = inlined_call_operand.vmem [shape: f32[31,32], index: 8, kind: input, shape index: {}]   ;;  %s5840_s9 = inlined_call_operand.hbm [shape: f32[24,32], index: 9, kind: output, shape index: {0}]   ;;  %s5841_s10 = inlined_call_operand.vmem [shape: f32[24,32], index: 10, kind: output, shape index: {1}]   ;;  %s5842_s11 = inlined_call_operand.vmem [shape: f32[3,24,8], index: 11, kind: output, shape index: {2}]  }
   0x1   :  { %18 = vsyncpa [#allocation4], 0  ;;  %s4455_s17 = smov [#allocation2]  }
   0x2   :  { %s38_s18 = sshll.u32 %s4455_s17, 4  ;;  %s39_s18 = int_to_ptr.vmem [resolvable:$true] %s38_s18 }
   0x3   :  { %s4419_s19 = scalar_lea.vmem %s39_s18, 6656  ;;  %p4424_p1 = scmp.lt.s32.totalorder %s39_s18, %s39_s18 }
   0x4   :  { %p4420_p0 = scmp.ne.s32.totalorder %s39_s18, %s4419_s19  ;;  %p4425_p2 = scmp.lt.s32.totalorder %s4419_s19, %s4419_s19 }
   0x6   :  { %p4426_p3 = por %p4425_p2, %p4424_p1 }
   0x8   :  { %p4427_p4 = pnand %p4426_p3, %p4420_p0 }
   0xa   :  { %4430 = shalt.err (!%p4427_p4)
}
   0xb   :  { %s4456_s20 = smov 128   ;;  %s4457_s21 = smov 8  }
   0xc   :  { %44 = dma.hbm_to_vmem [thread:$0]  %s5838_s7, 6656, %s39_s18, [#allocation3], %s4456_s20, %s4456_s20, %s4457_s21  }
   0xd   :  { %4451 = dma.done.wait [#allocation3], 6656  }
   0xe   :  { %4452 = vsyncadd [#allocation3], 4294960640  ;;  %v4458_v0 = vmov 0.0   ;;  %vm4459_vm0 = vmmov 0   ;;  %v58_v1 = vld [vmem:[%s5835_s4 + $0x8] sm:$0xff]  ;;  %v57_v2 = vld [vmem:[%s5835_s4] sm:$0xff]  ;;  %v59_v10 = vlaneseq }
   0xf   :  { %3945 = vmatprep.subr.mxu0 %v4458_v0  ;;  %3949 = vmatprep.mubr.msk.f32.mxu0 %vm4459_vm0, %v4458_v0  ;;  %v54_v3 = vld [vmem:[%s5831_s0] sm:$0xff]  ;;  %vm63_vm1 = vcmask 130048   ;;  %v56_v4 = vld [vmem:[%s5831_s0 + $0x10] sm:$0xff]  ;;  %v159_v5 = vld [vmem:[#allocation2 + $0x18] sm:$0xff]  ;;  %vm160_vm2 = vcmask 261120   ;;  %vm254_vm3 = vcmask 195584  }
  0x10   :  { %4330 = vmatprep.subr.mxu1 %v4458_v0  ;;  %3955 = vmatprep.mubr.msk.f32.mxu1 %vm4459_vm0, %v4458_v0  ;;  %v55_v6 = vld [vmem:[%s5831_s0 + $0x8] sm:$0xff]  ;;  %v158_v7 = vld [vmem:[#allocation2 + $0x10] sm:$0xff]  ;;  %v156_v9 = vld [vmem:[#allocation2] sm:$0xff]  ;;  %v4570_v11 = vshrl.u32 %v59_v10, 7  ;;  %s4460_s25 = smov 64   ;;  %vm1037_vm10 = vcmask 785920  }
  0x11   :  { %3946 = vmatpush3.msra.mxu0 %v58_v1  ;;  %4332 = vmatpush3.msra.mxu1 %v58_v1  ;;  %v157_v8 = vld [vmem:[#allocation2 + $0x8] sm:$0xff]  ;;  %v4578_v13 = vld [vmem:[%s5839_s8] sm:$0xff]  ;;  %v353_v19 = vld [vmem:[%s5836_s5 + $0x18] sm:$0xff]  ;;  %s4462_s26 = smov 32   ;;  %vm1110_vm11 = vcmask 1048320  }
  0x12   :  { %3947 = vmatprep.subr.mxu0 %v4458_v0  ;;  %4331 = vmatprep.subr.mxu1 %v4458_v0  ;;  %v4573_v12 = vsub.s32 0, %v4570_v11  ;;  %v352_v22 = vld [vmem:[%s5836_s5 + $0x10] sm:$0xff]  ;;  %v351_v25 = vld [vmem:[%s5836_s5 + $0x8] sm:$0xff]  ;;  %v350_v27 = vld [vmem:[%s5836_s5] sm:$0xff] }
  0x13   :  { %3948 = vmatpush3.msra.mxu0 %v57_v2  ;;  %4333 = vmatpush3.msra.mxu1 %v57_v2  ;;  %v153_v34 = vld [vmem:[%s5832_s1] sm:$0xff]  ;;  %v154_v38 = vld [vmem:[%s5832_s1 + $0x8] sm:$0xff]  ;;  %v155_v41 = vld [vmem:[%s5832_s1 + $0x10] sm:$0xff] }
  0x14   :  { %3950 = vmatmul.mubr.msk.f32.vlgmr.msra.gmra.mxu0 %vm63_vm1, %v54_v3  ;;  %3956 = vmatmul.mubr.msk.f32.vlgmr.msra.gmra.mxu1 %vm63_vm1, %v56_v4  ;;  %v62_v14 = vrot.slane %v4578_v13, %v4573_v12  ;;  %v347_v45 = vld [vmem:[%s5833_s2] sm:$0xff]  ;;  %v348_v47 = vld [vmem:[%s5833_s2 + $0x8] sm:$0xff]  ;;  %v349_v48 = vld [vmem:[%s5833_s2 + $0x10] sm:$0xff]  ;;  %s4464_s2 = smov [#allocation5]  }
  0x15   :  { %3952 = vmatprep.mubr.msk.f32.mxu0 %vm4459_vm0, %v4458_v0  ;;  %3958 = vmatprep.subr.mxu1 %v4458_v0  ;;  %v689_v1 = vld [vmem:[#allocation2 + $0x38] sm:$0xff]  ;;  %v688_v2 = vld [vmem:[#allocation2 + $0x30] sm:$0xff]  ;;  %v687_v4 = vld [vmem:[#allocation2 + $0x28] sm:$0xff]  ;;  %s3614_s13 = sshll.u32 %s4464_s2, 4  ;;  %s3615_s13 = int_to_ptr.vmem [resolvable:$true] %s3614_s13 }
  0x16   :  { %3959 = vmatpush3.msra.mxu1 %v159_v5  ;;  %3966 = vmatprep.mubr.msk.f32.mxu1 %vm4459_vm0, %v4458_v0  ;;  %s4431_s14 = scalar_lea.vmem %s3615_s13, 384  ;;  %p4436_p6 = scmp.lt.s32.totalorder %s3615_s13, %s3615_s13 }
  0x17   :  { %3960 = vmatprep.subr.mxu1 %v4458_v0  ;;  %3975 = vmatprep.subr.mxu0 %v4458_v0  ;;  %p4432_p5 = scmp.ne.s32.totalorder %s3615_s13, %s4431_s14  ;;  %p4437_p7 = scmp.lt.s32.totalorder %s4431_s14, %s4431_s14 }
  0x18   :  { %3953 = vmatmul.mubr.msk.f32.gmra.mxu0 %vm63_vm1, %v55_v6  ;;  %3961 = vmatpush3.msra.mxu1 %v158_v7  ;;  %v686_v7 = vld [vmem:[#allocation2 + $0x20] sm:$0xff] }
  0x19   :  { %3962 = vmatprep.subr.mxu1 %v4458_v0  ;;  %3981 = vmatprep.mubr.msk.f32.mxu0 %vm4459_vm0, %v4458_v0  ;;  %p4438_p8 = por %p4437_p7, %p4436_p6 }
  0x1a   :  { %3963 = vmatpush3.msra.mxu1 %v157_v8  ;;  %v4719_v8 = vld [vmem:[%s5839_s8 + $0x8] sm:$0xff] }
  0x1b   :  { %3964 = vmatprep.subr.mxu1 %v4458_v0  ;;  %p4439_p9 = pnand %p4438_p8, %p4432_p5 }
  0x1c   :  { %3965 = vmatpush3.msra.mxu1 %v156_v9  ;;  %v4722_v9 = vsub.s32 3, %v4570_v11 }
  0x1d   :  { %3990 = vmatprep.subr.mxu1 %v4458_v0 }
  0xd4   :  { %v139_v15 = vpop.f32.mrf.mxu0  ;;  %v149_v16 = vpop.f32.mrf.mxu1 }
  0xd5   :  { %v140_v17 = vadd.f32 %v139_v15, %v62_v14  ;;  %v150_v18 = vadd.f32 %v149_v16, %v62_v14 }
  0xd6   :  { %v3951_v20 = vpop.f32.mrf.mxu0  ;;  %v3957_v21 = vpop.f32.mrf.mxu1 }
  0xd7   :  { %344 = vst.msk [vmem:[#allocation5] sm:$0xff] %vm160_vm2, %v140_v17  ;;  %3967 = vmatmul.mubr.msk.f32.vlgmr.msra.gmra.mxu1 %vm160_vm2, %v140_v17  ;;  %346 = vst.msk [vmem:[#allocation5 + $0x10] sm:$0xff] %vm160_vm2, %v150_v18 }
  0xd8   :  { %v144_v23 = vpop.f32.mrf.mxu0  ;;  %3969 = vmatprep.mubr.msk.f32.mxu1 %vm4459_vm0, %v4458_v0  ;;  %3991 = vmatpush3.msra.mxu1 %v353_v19 }
  0xd9   :  { %v145_v24 = vadd.f32 %v144_v23, %v62_v14  ;;  %3992 = vmatprep.subr.mxu1 %v4458_v0  ;;  %v1029_v14 = vrot.slane %v4719_v8, %v4722_v9 }
  0xda   :  { %v3954_v26 = vpop.f32.mrf.mxu0  ;;  %3993 = vmatpush3.msra.mxu1 %v352_v22 }
  0xdb   :  { %345 = vst.msk [vmem:[#allocation5 + $0x8] sm:$0xff] %vm160_vm2, %v145_v24  ;;  %3970 = vmatmul.mubr.msk.f32.gmra.mxu1 %vm160_vm2, %v145_v24  ;;  %3994 = vmatprep.subr.mxu1 %v4458_v0 }
  0xdc   :  { %3972 = vmatprep.mubr.msk.f32.mxu1 %vm4459_vm0, %v4458_v0  ;;  %3995 = vmatpush3.msra.mxu1 %v351_v25 }
  0xdd   :  { %3996 = vmatprep.subr.mxu1 %v4458_v0 }
  0xde   :  { %3997 = vmatpush3.msra.mxu1 %v350_v27 }
  0xdf   :  { %3973 = vmatmul.mubr.msk.f32.gmra.mxu1 %vm160_vm2, %v150_v18  ;;  %4022 = vmatprep.subr.mxu1 %v4458_v0 }
  0xe0   :  { %3998 = vmatprep.mubr.msk.f32.mxu1 %vm4459_vm0, %v4458_v0 }
  0xe3   :  { %3999 = vmatmul.mubr.msk.f32.vlgmr.msra.gmra.mxu1 %vm160_vm2, %v140_v17 }
  0xe4   :  { %4001 = vmatprep.mubr.msk.f32.mxu1 %vm4459_vm0, %v4458_v0 }
  0xe7   :  { %4002 = vmatmul.mubr.msk.f32.gmra.mxu1 %vm160_vm2, %v145_v24 }
  0xe8   :  { %4004 = vmatprep.mubr.msk.f32.mxu1 %vm4459_vm0, %v4458_v0 }
  0xeb   :  { %4005 = vmatmul.mubr.msk.f32.gmra.mxu1 %vm160_vm2, %v150_v18 }
  0xec   :  { %4028 = vmatprep.mubr.msk.f32.mxu1 %vm4459_vm0, %v4458_v0 }
 0x197   :  { %v236_v28 = vpop.f32.mrf.mxu1 }
 0x199   :  { %v3968_v29 = vpop.f32.mrf.mxu1 }
 0x19b   :  { %v241_v30 = vpop.f32.mrf.mxu1 }
 0x19d   :  { %v3971_v31 = vpop.f32.mrf.mxu1 }
 0x19f   :  { %v246_v32 = vpop.f32.mrf.mxu1 }
 0x1a0   :  { %3976 = vmatpush3.msra.mxu0 %v246_v32 }
 0x1a1   :  { %v3974_v33 = vpop.f32.mrf.mxu1  ;;  %3977 = vmatprep.subr.mxu0 %v4458_v0 }
 0x1a2   :  { %3978 = vmatpush3.msra.mxu0 %v241_v30 }
 0x1a3   :  { %3979 = vmatprep.subr.mxu0 %v4458_v0  ;;  %v4624_v35 = vpop.f32.mrf.mxu1 }
 0x1a4   :  { %3980 = vmatpush3.msra.mxu0 %v236_v28  ;;  %v523_v36 = vmul.f32 %v4624_v35, %v4624_v35 }
 0x1a5   :  { %v4000_v37 = vpop.f32.mrf.mxu1  ;;  %3982 = vmatmul.mubr.msk.f32.vlgmr.msra.gmra.mxu0 %vm254_vm3, %v153_v34  ;;  %4007 = vmatprep.subr.mxu0 %v4458_v0 }
 0x1a6   :  { %529 = vrot.lane.b32.xlu1 %v523_v36, %s4460_s25  ;;  %3984 = vmatprep.mubr.msk.f32.mxu0 %vm4459_vm0, %v4458_v0 }
 0x1a7   :  { %v4636_v39 = vpop.f32.mrf.mxu1 }
 0x1a8   :  { %v524_v46 = vmul.f32 %v4636_v39, %v4636_v39 }
 0x1a9   :  { %v4003_v40 = vpop.f32.mrf.mxu1  ;;  %3985 = vmatmul.mubr.msk.f32.gmra.mxu0 %vm254_vm3, %v154_v38  ;;  %v912_v38 = vld [vmem:[%s5837_s6 + $0x18] sm:$0xff] }
 0x1aa   :  { %3987 = vmatprep.mubr.msk.f32.mxu0 %vm4459_vm0, %v4458_v0 }
 0x1ab   :  { %v4644_v42 = vpop.f32.mrf.mxu1 }
 0x1ac   :  { %4008 = vmatpush3.msra.mxu0 %v4644_v42  ;;  %v525_v43 = vmul.f32 %v4644_v42, %v4644_v42 }
 0x1ad   :  { %v4006_v44 = vpop.f32.mrf.mxu1  ;;  %4009 = vmatprep.subr.mxu0 %v4458_v0  ;;  %3988 = vmatmul.mubr.msk.f32.gmra.mxu0 %vm254_vm3, %v155_v41 }
 0x1ae   :  { %533 = vrot.lane.b32.xlu0 %v525_v43, %s4460_s25  ;;  %4010 = vmatpush3.msra.mxu0 %v4636_v39  ;;  %v911_v44 = vld [vmem:[%s5837_s6 + $0x10] sm:$0xff] }
 0x1af   :  { %4011 = vmatprep.subr.mxu0 %v4458_v0  ;;  %4013 = vmatprep.mubr.msk.f32.mxu0 %vm4459_vm0, %v4458_v0 }
 0x1b0   :  { %4012 = vmatpush3.msra.mxu0 %v4624_v35 }
 0x1b1   :  { %4014 = vmatmul.mubr.msk.f32.vlgmr.msra.gmra.mxu0 %vm254_vm3, %v347_v45  ;;  %4037 = vmatprep.subr.mxu0 %v4458_v0 }
 0x1b2   :  { %531 = vrot.lane.b32.xlu0 %v524_v46, %s4460_s25  ;;  %4016 = vmatprep.mubr.msk.f32.mxu0 %vm4459_vm0, %v4458_v0  ;;  %v4737_v46 = vsub.s32 1, %v4570_v11 }
 0x1b3   :  { %4038 = vmatpush3.msra.mxu0 %v689_v1 }
 0x1b4   :  { %4039 = vmatprep.subr.mxu0 %v4458_v0 }
 0x1b5   :  { %4017 = vmatmul.mubr.msk.f32.gmra.mxu0 %vm254_vm3, %v348_v47 }
 0x1b6   :  { %4019 = vmatprep.mubr.msk.f32.mxu0 %vm4459_vm0, %v4458_v0  ;;  %4040 = vmatpush3.msra.mxu0 %v688_v2 }
 0x1b7   :  { %4041 = vmatprep.subr.mxu0 %v4458_v0 }
 0x1b8   :  { %4042 = vmatpush3.msra.mxu0 %v687_v4  ;;  %v4776_v4 = vld [vmem:[%s5839_s8 + $0x10] sm:$0xff] }
 0x1b9   :  { %4020 = vmatmul.mubr.msk.f32.gmra.mxu0 %vm254_vm3, %v349_v48  ;;  %4043 = vmatprep.subr.mxu0 %v4458_v0 }
 0x1ba   :  { %4045 = vmatprep.mubr.msk.f32.mxu0 %vm4459_vm0, %v4458_v0  ;;  %4044 = vmatpush3.msra.mxu0 %v686_v7  ;;  %v4782_v7 = vsub.s32 2, %v4570_v11 }
 0x1bb   :  { %4071 = vmatprep.subr.mxu0 %v4458_v0 }
 0x218   :  { %v530_v51 = vpop.permute.xlu1 %529 }
 0x220   :  { %v534_v49 = vpop.permute.xlu0 %533 }
 0x221   :  { %4023 = vmatpush3.msra.mxu1 %v534_v49 }
 0x222   :  { %4024 = vmatprep.subr.mxu1 %v4458_v0 }
 0x224   :  { %v532_v50 = vpop.permute.xlu0 %531 }
 0x225   :  { %4025 = vmatpush3.msra.mxu1 %v532_v50 }
 0x226   :  { %4026 = vmatprep.subr.mxu1 %v4458_v0 }
 0x227   :  { %4027 = vmatpush3.msra.mxu1 %v530_v51 }
 0x228   :  { %4029 = vmatmul.mubr.msk.f32.vlgmr.msra.gmra.mxu1 %vm254_vm3, %v347_v45  ;;  %4054 = vmatprep.subr.mxu1 %v4458_v0 }
 0x229   :  { %4031 = vmatprep.mubr.msk.f32.mxu1 %vm4459_vm0, %v4458_v0 }
 0x22c   :  { %4032 = vmatmul.mubr.msk.f32.gmra.mxu1 %vm254_vm3, %v348_v47 }
 0x22d   :  { %4034 = vmatprep.mubr.msk.f32.mxu1 %vm4459_vm0, %v4458_v0 }
 0x230   :  { %4035 = vmatmul.mubr.msk.f32.gmra.mxu1 %vm254_vm3, %v349_v48  ;;  %v910_v48 = vld [vmem:[%s5837_s6 + $0x8] sm:$0xff] }
 0x231   :  { %4062 = vmatprep.mubr.msk.f32.mxu1 %vm4459_vm0, %v4458_v0 }
 0x265   :  { %v4691_v52 = vpop.f32.mrf.mxu0 }
 0x267   :  { %v3983_v53 = vpop.f32.mrf.mxu0 }
 0x268   :  { %v909_v53 = vld [vmem:[%s5837_s6] sm:$0xff]  ;;  %s4461_s6 = smov 96  }
 0x269   :  { %v4693_v54 = vpop.f32.mrf.mxu0 }
 0x26b   :  { %v3986_v55 = vpop.f32.mrf.mxu0 }
 0x26d   :  { %v4695_v56 = vpop.f32.mrf.mxu0 }
 0x26f   :  { %v3989_v57 = vpop.f32.mrf.mxu0 }
 0x270   :  { %v253_v57 = vrot.slane %v4578_v13, %v4737_v46 }
 0x271   :  { %v4697_v58 = vpop.f32.mrf.mxu0 }
 0x272   :  { %v640_v59 = vmul.f32 %v4697_v58, %v4697_v58  ;;  %v341_v1 = vadd.f32 %v4695_v56, %v253_v57 }
 0x273   :  { %v4015_v60 = vpop.f32.mrf.mxu0 }
 0x274   :  { %646 = vrot.lane.b32.xlu1 %v640_v59, %s4460_s25 }
 0x275   :  { %v4702_v61 = vpop.f32.mrf.mxu0 }
 0x276   :  { %v641_v62 = vmul.f32 %v4702_v61, %v4702_v61 }
 0x277   :  { %v4018_v63 = vpop.f32.mrf.mxu0 }
 0x278   :  { %648 = vrot.lane.b32.xlu0 %v641_v62, %s4460_s25  ;;  %v331_v62 = vadd.f32 %v4691_v52, %v253_v57  ;;  %v336_v63 = vadd.f32 %v4693_v54, %v253_v57  ;;  %v797_v52 = vrot.slane %v4578_v13, %v4722_v9 }
 0x279   :  { %v4707_v3 = vpop.f32.mrf.mxu0 }
 0x27a   :  { %v642_v5 = vmul.f32 %v4707_v3, %v4707_v3 }
 0x27b   :  { %v4021_v6 = vpop.f32.mrf.mxu0 }
 0x27c   :  { %650 = vrot.lane.b32.xlu1 %v642_v5, %s4460_s25  ;;  %1031 = vrot.lane.b32.xlu0 %v1029_v14, %s4460_s25  ;;  %v1077_v5 = vrot.slane %v4776_v4, %v4737_v46 }
 0x280   :  { %799 = vrot.lane.b32.xlu0 %v797_v52, %s4461_s6 }
 0x2e6   :  { %v647_v15 = vpop.permute.xlu1 %646 }
 0x2e8   :  { %v604_v16 = vpop.f32.mrf.mxu1 }
 0x2e9   :  { %v655_v17 = vsub.f32 %v604_v16, %v647_v15  ;;  %v1088_v15 = vrot.slane %v4776_v4, %v4782_v7 }
 0x2ea   :  { %v4030_v18 = vpop.f32.mrf.mxu1  ;;  %v649_v19 = vpop.permute.xlu0 %648 }
 0x2eb   :  { %v658_v20 = vmax.f32 %v655_v17, 0.0  ;;  %v809_v18 = vld [vmem:[#allocation2 + $0x58] sm:$0xff] }
 0x2ec   :  { %v609_v21 = vpop.f32.mrf.mxu1  ;;  %4055 = vmatpush3.msra.mxu1 %v809_v18 }
 0x2ed   :  { %v661_v22 = vadd.f32 1e-05, %v658_v20  ;;  %v656_v23 = vsub.f32 %v609_v21, %v649_v19  ;;  %v808_v19 = vld [vmem:[#allocation2 + $0x50] sm:$0xff]  ;;  %4056 = vmatprep.subr.mxu1 %v4458_v0  ;;  %v807_v21 = vld [vmem:[#allocation2 + $0x48] sm:$0xff] }
 0x2ee   :  { %v4033_v24 = vpop.f32.mrf.mxu1  ;;  %v651_v25 = vpop.permute.xlu1 %650  ;;  %4057 = vmatpush3.msra.mxu1 %v808_v19 }
 0x2ef   :  { %4346 = vrsqrt.f32 %v661_v22  ;;  %v659_v26 = vmax.f32 %v656_v23, 0.0  ;;  %vm666_vm4 = vcmp.eq.f32.partialorder %v661_v22, inf  ;;  %v669_v36 = vand.u32 2147483648, %v661_v22  ;;  %4058 = vmatprep.subr.mxu1 %v4458_v0  ;;  %v806_v24 = vld [vmem:[#allocation2 + $0x40] sm:$0xff] }
 0x2f0   :  { %v614_v27 = vpop.f32.mrf.mxu1  ;;  %vm668_vm5 = vcmp.eq.f32.partialorder %v661_v22, 0.0  ;;  %4059 = vmatpush3.msra.mxu1 %v807_v21 }
 0x2f1   :  { %v662_v28 = vadd.f32 1e-05, %v659_v26  ;;  %v657_v29 = vsub.f32 %v614_v27, %v651_v25  ;;  %4060 = vmatprep.subr.mxu1 %v4458_v0 }
 0x2f2   :  { %v4036_v30 = vpop.f32.mrf.mxu1  ;;  %4061 = vmatpush3.msra.mxu1 %v806_v24 }
 0x2f3   :  { %4348 = vrsqrt.f32 %v662_v28  ;;  %v660_v31 = vmax.f32 %v657_v29, 0.0  ;;  %vm673_vm6 = vcmp.eq.f32.partialorder %v662_v28, inf  ;;  %v676_v45 = vand.u32 2147483648, %v662_v28  ;;  %4088 = vmatprep.subr.mxu1 %v4458_v0 }
 0x2f4   :  { %vm675_vm7 = vcmp.eq.f32.partialorder %v662_v28, 0.0 }
 0x2f5   :  { %v663_v32 = vadd.f32 1e-05, %v660_v31 }
 0x2f7   :  { %4350 = vrsqrt.f32 %v663_v32  ;;  %vm680_vm8 = vcmp.eq.f32.partialorder %v663_v32, inf  ;;  %v683_v55 = vand.u32 2147483648, %v663_v32  ;;  %vm682_vm9 = vcmp.eq.f32.partialorder %v663_v32, 0.0 }
 0x2fc   :  { %v4347_v33 = vpop.eup %4346 }
 0x2fd   :  { %v665_v34 = vmul.f32 %v4347_v33, %v661_v22 }
 0x2ff   :  { %v667_v37 = vsel %vm666_vm4, %v661_v22, %v665_v34  ;;  %v1032_v22 = vpop.permute.xlu0 %1031 }
 0x300   :  { %v4349_v40 = vpop.eup %4348  ;;  %v670_v41 = vsel %vm668_vm5, %v669_v36, %v667_v37 }
 0x301   :  { %4046 = vmatmul.mubr.msk.f32.vlgmr.msra.gmra.mxu0 %vm160_vm2, %v670_v41  ;;  %v672_v43 = vmul.f32 %v4349_v40, %v662_v28 }
 0x302   :  { %4048 = vmatprep.mubr.msk.f32.mxu0 %vm4459_vm0, %v4458_v0  ;;  %4072 = vmatpush3.msra.mxu0 %v912_v38 }
 0x303   :  { %v674_v47 = vsel %vm673_vm6, %v662_v28, %v672_v43  ;;  %4073 = vmatprep.subr.mxu0 %v4458_v0 }
 0x304   :  { %v4351_v49 = vpop.eup %4350  ;;  %v677_v50 = vsel %vm675_vm7, %v676_v45, %v674_v47  ;;  %4074 = vmatpush3.msra.mxu0 %v911_v44 }
 0x305   :  { %4049 = vmatmul.mubr.msk.f32.gmra.mxu0 %vm160_vm2, %v677_v50  ;;  %v679_v51 = vmul.f32 %v4351_v49, %v663_v32  ;;  %4075 = vmatprep.subr.mxu0 %v4458_v0 }
 0x306   :  { %4051 = vmatprep.mubr.msk.f32.mxu0 %vm4459_vm0, %v4458_v0  ;;  %4076 = vmatpush3.msra.mxu0 %v910_v48 }
 0x307   :  { %v681_v59 = vsel %vm680_vm8, %v663_v32, %v679_v51  ;;  %4077 = vmatprep.subr.mxu0 %v4458_v0 }
 0x308   :  { %v684_v60 = vsel %vm682_vm9, %v683_v55, %v681_v59  ;;  %4078 = vmatpush3.msra.mxu0 %v909_v53 }
 0x309   :  { %4052 = vmatmul.mubr.msk.f32.gmra.mxu0 %vm160_vm2, %v684_v60  ;;  %4105 = vmatprep.subr.mxu0 %v4458_v0 }
 0x30a   :  { %4079 = vmatprep.mubr.msk.f32.mxu0 %vm4459_vm0, %v4458_v0 }
 0x30d   :  { %4080 = vmatmul.mubr.msk.f32.vlgmr.msra.gmra.mxu0 %vm160_vm2, %v331_v62 }
 0x30e   :  { %4082 = vmatprep.mubr.msk.f32.mxu0 %vm4459_vm0, %v4458_v0 }
 0x311   :  { %4083 = vmatmul.mubr.msk.f32.gmra.mxu0 %vm160_vm2, %v336_v63 }
 0x312   :  { %4085 = vmatprep.mubr.msk.f32.mxu0 %vm4459_vm0, %v4458_v0 }
 0x315   :  { %4086 = vmatmul.mubr.msk.f32.gmra.mxu0 %vm160_vm2, %v341_v1 }
 0x316   :  { %4113 = vmatprep.mubr.msk.f32.mxu0 %vm4459_vm0, %v4458_v0 }
 0x3c1   :  { %v765_v2 = vpop.f32.mrf.mxu0 }
 0x3c2   :  { %782 = vrot.lane.b32.xlu1 %v765_v2, %s4461_s6 }
 0x3c3   :  { %v4047_v54 = vpop.f32.mrf.mxu0 }
 0x3c5   :  { %v770_v56 = vpop.f32.mrf.mxu0 }
 0x3c6   :  { %784 = vrot.lane.b32.xlu1 %v770_v56, %s4461_s6 }
 0x3c7   :  { %v4050_v6 = vpop.f32.mrf.mxu0 }
 0x3c9   :  { %v775_v14 = vpop.f32.mrf.mxu0 }
 0x3ca   :  { %1079 = vrot.lane.b32.xlu1 %v1077_v5, %s4460_s25  ;;  %786 = vrot.lane.b32.xlu0 %v775_v14, %s4461_s6 }
 0x3cb   :  { %v4053_v16 = vpop.f32.mrf.mxu0 }
 0x3cd   :  { %v4788_v17 = vpop.f32.mrf.mxu0 }
 0x3ce   :  { %1090 = vrot.lane.b32.xlu0 %v1088_v15, %s4460_s25  ;;  %v1034_v26 = vadd.f32 %v1032_v22, %v4788_v17  ;;  %v800_v15 = vpop.permute.xlu0 %799 }
 0x3cf   :  { %v4081_v20 = vpop.f32.mrf.mxu0 }
 0x3d0   :  { %v1038_v31 = vsel %vm1037_vm10, %v1034_v26, 0.0 }
 0x3d1   :  { %v4792_v23 = vpop.f32.mrf.mxu0 }
 0x3d2   :  { %v1035_v25 = vadd.f32 %v1032_v22, %v4792_v23 }
 0x3d3   :  { %v4084_v27 = vpop.f32.mrf.mxu0 }
 0x3d4   :  { %v1039_v28 = vsel %vm1037_vm10, %v1035_v25, 0.0 }
 0x3d5   :  { %v4799_v29 = vpop.f32.mrf.mxu0  ;;  %v1040_v33 = vadd.f32 %v1039_v28, %v1038_v31 }
 0x3d6   :  { %v1036_v30 = vadd.f32 %v1032_v22, %v4799_v29 }
 0x3d7   :  { %v4087_v32 = vpop.f32.mrf.mxu0 }
 0x3d8   :  { %v1041_v34 = vsel %vm1037_vm10, %v1036_v30, 0.0 }
 0x3d9   :  { %v1042_v36 = vadd.f32 %v1041_v34, %v1040_v33 }
 0x3db   :  { %v1043_v37 = vrot.slane %v1042_v36, 4 }
 0x3dd   :  { %v1044_v38 = vadd.f32 %v1043_v37, %v1042_v36 }
 0x3df   :  { %v1045_v40 = vrot.slane %v1044_v38, 2 }
 0x3e1   :  { %v1046_v41 = vadd.f32 %v1045_v40, %v1044_v38  ;;  %v4815_v40 = vsub.s32 7, %v4570_v11 }
 0x3e3   :  { %v1047_v43 = vrot.slane %v1046_v41, 1 }
 0x3e5   :  { %v1048_v44 = vadd.f32 %v1047_v43, %v1046_v41 }
 0x3e7   :  { %v1050_v45 = vmul.f32 0.041666668, %v1048_v44 }
 0x3e9   :  { %v1051_v47 = vsub.f32 %v1034_v26, %v1050_v45  ;;  %v1052_v48 = vsub.f32 %v1035_v25, %v1050_v45  ;;  %v1053_v51 = vsub.f32 %v1036_v30, %v1050_v45  ;;  %v1102_v45 = vrot.slane %v4776_v4, %v4815_v40 }
 0x3eb   :  { %v1054_v49 = vmul.f32 %v1051_v47, %v1051_v47  ;;  %v1055_v50 = vmul.f32 %v1052_v48, %v1052_v48  ;;  %v1056_v57 = vmul.f32 %v1053_v51, %v1053_v51 }
 0x3ed   :  { %v1057_v53 = vsel %vm1037_vm10, %v1054_v49, 0.0  ;;  %v1058_v55 = vsel %vm1037_vm10, %v1055_v50, 0.0  ;;  %v1060_v60 = vsel %vm1037_vm10, %v1056_v57, 0.0  ;;  %v1174_v57 = vld [vmem:[#allocation2 + $0xf0] sm:$0xff] }
 0x3ee   :  { %v1059_v59 = vadd.f32 %v1058_v55, %v1057_v53  ;;  %v1175_v53 = vld [vmem:[#allocation2 + $0xf8] sm:$0xff] }
 0x3f0   :  { %v1061_v62 = vadd.f32 %v1060_v60, %v1059_v59  ;;  %v1173_v59 = vld [vmem:[#allocation2 + $0xe8] sm:$0xff] }
 0x3f2   :  { %v1062_v63 = vrot.slane %v1061_v62, 4 }
 0x3f4   :  { %v1063_v1 = vadd.f32 %v1062_v63, %v1061_v62  ;;  %v1172_v62 = vld [vmem:[#allocation2 + $0xe0] sm:$0xff] }
 0x3f6   :  { %v1064_v52 = vrot.slane %v1063_v1, 2 }
 0x3f8   :  { %v1065_v2 = vadd.f32 %v1064_v52, %v1063_v1 }
 0x3fa   :  { %v1066_v54 = vrot.slane %v1065_v2, 1 }
 0x3fc   :  { %v1067_v56 = vadd.f32 %v1066_v54, %v1065_v2 }
 0x3fe   :  { %v1068_v5 = vmul.f32 0.041666668, %v1067_v56 }
 0x400   :  { %v1069_v6 = vadd.f32 1e-05, %v1068_v5 }
 0x402   :  { %4352 = vrsqrt.f32 %v1069_v6 }
 0x40f   :  { %v4353_v21 = vpop.eup %4352 }
 0x410   :  { %v1071_v26 = vmul.f32 %v4353_v21, %v1051_v47  ;;  %v1072_v27 = vmul.f32 %v4353_v21, %v1052_v48  ;;  %v1073_v30 = vmul.f32 %v4353_v21, %v1053_v51  ;;  %v4822_v47 = vsub.s32 4, %v4570_v11  ;;  %v4827_v48 = vld [vmem:[%s5839_s8 + $0x18] sm:$0x7f] }
 0x411   :  { %v1149_v50 = vrot.slane %v4827_v48, %v4722_v9 }
 0x412   :  { %v1160_v51 = vrot.slane %v4827_v48, %v4822_v47 }
 0x434   :  { %v783_v14 = vpop.permute.xlu1 %782 }
 0x435   :  { %v791_v16 = vadd.f32 %v783_v14, %v4624_v35 }
 0x437   :  { %v802_v18 = vadd.f32 %v800_v15, %v791_v16 }
 0x438   :  { %v785_v19 = vpop.permute.xlu1 %784 }
 0x439   :  { %v792_v20 = vadd.f32 %v785_v19, %v4636_v39  ;;  %817 = vrot.lane.b32.xlu1 %v802_v18, %s4462_s26 }
 0x43b   :  { %v803_v22 = vadd.f32 %v800_v15, %v792_v20 }
 0x43c   :  { %v1080_v24 = vpop.permute.xlu1 %1079  ;;  %v787_v25 = vpop.permute.xlu0 %786 }
 0x43d   :  { %v793_v28 = vadd.f32 %v787_v25, %v4644_v42  ;;  %819 = vrot.lane.b32.xlu0 %v803_v22, %s4462_s26  ;;  %v1082_v31 = vmul.f32 %v1080_v24, %v1071_v26  ;;  %v1083_v32 = vmul.f32 %v1080_v24, %v1072_v27  ;;  %v1084_v36 = vmul.f32 %v1080_v24, %v1073_v30 }
 0x43f   :  { %v804_v33 = vadd.f32 %v800_v15, %v793_v28 }
 0x440   :  { %v1091_v34 = vpop.permute.xlu0 %1090 }
 0x441   :  { %v1093_v37 = vadd.f32 %v1091_v34, %v1082_v31  ;;  %v1094_v38 = vadd.f32 %v1091_v34, %v1083_v32  ;;  %821 = vrot.lane.b32.xlu1 %v804_v33, %s4462_s26  ;;  %v1095_v41 = vadd.f32 %v1091_v34, %v1084_v36 }
 0x443   :  { %v1097_v43 = vmax.f32 %v1094_v38, 0.0  ;;  %v1096_v44 = vmax.f32 %v1093_v37, 0.0  ;;  %v1098_v49 = vmax.f32 %v1095_v41, 0.0 }
 0x445   :  { %1185 = vrot.lane.b32.xlu1 %v1097_v43, %s4460_s25  ;;  %1183 = vrot.lane.b32.xlu0 %v1096_v44, %s4460_s25 }
 0x449   :  { %1104 = vrot.lane.b32.xlu1 %v1102_v45, %s4461_s6  ;;  %1187 = vrot.lane.b32.xlu0 %v1098_v49, %s4460_s25 }
 0x44d   :  { %1151 = vrot.lane.b32.xlu0 %v1149_v50, %s4461_s6  ;;  %1162 = vrot.lane.b32.xlu1 %v1160_v51, %s4461_s6 }
 0x4ab   :  { %v818_v55 = vpop.permute.xlu1 %817 }
 0x4ac   :  { %4063 = vmatmul.mubr.msk.f32.vlgmr.msra.gmra.mxu1 %vm160_vm2, %v818_v55 }
 0x4ad   :  { %4065 = vmatprep.mubr.msk.f32.mxu1 %vm4459_vm0, %v4458_v0  ;;  %4089 = vmatpush3.msra.mxu1 %v1175_v53 }
 0x4ae   :  { %4090 = vmatprep.subr.mxu1 %v4458_v0 }
 0x4af   :  { %v820_v60 = vpop.permute.xlu0 %819  ;;  %4091 = vmatpush3.msra.mxu1 %v1174_v57 }
 0x4b0   :  { %4066 = vmatmul.mubr.msk.f32.gmra.mxu1 %vm160_vm2, %v820_v60  ;;  %4092 = vmatprep.subr.mxu1 %v4458_v0 }
 0x4b1   :  { %4068 = vmatprep.mubr.msk.f32.mxu1 %vm4459_vm0, %v4458_v0  ;;  %4093 = vmatpush3.msra.mxu1 %v1173_v59 }
 0x4b2   :  { %4094 = vmatprep.subr.mxu1 %v4458_v0 }
 0x4b3   :  { %v822_v63 = vpop.permute.xlu1 %821  ;;  %4095 = vmatpush3.msra.mxu1 %v1172_v62 }
 0x4b4   :  { %4069 = vmatmul.mubr.msk.f32.gmra.mxu1 %vm160_vm2, %v822_v63  ;;  %4122 = vmatprep.subr.mxu1 %v4458_v0 }
 0x4b5   :  { %4096 = vmatprep.mubr.msk.f32.mxu1 %vm4459_vm0, %v4458_v0 }
 0x4b7   :  { %v1186_v1 = vpop.permute.xlu1 %1185  ;;  %v1184_v52 = vpop.permute.xlu0 %1183 }
 0x4b8   :  { %4097 = vmatmul.mubr.msk.f32.vlgmr.msra.gmra.mxu1 %vm160_vm2, %v1184_v52 }
 0x4b9   :  { %4099 = vmatprep.mubr.msk.f32.mxu1 %vm4459_vm0, %v4458_v0 }
 0x4bb   :  { %v1105_v2 = vpop.permute.xlu1 %1104  ;;  %v1188_v16 = vpop.permute.xlu0 %1187 }
 0x4bc   :  { %v1107_v54 = vadd.f32 %v1105_v2, %v4788_v17  ;;  %v1108_v56 = vadd.f32 %v1105_v2, %v4792_v23  ;;  %v1109_v5 = vadd.f32 %v1105_v2, %v4799_v29  ;;  %4100 = vmatmul.mubr.msk.f32.gmra.mxu1 %vm160_vm2, %v1186_v1 }
 0x4bd   :  { %4102 = vmatprep.mubr.msk.f32.mxu1 %vm4459_vm0, %v4458_v0 }
 0x4be   :  { %v1111_v6 = vsel %vm1110_vm11, %v1107_v54, 0.0  ;;  %v1112_v14 = vsel %vm1110_vm11, %v1108_v56, 0.0  ;;  %v1114_v18 = vsel %vm1110_vm11, %v1109_v5, 0.0 }
 0x4bf   :  { %v1113_v15 = vadd.f32 %v1112_v14, %v1111_v6  ;;  %v1152_v60 = vpop.permute.xlu0 %1151  ;;  %v1163_v52 = vpop.permute.xlu1 %1162  ;;  %v4869_v14 = vsub.s32 6, %v4570_v11 }
 0x4c0   :  { %4103 = vmatmul.mubr.msk.f32.gmra.mxu1 %vm160_vm2, %v1188_v16 }
 0x4c1   :  { %v1115_v19 = vadd.f32 %v1114_v18, %v1113_v15  ;;  %4130 = vmatprep.mubr.msk.f32.mxu1 %vm4459_vm0, %v4458_v0 }
 0x4c3   :  { %v1116_v20 = vrot.slane %v1115_v19, 4 }
 0x4c5   :  { %v1117_v21 = vadd.f32 %v1116_v20, %v1115_v19  ;;  %v1012_v19 = vrot.slane %v4578_v13, %v4869_v14  ;;  %v1956_v13 = vld [vmem:[%s5834_s3 + $0x18] sm:$0xff] }
 0x4c7   :  { %v1118_v22 = vrot.slane %v1117_v21, 2 }
 0x4c9   :  { %v1119_v24 = vadd.f32 %v1118_v22, %v1117_v21  ;;  %v1954_v21 = vld [vmem:[%s5834_s3 + $0x8] sm:$0xff]  ;;  %v1953_v22 = vld [vmem:[%s5834_s3] sm:$0xff] }
 0x4cb   :  { %v1120_v25 = vrot.slane %v1119_v24, 1 }
 0x4cd   :  { %v1121_v26 = vadd.f32 %v1120_v25, %v1119_v24  ;;  %v1955_v24 = vld [vmem:[%s5834_s3 + $0x10] sm:$0xff]  ;;  %v1958_v25 = vld [vmem:[%s5834_s3 + $0x28] sm:$0xff] }
 0x4cf   :  { %v1122_v27 = vmul.f32 0.041666668, %v1121_v26  ;;  %v1957_v26 = vld [vmem:[%s5834_s3 + $0x20] sm:$0xff] }
 0x4d1   :  { %v1123_v28 = vsub.f32 %v1107_v54, %v1122_v27  ;;  %v1124_v30 = vsub.f32 %v1108_v56, %v1122_v27  ;;  %v1125_v31 = vsub.f32 %v1109_v5, %v1122_v27  ;;  %v1960_v27 = vld [vmem:[%s5834_s3 + $0x38] sm:$0xff] }
 0x4d3   :  { %v1126_v32 = vmul.f32 %v1123_v28, %v1123_v28  ;;  %v1127_v33 = vmul.f32 %v1124_v30, %v1124_v30  ;;  %v1128_v34 = vmul.f32 %v1125_v31, %v1125_v31 }
 0x4d5   :  { %v1129_v36 = vsel %vm1110_vm11, %v1126_v32, 0.0  ;;  %v1130_v37 = vsel %vm1110_vm11, %v1127_v33, 0.0  ;;  %v1132_v41 = vsel %vm1110_vm11, %v1128_v34, 0.0  ;;  %v1964_v32 = vld [vmem:[%s5834_s3 + $0x58] sm:$0xff]  ;;  %v1963_v33 = vld [vmem:[%s5834_s3 + $0x50] sm:$0xff]  ;;  %v1966_v34 = vld [vmem:[%s5834_s3 + $0x68] sm:$0xff] }
 0x4d6   :  { %v1131_v38 = vadd.f32 %v1130_v37, %v1129_v36  ;;  %v1965_v36 = vld [vmem:[%s5834_s3 + $0x60] sm:$0xff]  ;;  %v1968_v37 = vld [vmem:[%s5834_s3 + $0x78] sm:$0xff] }
 0x4d8   :  { %v1133_v43 = vadd.f32 %v1132_v41, %v1131_v38  ;;  %v1967_v38 = vld [vmem:[%s5834_s3 + $0x70] sm:$0xff]  ;;  %v1970_v41 = vld [vmem:[%s5834_s3 + $0x88] sm:$0xff] }
 0x4da   :  { %v1134_v44 = vrot.slane %v1133_v43, 4 }
 0x4dc   :  { %v1135_v45 = vadd.f32 %v1134_v44, %v1133_v43  ;;  %v1969_v43 = vld [vmem:[%s5834_s3 + $0x80] sm:$0xff]  ;;  %v1331_v44 = vld [vmem:[#allocation2 + $0x118] sm:$0xff] }
 0x4dd   :  { %4106 = vmatpush3.msra.mxu0 %v1331_v44 }
 0x4de   :  { %v1136_v49 = vrot.slane %v1135_v45, 2  ;;  %4107 = vmatprep.subr.mxu0 %v4458_v0 }
 0x4e0   :  { %v1137_v50 = vadd.f32 %v1136_v49, %v1135_v45  ;;  %v1330_v45 = vld [vmem:[#allocation2 + $0x110] sm:$0xff]  ;;  %v1329_v49 = vld [vmem:[#allocation2 + $0x108] sm:$0xff] }
 0x4e1   :  { %4108 = vmatpush3.msra.mxu0 %v1330_v45 }
 0x4e2   :  { %v1138_v51 = vrot.slane %v1137_v50, 1  ;;  %4109 = vmatprep.subr.mxu0 %v4458_v0 }
 0x4e3   :  { %4110 = vmatpush3.msra.mxu0 %v1329_v49 }
 0x4e4   :  { %v1139_v53 = vadd.f32 %v1138_v51, %v1137_v50  ;;  %v1328_v50 = vld [vmem:[#allocation2 + $0x100] sm:$0xff]  ;;  %4111 = vmatprep.subr.mxu0 %v4458_v0 }
 0x4e5   :  { %4112 = vmatpush3.msra.mxu0 %v1328_v50 }
 0x4e6   :  { %v1140_v55 = vmul.f32 0.041666668, %v1139_v53  ;;  %4139 = vmatprep.subr.mxu0 %v4458_v0 }
 0x4e8   :  { %v1141_v57 = vadd.f32 1e-05, %v1140_v55 }
 0x4ea   :  { %4354 = vrsqrt.f32 %v1141_v57 }
 0x4f7   :  { %v4355_v59 = vpop.eup %4354 }
 0x4f8   :  { %v1143_v62 = vmul.f32 %v4355_v59, %v1123_v28  ;;  %v1144_v63 = vmul.f32 %v4355_v59, %v1124_v30  ;;  %v1145_v1 = vmul.f32 %v4355_v59, %v1125_v31  ;;  %v1959_v28 = vld [vmem:[%s5834_s3 + $0x30] sm:$0xff]  ;;  %v1962_v30 = vld [vmem:[%s5834_s3 + $0x48] sm:$0xff]  ;;  %v1961_v31 = vld [vmem:[%s5834_s3 + $0x40] sm:$0xff] }
 0x4fa   :  { %v1154_v2 = vmul.f32 %v1152_v60, %v1143_v62  ;;  %v1155_v54 = vmul.f32 %v1152_v60, %v1144_v63  ;;  %v1156_v56 = vmul.f32 %v1152_v60, %v1145_v1 }
 0x4fc   :  { %v1165_v5 = vadd.f32 %v1163_v52, %v1154_v2  ;;  %v1166_v6 = vadd.f32 %v1163_v52, %v1155_v54  ;;  %v1167_v15 = vadd.f32 %v1163_v52, %v1156_v56 }
 0x4fe   :  { %v1169_v16 = vmax.f32 %v1166_v6, 0.0  ;;  %v1168_v18 = vmax.f32 %v1165_v5, 0.0  ;;  %v1170_v20 = vmax.f32 %v1167_v15, 0.0 }
 0x500   :  { %1609 = vrot.lane.b32.xlu1 %v1169_v16, %s4462_s26  ;;  %1607 = vrot.lane.b32.xlu0 %v1168_v18, %s4462_s26  ;;  %v1179_v18 = vrot.slane %v4719_v8, %v4822_v47 }
 0x504   :  { %1014 = vrot.lane.b32.xlu1 %v1012_v19, %s4462_s26  ;;  %1611 = vrot.lane.b32.xlu0 %v1170_v20, %s4462_s26 }
 0x508   :  { %1991 = vrot.lane.b32.xlu1 %v1954_v21, %s4462_s26  ;;  %1989 = vrot.lane.b32.xlu0 %v1953_v22, %s4462_s26 }
 0x50c   :  { %1995 = vrot.lane.b32.xlu1 %v1956_v13, %s4462_s26  ;;  %1993 = vrot.lane.b32.xlu0 %v1955_v24, %s4462_s26 }
 0x510   :  { %1999 = vrot.lane.b32.xlu1 %v1958_v25, %s4462_s26  ;;  %1997 = vrot.lane.b32.xlu0 %v1957_v26, %s4462_s26 }
 0x514   :  { %2003 = vrot.lane.b32.xlu1 %v1960_v27, %s4462_s26  ;;  %2001 = vrot.lane.b32.xlu0 %v1959_v28, %s4462_s26 }
 0x518   :  { %2007 = vrot.lane.b32.xlu1 %v1962_v30, %s4462_s26  ;;  %2005 = vrot.lane.b32.xlu0 %v1961_v31, %s4462_s26 }
 0x51c   :  { %2011 = vrot.lane.b32.xlu1 %v1964_v32, %s4462_s26  ;;  %2009 = vrot.lane.b32.xlu0 %v1963_v33, %s4462_s26 }
 0x520   :  { %2015 = vrot.lane.b32.xlu1 %v1966_v34, %s4462_s26  ;;  %2013 = vrot.lane.b32.xlu0 %v1965_v36, %s4462_s26 }
 0x524   :  { %2019 = vrot.lane.b32.xlu1 %v1968_v37, %s4462_s26  ;;  %2017 = vrot.lane.b32.xlu0 %v1967_v38, %s4462_s26 }
 0x528   :  { %2023 = vrot.lane.b32.xlu1 %v1970_v41, %s4462_s26  ;;  %2021 = vrot.lane.b32.xlu0 %v1969_v43, %s4462_s26 }
 0x56c   :  { %v4953_v51 = vpop.f32.mrf.mxu1 }
 0x56e   :  { %v4064_v53 = vpop.f32.mrf.mxu1 }
 0x570   :  { %v4955_v55 = vpop.f32.mrf.mxu1 }
 0x572   :  { %v4957_v57 = vpop.permute.xlu1 %1609  ;;  %v4959_v59 = vpop.permute.xlu0 %1607 }
 0x573   :  { %v4067_v60 = vpop.f32.mrf.mxu1 }
 0x575   :  { %v4961_v62 = vpop.f32.mrf.mxu1 }
 0x576   :  { %v1015_v63 = vpop.permute.xlu1 %1014  ;;  %v4963_v1 = vpop.permute.xlu0 %1611 }
 0x577   :  { %v1017_v52 = vadd.f32 %v1015_v63, %v4788_v17  ;;  %v1018_v2 = vadd.f32 %v1015_v63, %v4792_v23  ;;  %v1019_v54 = vadd.f32 %v1015_v63, %v4799_v29  ;;  %v4070_v56 = vpop.f32.mrf.mxu1 }
 0x579   :  { %v1020_v5 = vmul.f32 1.442695, %v1017_v52  ;;  %v1022_v6 = vmul.f32 1.442695, %v1018_v2  ;;  %v1024_v15 = vmul.f32 1.442695, %v1019_v54  ;;  %v1261_v16 = vpop.f32.mrf.mxu1 }
 0x57a   :  { %v1992_v19 = vpop.permute.xlu1 %1991  ;;  %v1990_v20 = vpop.permute.xlu0 %1989  ;;  %v1262_v13 = vadd.f32 %v1261_v16, %v1179_v18 }
 0x57b   :  { %4356 = vpow2.f32 %v1020_v5  ;;  %v4098_v21 = vpop.f32.mrf.mxu1 }
 0x57c   :  { %4358 = vpow2.f32 %v1022_v6  ;;  %v1275_v31 = vsel %vm160_vm2, %v1262_v13, 0.0 }
 0x57d   :  { %4360 = vpow2.f32 %v1024_v15  ;;  %v1266_v22 = vpop.f32.mrf.mxu1 }
 0x57e   :  { %v1267_v24 = vadd.f32 %v1266_v22, %v1179_v18  ;;  %v1996_v25 = vpop.permute.xlu1 %1995  ;;  %v1994_v26 = vpop.permute.xlu0 %1993 }
 0x57f   :  { %v4101_v27 = vpop.f32.mrf.mxu1 }
 0x580   :  { %v1276_v28 = vsel %vm160_vm2, %v1267_v24, 0.0 }
 0x581   :  { %v1271_v30 = vpop.f32.mrf.mxu1  ;;  %v1277_v8 = vadd.f32 %v1276_v28, %v1275_v31 }
 0x582   :  { %v1272_v32 = vadd.f32 %v1271_v30, %v1179_v18  ;;  %v1998_v33 = vpop.permute.xlu0 %1997  ;;  %v2000_v34 = vpop.permute.xlu1 %1999 }
 0x583   :  { %v4104_v36 = vpop.f32.mrf.mxu1 }
 0x584   :  { %v1278_v37 = vsel %vm160_vm2, %v1272_v32, 0.0 }
 0x585   :  { %v1279_v38 = vadd.f32 %v1278_v37, %v1277_v8 }
 0x586   :  { %v2002_v44 = vpop.permute.xlu0 %2001  ;;  %v2004_v53 = vpop.permute.xlu1 %2003 }
 0x587   :  { %v1280_v41 = vrot.slane %v1279_v38, 4 }
 0x588   :  { %v4973_v43 = vpop.eup %4356 }
 0x589   :  { %v4975_v45 = vpop.eup %4358  ;;  %v2043_v49 = vmul.f32 %v4973_v43, %v1990_v20  ;;  %v1281_v50 = vadd.f32 %v1280_v41, %v1279_v38  ;;  %v2046_v56 = vmul.f32 %v4973_v43, %v1996_v25  ;;  %v2049_v27 = vmul.f32 %v4973_v43, %v2002_v44 }
 0x58a   :  { %v4978_v60 = vpop.eup %4360  ;;  %v2044_v63 = vmul.f32 %v4975_v45, %v1992_v19  ;;  %v2006_v5 = vpop.permute.xlu0 %2005  ;;  %v2047_v18 = vmul.f32 %v4975_v45, %v1998_v33  ;;  %v2050_v30 = vmul.f32 %v4975_v45, %v2004_v53 }
 0x58b   :  { %v1282_v52 = vrot.slane %v1281_v50, 2  ;;  %2079 = vrot.lane.b32.xlu0 %v2043_v49, %s4461_s6  ;;  %v2045_v2 = vmul.f32 %v4978_v60, %v1994_v26  ;;  %v2008_v15 = vpop.permute.xlu1 %2007  ;;  %v2048_v19 = vmul.f32 %v4978_v60, %v2000_v34 }
 0x58c   :  { %2081 = vrot.lane.b32.xlu1 %v2044_v63, %s4461_s6 }
 0x58d   :  { %v1283_v54 = vadd.f32 %v1282_v52, %v1281_v50 }
 0x58e   :  { %v2010_v21 = vpop.permute.xlu0 %2009 }
 0x58f   :  { %v1284_v6 = vrot.slane %v1283_v54, 1  ;;  %2083 = vrot.lane.b32.xlu0 %v2045_v2, %s4461_s6  ;;  %v2012_v28 = vpop.permute.xlu1 %2011  ;;  %v2053_v49 = vmul.f32 %v4975_v45, %v2010_v21 }
 0x590   :  { %2085 = vrot.lane.b32.xlu1 %v2046_v56, %s4461_s6  ;;  %v2054_v53 = vmul.f32 %v4978_v60, %v2012_v28 }
 0x591   :  { %v1285_v16 = vadd.f32 %v1284_v6, %v1283_v54 }
 0x592   :  { %v2014_v37 = vpop.permute.xlu0 %2013 }
 0x593   :  { %v1286_v20 = vmul.f32 0.041666668, %v1285_v16  ;;  %2087 = vrot.lane.b32.xlu0 %v2047_v18, %s4461_s6  ;;  %v2016_v41 = vpop.permute.xlu1 %2015  ;;  %v2055_v2 = vmul.f32 %v4973_v43, %v2014_v37 }
 0x594   :  { %2089 = vrot.lane.b32.xlu1 %v2048_v19, %s4461_s6 }
 0x595   :  { %v1287_v22 = vsub.f32 %v1262_v13, %v1286_v20  ;;  %v1288_v25 = vsub.f32 %v1267_v24, %v1286_v20  ;;  %v1289_v26 = vsub.f32 %v1272_v32, %v1286_v20  ;;  %v2051_v13 = vmul.f32 %v4978_v60, %v2006_v5 }
 0x596   :  { %v2052_v32 = vmul.f32 %v4973_v43, %v2008_v15  ;;  %v2018_v52 = vpop.permute.xlu0 %2017  ;;  %v2056_v5 = vmul.f32 %v4975_v45, %v2016_v41 }
 0x597   :  { %v1290_v31 = vmul.f32 %v1287_v22, %v1287_v22  ;;  %v1291_v8 = vmul.f32 %v1288_v25, %v1288_v25  ;;  %v1292_v36 = vmul.f32 %v1289_v26, %v1289_v26  ;;  %2091 = vrot.lane.b32.xlu0 %v2049_v27, %s4461_s6  ;;  %v2020_v54 = vpop.permute.xlu1 %2019  ;;  %v2057_v15 = vmul.f32 %v4978_v60, %v2018_v52  ;;  %v1480_v52 = vld [vmem:[#allocation2 + $0x130] sm:$0xff] }
 0x598   :  { %2093 = vrot.lane.b32.xlu1 %v2050_v30, %s4461_s6  ;;  %v2058_v18 = vmul.f32 %v4973_v43, %v2020_v54  ;;  %v1313_v43 = vrot.slane %v4776_v4, %v4722_v9 }
 0x599   :  { %v1293_v33 = vsel %vm160_vm2, %v1290_v31, 0.0  ;;  %v1294_v34 = vsel %vm160_vm2, %v1291_v8, 0.0  ;;  %v1296_v38 = vsel %vm160_vm2, %v1292_v36, 0.0 }
 0x59a   :  { %v1295_v24 = vadd.f32 %v1294_v34, %v1293_v33  ;;  %v2022_v19 = vpop.permute.xlu0 %2021 }
 0x59b   :  { %2095 = vrot.lane.b32.xlu0 %v2051_v13, %s4461_s6  ;;  %v2024_v20 = vpop.permute.xlu1 %2023  ;;  %v2059_v27 = vmul.f32 %v4975_v45, %v2022_v19 }
 0x59c   :  { %v1297_v44 = vadd.f32 %v1296_v38, %v1295_v24  ;;  %2097 = vrot.lane.b32.xlu1 %v2052_v32, %s4461_s6  ;;  %v2060_v30 = vmul.f32 %v4978_v60, %v2024_v20  ;;  %v1320_v60 = vrot.slane %v4776_v4, %v4822_v47  ;;  %v1596_v38 = vld [vmem:[#allocation2 + $0x140] sm:$0xff] }
 0x59e   :  { %v1298_v50 = vrot.slane %v1297_v44, 4 }
 0x59f   :  { %2099 = vrot.lane.b32.xlu0 %v2053_v49, %s4461_s6 }
 0x5a0   :  { %v1299_v63 = vadd.f32 %v1298_v50, %v1297_v44  ;;  %2101 = vrot.lane.b32.xlu1 %v2054_v53, %s4461_s6 }
 0x5a2   :  { %v1300_v56 = vrot.slane %v1299_v63, 2 }
 0x5a3   :  { %2103 = vrot.lane.b32.xlu0 %v2055_v2, %s4461_s6  ;;  %v1478_v2 = vld [vmem:[#allocation2 + $0x120] sm:$0xff] }
 0x5a4   :  { %v1301_v6 = vadd.f32 %v1300_v56, %v1299_v63  ;;  %2105 = vrot.lane.b32.xlu1 %v2056_v5, %s4461_s6  ;;  %v5088_v56 = vld [vmem:[%s5839_s8 + $0x8] sm:$0xff] }
 0x5a6   :  { %v1302_v16 = vrot.slane %v1301_v6, 1 }
 0x5a7   :  { %2107 = vrot.lane.b32.xlu0 %v2057_v15, %s4461_s6 }
 0x5a8   :  { %v1303_v21 = vadd.f32 %v1302_v16, %v1301_v6  ;;  %2109 = vrot.lane.b32.xlu1 %v2058_v18, %s4461_s6 }
 0x5aa   :  { %v1304_v28 = vmul.f32 0.041666668, %v1303_v21 }
 0x5ab   :  { %2111 = vrot.lane.b32.xlu0 %v2059_v27, %s4461_s6 }
 0x5ac   :  { %v1305_v31 = vadd.f32 1e-05, %v1304_v28  ;;  %2113 = vrot.lane.b32.xlu1 %v2060_v30, %s4461_s6 }
 0x5ae   :  { %4362 = vrsqrt.f32 %v1305_v31 }
 0x5af   :  { %628 = vrot.lane.b32.xlu0 %v4624_v35, %s4461_s6 }
 0x5b0   :  { %630 = vrot.lane.b32.xlu1 %v4636_v39, %s4461_s6  ;;  %v1599_v39 = vld [vmem:[#allocation2 + $0x158] sm:$0xff] }
 0x5b3   :  { %632 = vrot.lane.b32.xlu0 %v4644_v42, %s4461_s6  ;;  %v1598_v42 = vld [vmem:[#allocation2 + $0x150] sm:$0xff] }
 0x5bb   :  { %v4363_v45 = vpop.eup %4362 }
 0x5bc   :  { %v1307_v8 = vmul.f32 %v4363_v45, %v1287_v22  ;;  %v1308_v36 = vmul.f32 %v4363_v45, %v1288_v25  ;;  %v1309_v33 = vmul.f32 %v4363_v45, %v1289_v26  ;;  %v1597_v22 = vld [vmem:[#allocation2 + $0x148] sm:$0xff]  ;;  %v5035_v25 = vld [vmem:[%s5839_s8] sm:$0xff] }
 0x5bd   :  { %v813_v26 = vrot.slane %v5035_v25, %v4822_v47 }
 0x5be   :  { %v1314_v34 = vmul.f32 %v1313_v43, %v1307_v8  ;;  %v1315_v13 = vmul.f32 %v1313_v43, %v1308_v36  ;;  %v1316_v35 = vmul.f32 %v1313_v43, %v1309_v33 }
 0x5bf   :  { %v5042_v41 = vadd.f32 %v4955_v55, %v813_v26  ;;  %v5048_v49 = vadd.f32 %v4953_v51, %v813_v26  ;;  %v5053_v47 = vadd.f32 %v4961_v62, %v813_v26 }
 0x5c0   :  { %v1321_v24 = vadd.f32 %v1320_v60, %v1314_v34  ;;  %v1322_v37 = vadd.f32 %v1320_v60, %v1315_v13  ;;  %v1323_v4 = vadd.f32 %v1320_v60, %v1316_v35  ;;  %v1603_v60 = vrot.slane %v4827_v48, %v4573_v12 }
 0x5c1   :  { %v3078_v55 = vmul.f32 %v5042_v41, %v5042_v41  ;;  %v3077_v50 = vmul.f32 %v5048_v49, %v5048_v49  ;;  %v3079_v62 = vmul.f32 %v5053_v47, %v5053_v47 }
 0x5c2   :  { %v1324_v32 = vmax.f32 %v1321_v24, 0.0  ;;  %v1325_v9 = vmax.f32 %v1322_v37, 0.0  ;;  %v1326_v44 = vmax.f32 %v1323_v4, 0.0 }
 0x5c3   :  { %v3083_v51 = vsel %vm160_vm2, %v3078_v55, 0.0  ;;  %v3080_v53 = vsel %vm160_vm2, %v3077_v50, 0.0  ;;  %v3086_v63 = vsel %vm160_vm2, %v3079_v62, 0.0 }
 0x5c4   :  { %4114 = vmatmul.mubr.msk.f32.vlgmr.msra.gmra.mxu0 %vm160_vm2, %v1324_v32 }
 0x5c5   :  { %4116 = vmatprep.mubr.msk.f32.mxu0 %vm4459_vm0, %v4458_v0  ;;  %4140 = vmatpush3.msra.mxu0 %v1599_v39 }
 0x5c6   :  { %4141 = vmatprep.subr.mxu0 %v4458_v0 }
 0x5c7   :  { %4142 = vmatpush3.msra.mxu0 %v1598_v42 }
 0x5c8   :  { %4117 = vmatmul.mubr.msk.f32.gmra.mxu0 %vm160_vm2, %v1325_v9  ;;  %4143 = vmatprep.subr.mxu0 %v4458_v0 }
 0x5c9   :  { %4119 = vmatprep.mubr.msk.f32.mxu0 %vm4459_vm0, %v4458_v0  ;;  %4144 = vmatpush3.msra.mxu0 %v1597_v22 }
 0x5ca   :  { %4145 = vmatprep.subr.mxu0 %v4458_v0 }
 0x5cb   :  { %4146 = vmatpush3.msra.mxu0 %v1596_v38 }
 0x5cc   :  { %4120 = vmatmul.mubr.msk.f32.gmra.mxu0 %vm160_vm2, %v1326_v44  ;;  %4173 = vmatprep.subr.mxu0 %v4458_v0 }
 0x5cd   :  { %4147 = vmatprep.mubr.msk.f32.mxu0 %vm4459_vm0, %v4458_v0 }
 0x5d0   :  { %4148 = vmatmul.mubr.msk.f32.vlgmr.msra.gmra.mxu0 %vm160_vm2, %v4959_v59  ;;  %v1481_v59 = vld [vmem:[#allocation2 + $0x138] sm:$0xff] }
 0x5d1   :  { %4150 = vmatprep.mubr.msk.f32.mxu0 %vm4459_vm0, %v4458_v0  ;;  %4123 = vmatpush3.msra.mxu1 %v1481_v59 }
 0x5d2   :  { %3084 = vadd.xlane.f32.xlu0 %v3083_v51  ;;  %4124 = vmatprep.subr.mxu1 %v4458_v0 }
 0x5d3   :  { %4125 = vmatpush3.msra.mxu1 %v1480_v52 }
 0x5d4   :  { %3081 = vadd.xlane.f32.xlu1 %v3080_v53  ;;  %4151 = vmatmul.mubr.msk.f32.gmra.mxu0 %vm160_vm2, %v4957_v57  ;;  %v1479_v57 = vld [vmem:[#allocation2 + $0x128] sm:$0xff] }
 0x5d5   :  { %4153 = vmatprep.mubr.msk.f32.mxu0 %vm4459_vm0, %v4458_v0  ;;  %4126 = vmatprep.subr.mxu1 %v4458_v0 }
 0x5d6   :  { %3087 = vadd.xlane.f32.xlu0 %v3086_v63  ;;  %4127 = vmatpush3.msra.mxu1 %v1479_v57 }
 0x5d7   :  { %4128 = vmatprep.subr.mxu1 %v4458_v0 }
 0x5d8   :  { %4154 = vmatmul.mubr.msk.f32.gmra.mxu0 %vm160_vm2, %v4963_v1  ;;  %4129 = vmatpush3.msra.mxu1 %v1478_v2  ;;  %v5083_v1 = vsub.s32 5, %v4570_v11 }
 0x5d9   :  { %4181 = vmatprep.mubr.msk.f32.mxu0 %vm4459_vm0, %v4458_v0  ;;  %4156 = vmatprep.subr.mxu1 %v4458_v0 }
 0x5da   :  { %v1335_v5 = vrot.slane %v5088_v56, %v5083_v1 }
 0x684   :  { %v1411_v54 = vpop.f32.mrf.mxu0 }
 0x685   :  { %v1412_v16 = vadd.f32 %v1411_v54, %v1335_v5 }
 0x686   :  { %v4115_v6 = vpop.f32.mrf.mxu0 }
 0x687   :  { %v1425_v11 = vsel %vm160_vm2, %v1412_v16, 0.0 }
 0x688   :  { %v1416_v15 = vpop.f32.mrf.mxu0 }
 0x689   :  { %v1417_v18 = vadd.f32 %v1416_v15, %v1335_v5 }
 0x68a   :  { %v4118_v19 = vpop.f32.mrf.mxu0 }
 0x68b   :  { %v1426_v20 = vsel %vm160_vm2, %v1417_v18, 0.0 }
 0x68c   :  { %v1421_v21 = vpop.f32.mrf.mxu0  ;;  %v1427_v28 = vadd.f32 %v1426_v20, %v1425_v11 }
 0x68d   :  { %v1422_v27 = vadd.f32 %v1421_v21, %v1335_v5 }
 0x68e   :  { %v4121_v30 = vpop.f32.mrf.mxu0 }
 0x68f   :  { %v1428_v31 = vsel %vm160_vm2, %v1422_v27, 0.0 }
 0x690   :  { %v1429_v43 = vadd.f32 %v1428_v31, %v1427_v28  ;;  %v1685_v45 = vpop.f32.mrf.mxu0 }
 0x691   :  { %v1686_v13 = vadd.f32 %v1685_v45, %v1603_v60 }
 0x692   :  { %v1430_v8 = vrot.slane %v1429_v43, 4  ;;  %v4149_v36 = vpop.f32.mrf.mxu0 }
 0x693   :  { %v1699_v9 = vsel %vm160_vm2, %v1686_v13, 0.0 }
 0x694   :  { %v1431_v33 = vadd.f32 %v1430_v8, %v1429_v43  ;;  %v1690_v34 = vpop.f32.mrf.mxu0 }
 0x695   :  { %v1691_v24 = vadd.f32 %v1690_v34, %v1603_v60 }
 0x696   :  { %v1432_v35 = vrot.slane %v1431_v33, 2  ;;  %v4152_v32 = vpop.f32.mrf.mxu0 }
 0x697   :  { %v1700_v37 = vsel %vm160_vm2, %v1691_v24, 0.0 }
 0x698   :  { %v1433_v39 = vadd.f32 %v1432_v35, %v1431_v33  ;;  %v1695_v42 = vpop.f32.mrf.mxu0  ;;  %v1701_v26 = vadd.f32 %v1700_v37, %v1699_v9 }
 0x699   :  { %v1696_v4 = vadd.f32 %v1695_v42, %v1603_v60 }
 0x69a   :  { %v1434_v22 = vrot.slane %v1433_v39, 1  ;;  %v4155_v38 = vpop.f32.mrf.mxu0 }
 0x69b   :  { %v1702_v44 = vsel %vm160_vm2, %v1696_v4, 0.0 }
 0x69c   :  { %v1435_v55 = vadd.f32 %v1434_v22, %v1433_v39  ;;  %v1703_v50 = vadd.f32 %v1702_v44, %v1701_v26 }
 0x69e   :  { %v1436_v51 = vmul.f32 0.041666668, %v1435_v55  ;;  %v1704_v62 = vrot.slane %v1703_v50, 4 }
 0x6a0   :  { %v1437_v53 = vsub.f32 %v1412_v16, %v1436_v51  ;;  %v1438_v63 = vsub.f32 %v1417_v18, %v1436_v51  ;;  %v1439_v59 = vsub.f32 %v1422_v27, %v1436_v51  ;;  %v1705_v52 = vadd.f32 %v1704_v62, %v1703_v50 }
 0x6a2   :  { %v1440_v57 = vmul.f32 %v1437_v53, %v1437_v53  ;;  %v1441_v2 = vmul.f32 %v1438_v63, %v1438_v63  ;;  %v1442_v54 = vmul.f32 %v1439_v59, %v1439_v59  ;;  %v1706_v5 = vrot.slane %v1705_v52, 2 }
 0x6a4   :  { %v1443_v6 = vsel %vm160_vm2, %v1440_v57, 0.0  ;;  %v1444_v15 = vsel %vm160_vm2, %v1441_v2, 0.0  ;;  %v1707_v19 = vadd.f32 %v1706_v5, %v1705_v52  ;;  %v1446_v21 = vsel %vm160_vm2, %v1442_v54, 0.0  ;;  %v4406_v52 = vld [vmem:[%s5839_s8 + $0x10] sm:$0xff] }
 0x6a5   :  { %v1445_v20 = vadd.f32 %v1444_v15, %v1443_v6  ;;  %v1463_v57 = vrot.slane %v4406_v52, %v5083_v1  ;;  %v1470_v54 = vrot.slane %v4406_v52, %v4869_v14 }
 0x6a6   :  { %v1708_v11 = vrot.slane %v1707_v19, 1 }
 0x6a7   :  { %v1447_v28 = vadd.f32 %v1446_v21, %v1445_v20 }
 0x6a8   :  { %v1709_v30 = vadd.f32 %v1708_v11, %v1707_v19 }
 0x6a9   :  { %v1448_v31 = vrot.slane %v1447_v28, 4 }
 0x6aa   :  { %v1710_v16 = vmul.f32 0.041666668, %v1709_v30 }
 0x6ab   :  { %v1449_v18 = vadd.f32 %v1448_v31, %v1447_v28  ;;  %v1755_v31 = vld [vmem:[#allocation2 + $0x178] sm:$0xff] }
 0x6ac   :  { %v1711_v27 = vsub.f32 %v1686_v13, %v1710_v16  ;;  %v1712_v43 = vsub.f32 %v1691_v24, %v1710_v16  ;;  %v1713_v45 = vsub.f32 %v1696_v4, %v1710_v16  ;;  %v2080_v16 = vpop.permute.xlu0 %2079 }
 0x6ad   :  { %v1450_v60 = vrot.slane %v1449_v18, 2 }
 0x6ae   :  { %v1714_v8 = vmul.f32 %v1711_v27, %v1711_v27  ;;  %v1715_v36 = vmul.f32 %v1712_v43, %v1712_v43  ;;  %v1716_v33 = vmul.f32 %v1713_v45, %v1713_v45 }
 0x6af   :  { %v1451_v34 = vadd.f32 %v1450_v60, %v1449_v18  ;;  %v1754_v18 = vld [vmem:[#allocation2 + $0x170] sm:$0xff]  ;;  %v1753_v60 = vld [vmem:[#allocation2 + $0x168] sm:$0xff] }
 0x6b0   :  { %v1717_v35 = vsel %vm160_vm2, %v1714_v8, 0.0  ;;  %v1718_v32 = vsel %vm160_vm2, %v1715_v36, 0.0  ;;  %v1720_v42 = vsel %vm160_vm2, %v1716_v33, 0.0  ;;  %v2082_v36 = vpop.permute.xlu1 %2081  ;;  %v1744_v33 = vrot.slane %v4827_v48, %v4869_v14 }
 0x6b1   :  { %v1452_v37 = vrot.slane %v1451_v34, 1  ;;  %v1719_v39 = vadd.f32 %v1718_v32, %v1717_v35  ;;  %v1752_v35 = vld [vmem:[#allocation2 + $0x160] sm:$0xff] }
 0x6b3   :  { %v1453_v9 = vadd.f32 %v1452_v37, %v1451_v34  ;;  %v1721_v22 = vadd.f32 %v1720_v42, %v1719_v39  ;;  %v2155_v37 = vld [vmem:[#allocation2 + $0x78] sm:$0xff]  ;;  %v2084_v39 = vpop.permute.xlu0 %2083 }
 0x6b5   :  { %v1454_v26 = vmul.f32 0.041666668, %v1453_v9  ;;  %v1722_v38 = vrot.slane %v1721_v22, 4 }
 0x6b7   :  { %v1455_v13 = vadd.f32 1e-05, %v1454_v26  ;;  %v1723_v24 = vadd.f32 %v1722_v38, %v1721_v22 }
 0x6b9   :  { %4364 = vrsqrt.f32 %v1455_v13  ;;  %v1724_v4 = vrot.slane %v1723_v24, 2 }
 0x6bb   :  { %v1725_v44 = vadd.f32 %v1724_v4, %v1723_v24  ;;  %v2154_v24 = vld [vmem:[#allocation2 + $0x70] sm:$0xff]  ;;  %v2088_v4 = vpop.permute.xlu0 %2087 }
 0x6bd   :  { %v1726_v55 = vrot.slane %v1725_v44, 1 }
 0x6bf   :  { %v1727_v50 = vadd.f32 %v1726_v55, %v1725_v44  ;;  %v2153_v44 = vld [vmem:[#allocation2 + $0x68] sm:$0xff] }
 0x6c1   :  { %v1728_v51 = vmul.f32 0.041666668, %v1727_v50 }
 0x6c3   :  { %v1729_v62 = vadd.f32 1e-05, %v1728_v51 }
 0x6c5   :  { %4366 = vrsqrt.f32 %v1729_v62  ;;  %v2152_v62 = vld [vmem:[#allocation2 + $0x60] sm:$0xff] }
 0x6c6   :  { %v4365_v2 = vpop.eup %4364 }
 0x6c7   :  { %v1457_v5 = vmul.f32 %v4365_v2, %v1437_v53  ;;  %v1458_v6 = vmul.f32 %v4365_v2, %v1438_v63  ;;  %v1459_v15 = vmul.f32 %v4365_v2, %v1439_v59  ;;  %v1737_v53 = vrot.slane %v4827_v48, %v5083_v1 }
 0x6c9   :  { %v1464_v19 = vmul.f32 %v1463_v57, %v1457_v5  ;;  %v1465_v20 = vmul.f32 %v1463_v57, %v1458_v6  ;;  %v1466_v11 = vmul.f32 %v1463_v57, %v1459_v15 }
 0x6cb   :  { %v1471_v21 = vadd.f32 %v1470_v54, %v1464_v19  ;;  %v1472_v30 = vadd.f32 %v1470_v54, %v1465_v20  ;;  %v1473_v59 = vadd.f32 %v1470_v54, %v1466_v11 }
 0x6cd   :  { %v1474_v28 = vmax.f32 %v1471_v21, 0.0  ;;  %v1475_v63 = vmax.f32 %v1472_v30, 0.0  ;;  %v1476_v22 = vmax.f32 %v1473_v59, 0.0 }
 0x6cf   :  { %4131 = vmatmul.mubr.msk.f32.vlgmr.msra.gmra.mxu1 %vm160_vm2, %v1474_v28 }
 0x6d0   :  { %4133 = vmatprep.mubr.msk.f32.mxu1 %vm4459_vm0, %v4458_v0  ;;  %4157 = vmatpush3.msra.mxu1 %v1755_v31 }
 0x6d1   :  { %4158 = vmatprep.subr.mxu1 %v4458_v0 }
 0x6d2   :  { %v4367_v8 = vpop.eup %4366  ;;  %4159 = vmatpush3.msra.mxu1 %v1754_v18 }
 0x6d3   :  { %v1731_v34 = vmul.f32 %v4367_v8, %v1711_v27  ;;  %4134 = vmatmul.mubr.msk.f32.gmra.mxu1 %vm160_vm2, %v1475_v63  ;;  %4160 = vmatprep.subr.mxu1 %v4458_v0  ;;  %v1732_v32 = vmul.f32 %v4367_v8, %v1712_v43  ;;  %v1733_v42 = vmul.f32 %v4367_v8, %v1713_v45  ;;  %v2086_v27 = vpop.permute.xlu1 %2085 }
 0x6d4   :  { %4136 = vmatprep.mubr.msk.f32.mxu1 %vm4459_vm0, %v4458_v0  ;;  %4161 = vmatpush3.msra.mxu1 %v1753_v60  ;;  %v1005_v45 = vrot.slane %v5035_v25, %v5083_v1  ;;  %v2092_v1 = vpop.permute.xlu0 %2091 }
 0x6d5   :  { %v1738_v9 = vmul.f32 %v1737_v53, %v1731_v34  ;;  %4162 = vmatprep.subr.mxu1 %v4458_v0  ;;  %v1739_v26 = vmul.f32 %v1737_v53, %v1732_v32  ;;  %v1740_v43 = vmul.f32 %v1737_v53, %v1733_v42 }
 0x6d6   :  { %4163 = vmatpush3.msra.mxu1 %v1752_v35  ;;  %v1006_v52 = vadd.f32 %v1005_v45, %v4788_v17  ;;  %v1007_v54 = vadd.f32 %v1005_v45, %v4792_v23  ;;  %v1008_v5 = vadd.f32 %v1005_v45, %v4799_v29 }
 0x6d7   :  { %v1745_v48 = vadd.f32 %v1744_v33, %v1738_v9  ;;  %4137 = vmatmul.mubr.msk.f32.gmra.mxu1 %vm160_vm2, %v1476_v22  ;;  %4190 = vmatprep.subr.mxu1 %v2155_v37  ;;  %v1746_v13 = vadd.f32 %v1744_v33, %v1739_v26  ;;  %v1747_v50 = vadd.f32 %v1744_v33, %v1740_v43  ;;  %v2090_v51 = vpop.permute.xlu1 %2089  ;;  %v1856_v22 = vld [vmem:[#allocation2 + $0x198] sm:$0xff]  ;;  %v1855_v26 = vld [vmem:[#allocation2 + $0x190] sm:$0xff] }
 0x6d8   :  { %4164 = vmatprep.mubr.msk.f32.mxu1 %vm4459_vm0, %v4458_v0  ;;  %v2133_v2 = vadd.f32 %v2080_v16, %v1006_v52  ;;  %v2134_v15 = vadd.f32 %v2082_v36, %v1007_v54  ;;  %v2135_v17 = vadd.f32 %v2084_v39, %v1008_v5  ;;  %v2096_v19 = vpop.permute.xlu0 %2095  ;;  %v2136_v20 = vadd.f32 %v2086_v27, %v1006_v52  ;;  %v1853_v27 = vld [vmem:[#allocation2 + $0x180] sm:$0xff]  ;;  %v2391_v43 = vld [vmem:[#allocation2 + $0x98] sm:$0xff] }
 0x6d9   :  { %v1748_v38 = vmax.f32 %v1745_v48, 0.0  ;;  %v1749_v55 = vmax.f32 %v1746_v13, 0.0  ;;  %v1750_v57 = vmax.f32 %v1747_v50, 0.0  ;;  %v2137_v21 = vadd.f32 %v2088_v4, %v1007_v54  ;;  %4174 = vmatpush3.msra.mxu0 %v1856_v22  ;;  %v1854_v48 = vld [vmem:[#allocation2 + $0x188] sm:$0xff] }
 0x6da   :  { %v2138_v23 = vadd.f32 %v2090_v51, %v1008_v5  ;;  %v2139_v29 = vadd.f32 %v2092_v1, %v1006_v52  ;;  %v2141_v16 = vadd.f32 %v2096_v19, %v1008_v5  ;;  %4175 = vmatprep.subr.mxu0 %v4458_v0 }
 0x6db   :  { %4165 = vmatmul.mubr.msk.f32.vlgmr.msra.gmra.mxu1 %vm160_vm2, %v1748_v38  ;;  %v2094_v6 = vpop.permute.xlu1 %2093  ;;  %4176 = vmatpush3.msra.mxu0 %v1855_v26  ;;  %v2627_v38 = vld [vmem:[#allocation2 + $0xb8] sm:$0xff] }
 0x6dc   :  { %4167 = vmatprep.mubr.msk.f32.mxu1 %vm4459_vm0, %v4458_v0  ;;  %4191 = vmatpush3.msra.mxu1 %v2155_v37  ;;  %v2100_v28 = vpop.permute.xlu0 %2099  ;;  %v2140_v31 = vadd.f32 %v2094_v6, %v1007_v54 }
 0x6dd   :  { %4192 = vmatprep.subr.mxu1 %v2154_v24  ;;  %v2143_v63 = vadd.f32 %v2100_v28, %v1007_v54  ;;  %4177 = vmatprep.subr.mxu0 %v4458_v0 }
 0x6de   :  { %4193 = vmatpush3.msra.mxu1 %v2154_v24  ;;  %4178 = vmatpush3.msra.mxu0 %v1854_v48 }
 0x6df   :  { %4168 = vmatmul.mubr.msk.f32.gmra.mxu1 %vm160_vm2, %v1749_v55  ;;  %4194 = vmatprep.subr.mxu1 %v2153_v44  ;;  %v2098_v11 = vpop.permute.xlu1 %2097  ;;  %v5169_v55 = vld [vmem:[%s5839_s8 + $0x18] sm:$0x7f] }
 0x6e0   :  { %4170 = vmatprep.mubr.msk.f32.mxu1 %vm4459_vm0, %v4458_v0  ;;  %4195 = vmatpush3.msra.mxu1 %v2153_v44  ;;  %v2104_v18 = vpop.permute.xlu0 %2103  ;;  %v2142_v53 = vadd.f32 %v2098_v11, %v1006_v52  ;;  %v1759_v50 = vrot.slane %v5169_v55, %v4737_v46  ;;  %v5179_v11 = vrot.slane %v5035_v25, %v4815_v40 }
 0x6e1   :  { %4196 = vmatprep.subr.mxu1 %v2152_v62  ;;  %v2145_v36 = vadd.f32 %v2104_v18, %v1006_v52  ;;  %4179 = vmatprep.subr.mxu0 %v4458_v0 }
 0x6e2   :  { %4197 = vmatpush3.msra.mxu1 %v2152_v62  ;;  %4180 = vmatpush3.msra.mxu0 %v1853_v27 }
 0x6e3   :  { %4171 = vmatmul.mubr.msk.f32.gmra.mxu1 %vm160_vm2, %v1750_v57  ;;  %v2102_v30 = vpop.permute.xlu1 %2101  ;;  %4225 = vmatprep.subr.mxu0 %v2391_v43 }
 0x6e4   :  { %4198 = vmatprep.mubr.msk.f32.mxu1 %vm160_vm2, %v2133_v2  ;;  %v2144_v60 = vadd.f32 %v2102_v30, %v1008_v5  ;;  %v2108_v8 = vpop.permute.xlu0 %2107  ;;  %4260 = vmatprep.subr.mxu1 %v2627_v38 }
 0x6e5   :  { %v2147_v35 = vadd.f32 %v2108_v8, %v1008_v5 }
 0x6e7   :  { %4199 = vmatmul.mubr.msk.f32.vlgmr.msra.gmra.mxu1 %vm160_vm2, %v2134_v15  ;;  %v2106_v59 = vpop.permute.xlu1 %2105  ;;  %v2389_v15 = vld [vmem:[#allocation2 + $0x88] sm:$0xff] }
 0x6e8   :  { %4201 = vmatprep.mubr.msk.f32.mxu1 %vm160_vm2, %v2135_v17  ;;  %v2146_v34 = vadd.f32 %v2106_v59, %v1007_v54  ;;  %v2112_v32 = vpop.permute.xlu0 %2111  ;;  %4261 = vmatpush3.msra.mxu1 %v2627_v38 }
 0x6e9   :  { %v2149_v42 = vadd.f32 %v2112_v32, %v1007_v54  ;;  %v2390_v54 = vld [vmem:[#allocation2 + $0x90] sm:$0xff] }
 0x6eb   :  { %4202 = vmatmul.mubr.msk.f32.gmra.mxu1 %vm160_vm2, %v2136_v20  ;;  %v2110_v33 = vpop.permute.xlu1 %2109  ;;  %v2388_v20 = vld [vmem:[#allocation2 + $0x80] sm:$0xff] }
 0x6ec   :  { %4204 = vmatprep.mubr.msk.f32.mxu1 %vm160_vm2, %v2137_v21  ;;  %v2148_v37 = vadd.f32 %v2110_v33, %v1006_v52 }
 0x6ef   :  { %4205 = vmatmul.mubr.msk.f32.gmra.mxu1 %vm160_vm2, %v2138_v23  ;;  %v2114_v39 = vpop.permute.xlu1 %2113 }
 0x6f0   :  { %4207 = vmatprep.mubr.msk.f32.mxu1 %vm160_vm2, %v2139_v29  ;;  %v2150_v9 = vadd.f32 %v2114_v39, %v1008_v5 }
 0x6f3   :  { %4208 = vmatmul.mubr.msk.f32.gmra.mxu1 %vm160_vm2, %v2140_v31 }
 0x6f4   :  { %4210 = vmatprep.mubr.msk.f32.mxu1 %vm160_vm2, %v2141_v16 }
 0x6f7   :  { %4211 = vmatmul.mubr.msk.f32.gmra.mxu1 %vm160_vm2, %v2142_v53 }
 0x6f8   :  { %4213 = vmatprep.mubr.msk.f32.mxu1 %vm160_vm2, %v2143_v63 }
 0x6fb   :  { %4214 = vmatmul.mubr.msk.f32.gmra.mxu1 %vm160_vm2, %v2144_v60 }
 0x6fc   :  { %4216 = vmatprep.mubr.msk.f32.mxu1 %vm160_vm2, %v2145_v36 }
 0x6ff   :  { %4217 = vmatmul.mubr.msk.f32.gmra.mxu1 %vm160_vm2, %v2146_v34 }
 0x700   :  { %4219 = vmatprep.mubr.msk.f32.mxu1 %vm160_vm2, %v2147_v35 }
 0x703   :  { %4220 = vmatmul.mubr.msk.f32.gmra.mxu1 %vm160_vm2, %v2148_v37 }
 0x704   :  { %4222 = vmatprep.mubr.msk.f32.mxu1 %vm160_vm2, %v2149_v42 }
 0x707   :  { %4223 = vmatmul.mubr.msk.f32.gmra.mxu1 %vm160_vm2, %v2150_v9 }
 0x78f   :  { %v5160_v13 = vpop.f32.mrf.mxu1 }
 0x791   :  { %v4132_v24 = vpop.f32.mrf.mxu1 }
 0x793   :  { %v5162_v4 = vpop.f32.mrf.mxu1 }
 0x795   :  { %v4135_v45 = vpop.f32.mrf.mxu1 }
 0x797   :  { %v5164_v44 = vpop.f32.mrf.mxu1 }
 0x799   :  { %v4138_v51 = vpop.f32.mrf.mxu1 }
 0x79b   :  { %v1835_v62 = vpop.f32.mrf.mxu1 }
 0x79c   :  { %v1836_v52 = vadd.f32 %v1835_v62, %v1759_v50 }
 0x79d   :  { %v4166_v1 = vpop.f32.mrf.mxu1 }
 0x79e   :  { %v1849_v57 = vmax.f32 %v1836_v52, 0.0 }
 0x79f   :  { %v1840_v2 = vpop.f32.mrf.mxu1 }
 0x7a0   :  { %v1841_v5 = vadd.f32 %v1840_v2, %v1759_v50  ;;  %4182 = vmatmul.mubr.msk.f32.vlgmr.msra.gmra.mxu0 %vm160_vm2, %v1849_v57 }
 0x7a1   :  { %v4169_v6 = vpop.f32.mrf.mxu1  ;;  %4184 = vmatprep.mubr.msk.f32.mxu0 %vm4459_vm0, %v4458_v0  ;;  %4226 = vmatpush3.msra.mxu0 %v2391_v43 }
 0x7a2   :  { %v1850_v17 = vmax.f32 %v1841_v5, 0.0  ;;  %4227 = vmatprep.subr.mxu0 %v2390_v54 }
 0x7a3   :  { %v1845_v19 = vpop.f32.mrf.mxu1  ;;  %4228 = vmatpush3.msra.mxu0 %v2390_v54 }
 0x7a4   :  { %v1846_v21 = vadd.f32 %v1845_v19, %v1759_v50  ;;  %4185 = vmatmul.mubr.msk.f32.gmra.mxu0 %vm160_vm2, %v1850_v17  ;;  %4229 = vmatprep.subr.mxu0 %v2389_v15 }
 0x7a5   :  { %v4172_v23 = vpop.f32.mrf.mxu1  ;;  %4187 = vmatprep.mubr.msk.f32.mxu0 %vm4459_vm0, %v4458_v0  ;;  %4230 = vmatpush3.msra.mxu0 %v2389_v15 }
 0x7a6   :  { %v1851_v28 = vmax.f32 %v1846_v21, 0.0  ;;  %4231 = vmatprep.subr.mxu0 %v2388_v20 }
 0x7a7   :  { %v4200_v29 = vpop.f32.mrf.mxu1  ;;  %4232 = vmatpush3.msra.mxu0 %v2388_v20 }
 0x7a8   :  { %4188 = vmatmul.mubr.msk.f32.gmra.mxu0 %vm160_vm2, %v1851_v28  ;;  %v2286_v30 = vadd.f32 %v4200_v29, %v5179_v11 }
 0x7a9   :  { %v2280_v31 = vpop.f32.mrf.mxu1 }
 0x7aa   :  { %v2281_v16 = vadd.f32 %v2280_v31, %v5179_v11  ;;  %v2370_v25 = vmax.f32 %v2286_v30, 0.0 }
 0x7ab   :  { %v4203_v18 = vpop.f32.mrf.mxu1 }
 0x7ac   :  { %v2369_v53 = vmax.f32 %v2281_v16, 0.0  ;;  %v2296_v63 = vadd.f32 %v4203_v18, %v5179_v11 }
 0x7ad   :  { %v2290_v59 = vpop.f32.mrf.mxu1 }
 0x7ae   :  { %v2291_v0 = vadd.f32 %v2290_v59, %v5179_v11  ;;  %4233 = vmatprep.mubr.msk.f32.mxu0 %vm160_vm2, %v2369_v53  ;;  %v2372_v36 = vmax.f32 %v2296_v63, 0.0  ;;  %v2626_v59 = vld [vmem:[#allocation2 + $0xb0] sm:$0xff] }
 0x7af   :  { %v4206_v60 = vpop.f32.mrf.mxu1  ;;  %4234 = vmatmul.mubr.msk.f32.vlgmr.msra.gmra.mxu0 %vm160_vm2, %v2370_v25  ;;  %4262 = vmatprep.subr.mxu1 %v2626_v59 }
 0x7b0   :  { %v2371_v8 = vmax.f32 %v2291_v0, 0.0  ;;  %v2306_v33 = vadd.f32 %v4206_v60, %v5179_v11  ;;  %4263 = vmatpush3.msra.mxu1 %v2626_v59  ;;  %v2625_v0 = vld [vmem:[#allocation2 + $0xa8] sm:$0xff]  ;;  %v2624_v60 = vld [vmem:[#allocation2 + $0xa0] sm:$0xff] }
 0x7b1   :  { %v2300_v34 = vpop.f32.mrf.mxu1  ;;  %4264 = vmatprep.subr.mxu1 %v2625_v0 }
 0x7b2   :  { %v2301_v35 = vadd.f32 %v2300_v34, %v5179_v11  ;;  %4236 = vmatprep.mubr.msk.f32.mxu0 %vm160_vm2, %v2371_v8  ;;  %v2374_v39 = vmax.f32 %v2306_v33, 0.0  ;;  %4265 = vmatpush3.msra.mxu1 %v2625_v0  ;;  %v2862_v8 = vld [vmem:[#allocation2 + $0xd0] sm:$0xff]  ;;  %v1860_v33 = vrot.slane %v5169_v55, %v4782_v7  ;;  %v5236_v55 = vrot.slane %v5088_v56, %v4573_v12 }
 0x7b3   :  { %v4209_v32 = vpop.f32.mrf.mxu1  ;;  %4237 = vmatmul.mubr.msk.f32.gmra.mxu0 %vm160_vm2, %v2372_v36  ;;  %4266 = vmatprep.subr.mxu1 %v2624_v60  ;;  %v2861_v36 = vld [vmem:[#allocation2 + $0xc8] sm:$0xff] }
 0x7b4   :  { %v2373_v37 = vmax.f32 %v2301_v35, 0.0  ;;  %v2316_v42 = vadd.f32 %v4209_v32, %v5179_v11  ;;  %4267 = vmatpush3.msra.mxu1 %v2624_v60 }
 0x7b5   :  { %v2310_v9 = vpop.f32.mrf.mxu1 }
 0x7b6   :  { %v2311_v22 = vadd.f32 %v2310_v9, %v5179_v11  ;;  %4239 = vmatprep.mubr.msk.f32.mxu0 %vm160_vm2, %v2373_v37  ;;  %v2376_v27 = vmax.f32 %v2316_v42, 0.0 }
 0x7b7   :  { %v4212_v26 = vpop.f32.mrf.mxu1  ;;  %4240 = vmatmul.mubr.msk.f32.gmra.mxu0 %vm160_vm2, %v2374_v39 }
 0x7b8   :  { %v2375_v48 = vmax.f32 %v2311_v22, 0.0  ;;  %v2326_v43 = vadd.f32 %v4212_v26, %v5179_v11 }
 0x7b9   :  { %v2320_v38 = vpop.f32.mrf.mxu1 }
 0x7ba   :  { %v2321_v24 = vadd.f32 %v2320_v38, %v5179_v11  ;;  %4242 = vmatprep.mubr.msk.f32.mxu0 %vm160_vm2, %v2375_v48  ;;  %v2378_v51 = vmax.f32 %v2326_v43, 0.0 }
 0x7bb   :  { %v4215_v45 = vpop.f32.mrf.mxu1  ;;  %4243 = vmatmul.mubr.msk.f32.gmra.mxu0 %vm160_vm2, %v2376_v27 }
 0x7bc   :  { %v2377_v50 = vmax.f32 %v2321_v24, 0.0  ;;  %v2336_v62 = vadd.f32 %v4215_v45, %v5179_v11 }
 0x7bd   :  { %v2330_v52 = vpop.f32.mrf.mxu1 }
 0x7be   :  { %v2331_v1 = vadd.f32 %v2330_v52, %v5179_v11  ;;  %4245 = vmatprep.mubr.msk.f32.mxu0 %vm160_vm2, %v2377_v50  ;;  %v2380_v54 = vmax.f32 %v2336_v62, 0.0 }
 0x7bf   :  { %v4218_v57 = vpop.f32.mrf.mxu1  ;;  %4246 = vmatmul.mubr.msk.f32.gmra.mxu0 %vm160_vm2, %v2378_v51 }
 0x7c0   :  { %v2379_v2 = vmax.f32 %v2331_v1, 0.0  ;;  %v2346_v5 = vadd.f32 %v4218_v57, %v5179_v11 }
 0x7c1   :  { %v2340_v6 = vpop.f32.mrf.mxu1 }
 0x7c2   :  { %v2341_v15 = vadd.f32 %v2340_v6, %v5179_v11  ;;  %4248 = vmatprep.mubr.msk.f32.mxu0 %vm160_vm2, %v2379_v2  ;;  %v2382_v20 = vmax.f32 %v2346_v5, 0.0 }
 0x7c3   :  { %v4221_v17 = vpop.f32.mrf.mxu1  ;;  %4249 = vmatmul.mubr.msk.f32.gmra.mxu0 %vm160_vm2, %v2380_v54 }
 0x7c4   :  { %v2381_v19 = vmax.f32 %v2341_v15, 0.0  ;;  %v2356_v21 = vadd.f32 %v4221_v17, %v5179_v11 }
 0x7c5   :  { %v2350_v23 = vpop.f32.mrf.mxu1 }
 0x7c6   :  { %v2351_v28 = vadd.f32 %v2350_v23, %v5179_v11  ;;  %4251 = vmatprep.mubr.msk.f32.mxu0 %vm160_vm2, %v2381_v19  ;;  %v2384_v31 = vmax.f32 %v2356_v21, 0.0 }
 0x7c7   :  { %v4224_v29 = vpop.f32.mrf.mxu1  ;;  %4252 = vmatmul.mubr.msk.f32.gmra.mxu0 %vm160_vm2, %v2382_v20 }
 0x7c8   :  { %v2383_v30 = vmax.f32 %v2351_v28, 0.0  ;;  %v2366_v16 = vadd.f32 %v4224_v29, %v5179_v11 }
 0x7c9   :  { %v2360_v18 = vpop.f32.mrf.mxu1 }
 0x7ca   :  { %v2361_v53 = vadd.f32 %v2360_v18, %v5179_v11  ;;  %4254 = vmatprep.mubr.msk.f32.mxu0 %vm160_vm2, %v2383_v30  ;;  %v2386_v63 = vmax.f32 %v2366_v16, 0.0  ;;  %v2863_v11 = vld [vmem:[#allocation2 + $0xd8] sm:$0xff] }
 0x7cb   :  { %4255 = vmatmul.mubr.msk.f32.gmra.mxu0 %vm160_vm2, %v2384_v31  ;;  %4295 = vmatprep.subr.mxu0 %v2863_v11 }
 0x7cc   :  { %v2385_v25 = vmax.f32 %v2361_v53, 0.0  ;;  %4296 = vmatpush3.msra.mxu0 %v2863_v11 }
 0x7cd   :  { %4297 = vmatprep.subr.mxu0 %v2862_v8 }
 0x7ce   :  { %4257 = vmatprep.mubr.msk.f32.mxu0 %vm160_vm2, %v2385_v25  ;;  %4298 = vmatpush3.msra.mxu0 %v2862_v8 }
 0x7cf   :  { %4258 = vmatmul.mubr.msk.f32.gmra.mxu0 %vm160_vm2, %v2386_v63  ;;  %4299 = vmatprep.subr.mxu0 %v2861_v36 }
 0x7d0   :  { %4300 = vmatpush3.msra.mxu0 %v2861_v36 }
 0x860   :  { %v1936_v34 = vpop.f32.mrf.mxu0 }
 0x861   :  { %v1937_v35 = vadd.f32 %v1936_v34, %v1860_v33 }
 0x862   :  { %v4183_v32 = vpop.f32.mrf.mxu0 }
 0x863   :  { %1950 = vst.msk [vmem:[%s5841_s10] sm:$0xff] %vm160_vm2, %v1937_v35 }
 0x864   :  { %v1941_v37 = vpop.f32.mrf.mxu0 }
 0x865   :  { %v1942_v39 = vadd.f32 %v1941_v37, %v1860_v33 }
 0x866   :  { %v4186_v42 = vpop.f32.mrf.mxu0 }
 0x867   :  { %1951 = vst.msk [vmem:[%s5841_s10 + $0x8] sm:$0xff] %vm160_vm2, %v1942_v39 }
 0x868   :  { %v1946_v9 = vpop.f32.mrf.mxu0 }
 0x869   :  { %v1947_v22 = vadd.f32 %v1946_v9, %v1860_v33 }
 0x86a   :  { %v4189_v26 = vpop.f32.mrf.mxu0 }
 0x86b   :  { %1952 = vst.msk [vmem:[%s5841_s10 + $0x10] sm:$0xff] %vm160_vm2, %v1947_v22 }
 0x86f   :  { %v4235_v48 = vpop.f32.mrf.mxu0 }
 0x870   :  { %v2522_v27 = vadd.f32 %v4235_v48, %v5236_v55 }
 0x871   :  { %v2516_v43 = vpop.f32.mrf.mxu0 }
 0x872   :  { %v2517_v38 = vadd.f32 %v2516_v43, %v5236_v55  ;;  %v2606_v50 = vmax.f32 %v2522_v27, 0.0 }
 0x873   :  { %v4238_v24 = vpop.f32.mrf.mxu0 }
 0x874   :  { %v2605_v45 = vmax.f32 %v2517_v38, 0.0  ;;  %v2532_v51 = vadd.f32 %v4238_v24, %v5236_v55 }
 0x875   :  { %v2526_v62 = vpop.f32.mrf.mxu0 }
 0x876   :  { %v2527_v52 = vadd.f32 %v2526_v62, %v5236_v55  ;;  %4268 = vmatprep.mubr.msk.f32.mxu1 %vm160_vm2, %v2605_v45  ;;  %v2608_v2 = vmax.f32 %v2532_v51, 0.0  ;;  %v2860_v51 = vld [vmem:[#allocation2 + $0xc0] sm:$0xff]  ;;  %v5276_v62 = vrot.slane %v5088_v56, %v4737_v46 }
 0x877   :  { %v4241_v1 = vpop.f32.mrf.mxu0  ;;  %4269 = vmatmul.mubr.msk.f32.vlgmr.msra.gmra.mxu1 %vm160_vm2, %v2606_v50  ;;  %4301 = vmatprep.subr.mxu0 %v2860_v51 }
 0x878   :  { %v2607_v57 = vmax.f32 %v2527_v52, 0.0  ;;  %v2542_v54 = vadd.f32 %v4241_v1, %v5236_v55  ;;  %4302 = vmatpush3.msra.mxu0 %v2860_v51 }
 0x879   :  { %v2536_v5 = vpop.f32.mrf.mxu0 }
 0x87a   :  { %v2537_v6 = vadd.f32 %v2536_v5, %v5236_v55  ;;  %4271 = vmatprep.mubr.msk.f32.mxu1 %vm160_vm2, %v2607_v57  ;;  %v2610_v19 = vmax.f32 %v2542_v54, 0.0 }
 0x87b   :  { %v4244_v15 = vpop.f32.mrf.mxu0  ;;  %4272 = vmatmul.mubr.msk.f32.gmra.mxu1 %vm160_vm2, %v2608_v2 }
 0x87c   :  { %v2609_v17 = vmax.f32 %v2537_v6, 0.0  ;;  %v2552_v20 = vadd.f32 %v4244_v15, %v5236_v55 }
 0x87d   :  { %v2546_v21 = vpop.f32.mrf.mxu0 }
 0x87e   :  { %v2547_v23 = vadd.f32 %v2546_v21, %v5236_v55  ;;  %4274 = vmatprep.mubr.msk.f32.mxu1 %vm160_vm2, %v2609_v17  ;;  %v2612_v30 = vmax.f32 %v2552_v20, 0.0 }
 0x87f   :  { %v4247_v28 = vpop.f32.mrf.mxu0  ;;  %4275 = vmatmul.mubr.msk.f32.gmra.mxu1 %vm160_vm2, %v2610_v19 }
 0x880   :  { %v2611_v29 = vmax.f32 %v2547_v23, 0.0  ;;  %v2562_v31 = vadd.f32 %v4247_v28, %v5236_v55 }
 0x881   :  { %v2556_v16 = vpop.f32.mrf.mxu0 }
 0x882   :  { %v2557_v18 = vadd.f32 %v2556_v16, %v5236_v55  ;;  %4277 = vmatprep.mubr.msk.f32.mxu1 %vm160_vm2, %v2611_v29  ;;  %v2614_v63 = vmax.f32 %v2562_v31, 0.0 }
 0x883   :  { %v4250_v53 = vpop.f32.mrf.mxu0  ;;  %4278 = vmatmul.mubr.msk.f32.gmra.mxu1 %vm160_vm2, %v2612_v30 }
 0x884   :  { %v2613_v25 = vmax.f32 %v2557_v18, 0.0  ;;  %v2572_v59 = vadd.f32 %v4250_v53, %v5236_v55 }
 0x885   :  { %v2566_v0 = vpop.f32.mrf.mxu0 }
 0x886   :  { %v2567_v60 = vadd.f32 %v2566_v0, %v5236_v55  ;;  %4280 = vmatprep.mubr.msk.f32.mxu1 %vm160_vm2, %v2613_v25  ;;  %v2616_v36 = vmax.f32 %v2572_v59, 0.0 }
 0x887   :  { %v4253_v11 = vpop.f32.mrf.mxu0  ;;  %4281 = vmatmul.mubr.msk.f32.gmra.mxu1 %vm160_vm2, %v2614_v63 }
 0x888   :  { %v2615_v8 = vmax.f32 %v2567_v60, 0.0  ;;  %v2582_v33 = vadd.f32 %v4253_v11, %v5236_v55 }
 0x889   :  { %v2576_v34 = vpop.f32.mrf.mxu0 }
 0x88a   :  { %v2577_v35 = vadd.f32 %v2576_v34, %v5236_v55  ;;  %4283 = vmatprep.mubr.msk.f32.mxu1 %vm160_vm2, %v2615_v8  ;;  %v2618_v39 = vmax.f32 %v2582_v33, 0.0 }
 0x88b   :  { %v4256_v32 = vpop.f32.mrf.mxu0  ;;  %4284 = vmatmul.mubr.msk.f32.gmra.mxu1 %vm160_vm2, %v2616_v36 }
 0x88c   :  { %v2617_v37 = vmax.f32 %v2577_v35, 0.0  ;;  %v2592_v42 = vadd.f32 %v4256_v32, %v5236_v55 }
 0x88d   :  { %v2586_v9 = vpop.f32.mrf.mxu0 }
 0x88e   :  { %v2587_v22 = vadd.f32 %v2586_v9, %v5236_v55  ;;  %4286 = vmatprep.mubr.msk.f32.mxu1 %vm160_vm2, %v2617_v37  ;;  %v2620_v27 = vmax.f32 %v2592_v42, 0.0 }
 0x88f   :  { %v4259_v26 = vpop.f32.mrf.mxu0  ;;  %4287 = vmatmul.mubr.msk.f32.gmra.mxu1 %vm160_vm2, %v2618_v39 }
 0x890   :  { %v2619_v48 = vmax.f32 %v2587_v22, 0.0  ;;  %v2602_v43 = vadd.f32 %v4259_v26, %v5236_v55 }
 0x891   :  { %v2596_v38 = vpop.f32.mrf.mxu0 }
 0x892   :  { %v2597_v24 = vadd.f32 %v2596_v38, %v5236_v55  ;;  %4289 = vmatprep.mubr.msk.f32.mxu1 %vm160_vm2, %v2619_v48  ;;  %v2622_v50 = vmax.f32 %v2602_v43, 0.0 }
 0x893   :  { %4290 = vmatmul.mubr.msk.f32.gmra.mxu1 %vm160_vm2, %v2620_v27 }
 0x894   :  { %v2621_v45 = vmax.f32 %v2597_v24, 0.0 }
 0x896   :  { %4292 = vmatprep.mubr.msk.f32.mxu1 %vm160_vm2, %v2621_v45 }
 0x897   :  { %4293 = vmatmul.mubr.msk.f32.gmra.mxu1 %vm160_vm2, %v2622_v50 }
 0x937   :  { %v4270_v52 = vpop.f32.mrf.mxu1 }
 0x938   :  { %v2758_v55 = vadd.f32 %v4270_v52, %v5276_v62 }
 0x939   :  { %v2752_v1 = vpop.f32.mrf.mxu1 }
 0x93a   :  { %v2753_v57 = vadd.f32 %v2752_v1, %v5276_v62  ;;  %v2842_v5 = vmax.f32 %v2758_v55, 0.0 }
 0x93b   :  { %v4273_v2 = vpop.f32.mrf.mxu1 }
 0x93c   :  { %v2841_v54 = vmax.f32 %v2753_v57, 0.0  ;;  %v2768_v6 = vadd.f32 %v4273_v2, %v5276_v62 }
 0x93d   :  { %v2762_v15 = vpop.f32.mrf.mxu1 }
 0x93e   :  { %v2763_v17 = vadd.f32 %v2762_v15, %v5276_v62  ;;  %4303 = vmatprep.mubr.msk.f32.mxu0 %vm160_vm2, %v2841_v54  ;;  %v2844_v56 = vmax.f32 %v2768_v6, 0.0  ;;  %v4463_v54 = vmov 0   ;;  %v5317_v15 = vld [vmem:[%s5839_s8 + $0x8] sm:$0xff] }
 0x93f   :  { %v4276_v19 = vpop.f32.mrf.mxu1  ;;  %4304 = vmatmul.mubr.msk.f32.vlgmr.msra.gmra.mxu0 %vm160_vm2, %v2842_v5  ;;  %4344 = vset.pattern.permute.xlu1 %v4463_v54 }
 0x940   :  { %v2843_v46 = vmax.f32 %v2763_v17, 0.0  ;;  %v2778_v20 = vadd.f32 %v4276_v19, %v5276_v62  ;;  %4345 = vset.pattern.permute.xlu0 %v4463_v54  ;;  %v4409_v17 = vld [vmem:[%s5839_s8] sm:$0xff] }
 0x941   :  { %v2772_v21 = vpop.f32.mrf.mxu1  ;;  %v621_v19 = vrot.slane %v4409_v17, %v4782_v7 }
 0x942   :  { %v2773_v23 = vadd.f32 %v2772_v21, %v5276_v62  ;;  %4306 = vmatprep.mubr.msk.f32.mxu0 %vm160_vm2, %v2843_v46  ;;  %v2846_v30 = vmax.f32 %v2778_v20, 0.0 }
 0x943   :  { %v4279_v28 = vpop.f32.mrf.mxu1  ;;  %4307 = vmatmul.mubr.msk.f32.gmra.mxu0 %vm160_vm2, %v2844_v56  ;;  %v629_v56 = vpop.permute.xlu0 %628 }
 0x944   :  { %v2845_v29 = vmax.f32 %v2773_v23, 0.0  ;;  %v2788_v31 = vadd.f32 %v4279_v28, %v5276_v62 }
 0x945   :  { %v2782_v16 = vpop.f32.mrf.mxu1 }
 0x946   :  { %v2783_v18 = vadd.f32 %v2782_v16, %v5276_v62  ;;  %4309 = vmatprep.mubr.msk.f32.mxu0 %vm160_vm2, %v2845_v29  ;;  %v2848_v63 = vmax.f32 %v2788_v31, 0.0  ;;  %v622_v29 = vadd.f32 %v621_v19, %v4697_v58 }
 0x947   :  { %v4282_v53 = vpop.f32.mrf.mxu1  ;;  %4310 = vmatmul.mubr.msk.f32.gmra.mxu0 %vm160_vm2, %v2846_v30 }
 0x948   :  { %v2847_v25 = vmax.f32 %v2783_v18, 0.0  ;;  %v2798_v59 = vadd.f32 %v4282_v53, %v5276_v62  ;;  %v5332_v53 = vadd.f32 %v629_v56, %v622_v29 }
 0x949   :  { %v2792_v0 = vpop.f32.mrf.mxu1 }
 0x94a   :  { %v2793_v60 = vadd.f32 %v2792_v0, %v5276_v62  ;;  %4312 = vmatprep.mubr.msk.f32.mxu0 %vm160_vm2, %v2847_v25  ;;  %v2850_v36 = vmax.f32 %v2798_v59, 0.0 }
 0x94b   :  { %v4285_v11 = vpop.f32.mrf.mxu1  ;;  %4313 = vmatmul.mubr.msk.f32.gmra.mxu0 %vm160_vm2, %v2848_v63  ;;  %v633_v63 = vpop.permute.xlu0 %632 }
 0x94c   :  { %v2849_v8 = vmax.f32 %v2793_v60, 0.0  ;;  %v2808_v33 = vadd.f32 %v4285_v11, %v5276_v62 }
 0x94d   :  { %v2802_v34 = vpop.f32.mrf.mxu1 }
 0x94e   :  { %v2803_v35 = vadd.f32 %v2802_v34, %v5276_v62  ;;  %4315 = vmatprep.mubr.msk.f32.mxu0 %vm160_vm2, %v2849_v8  ;;  %v2852_v39 = vmax.f32 %v2808_v33, 0.0  ;;  %v624_v8 = vadd.f32 %v621_v19, %v4707_v3  ;;  %v631_v33 = vpop.permute.xlu1 %630 }
 0x94f   :  { %v4288_v32 = vpop.f32.mrf.mxu1  ;;  %4316 = vmatmul.mubr.msk.f32.gmra.mxu0 %vm160_vm2, %v2850_v36 }
 0x950   :  { %v2851_v37 = vmax.f32 %v2803_v35, 0.0  ;;  %v2818_v42 = vadd.f32 %v4288_v32, %v5276_v62 }
 0x951   :  { %v2812_v9 = vpop.f32.mrf.mxu1 }
 0x952   :  { %v2813_v22 = vadd.f32 %v2812_v9, %v5276_v62  ;;  %4318 = vmatprep.mubr.msk.f32.mxu0 %vm160_vm2, %v2851_v37  ;;  %v2854_v27 = vmax.f32 %v2818_v42, 0.0  ;;  %v5341_v42 = vadd.f32 %v633_v63, %v624_v8 }
 0x953   :  { %v4291_v26 = vpop.f32.mrf.mxu1  ;;  %4319 = vmatmul.mubr.msk.f32.gmra.mxu0 %vm160_vm2, %v2852_v39  ;;  %v623_v39 = vadd.f32 %v621_v19, %v4702_v61 }
 0x954   :  { %v2853_v48 = vmax.f32 %v2813_v22, 0.0  ;;  %v2828_v43 = vadd.f32 %v4291_v26, %v5276_v62 }
 0x955   :  { %v2822_v38 = vpop.f32.mrf.mxu1 }
 0x956   :  { %v2823_v24 = vadd.f32 %v2822_v38, %v5276_v62  ;;  %4321 = vmatprep.mubr.msk.f32.mxu0 %vm160_vm2, %v2853_v48  ;;  %v2856_v51 = vmax.f32 %v2828_v43, 0.0  ;;  %v5347_v43 = vadd.f32 %v631_v33, %v623_v39 }
 0x957   :  { %v4294_v45 = vpop.f32.mrf.mxu1  ;;  %4322 = vmatmul.mubr.msk.f32.gmra.mxu0 %vm160_vm2, %v2854_v27 }
 0x958   :  { %v2855_v50 = vmax.f32 %v2823_v24, 0.0  ;;  %v2838_v52 = vadd.f32 %v4294_v45, %v5276_v62 }
 0x959   :  { %v2832_v55 = vpop.f32.mrf.mxu1 }
 0x95a   :  { %v2833_v1 = vadd.f32 %v2832_v55, %v5276_v62  ;;  %4324 = vmatprep.mubr.msk.f32.mxu0 %vm160_vm2, %v2855_v50  ;;  %v2858_v2 = vmax.f32 %v2838_v52, 0.0  ;;  %v5321_v62 = vrot.slane %v5317_v15, %v4782_v7 }
 0x95b   :  { %4325 = vmatmul.mubr.msk.f32.gmra.mxu0 %vm160_vm2, %v2856_v51 }
 0x95c   :  { %v2857_v57 = vmax.f32 %v2833_v1, 0.0 }
 0x95e   :  { %4327 = vmatprep.mubr.msk.f32.mxu0 %vm160_vm2, %v2857_v57 }
 0x95f   :  { %4328 = vmatmul.mubr.msk.f32.gmra.mxu0 %vm160_vm2, %v2858_v2 }
 0x9ff   :  { %v4305_v5 = vpop.f32.mrf.mxu0 }
 0xa00   :  { %v2994_v7 = vadd.f32 %v4305_v5, %v5321_v62 }
 0xa01   :  { %v2988_v6 = vpop.f32.mrf.mxu0 }
 0xa02   :  { %v2989_v20 = vadd.f32 %v2988_v6, %v5321_v62 }
 0xa03   :  { %v4308_v46 = vpop.f32.mrf.mxu0 }
 0xa04   :  { %v3004_v21 = vadd.f32 %v4308_v46, %v5321_v62 }
 0xa05   :  { %v2998_v23 = vpop.f32.mrf.mxu0 }
 0xa06   :  { %v3097_v28 = vadd.f32 %v3004_v21, %v2989_v20  ;;  %v2999_v16 = vadd.f32 %v2998_v23, %v5321_v62 }
 0xa07   :  { %v4311_v30 = vpop.f32.mrf.mxu0 }
 0xa08   :  { %v3100_v31 = vmul.f32 0.5, %v3097_v28  ;;  %v3014_v18 = vadd.f32 %v4311_v30, %v5321_v62 }
 0xa09   :  { %v3008_v25 = vpop.f32.mrf.mxu0 }
 0xa0a   :  { %v3103_v59 = vsub.f32 %v2989_v20, %v3100_v31  ;;  %v3112_v0 = vsub.f32 %v3004_v21, %v3100_v31  ;;  %v3099_v60 = vadd.f32 %v3014_v18, %v2999_v16  ;;  %v3009_v11 = vadd.f32 %v3008_v25, %v5321_v62 }
 0xa0b   :  { %v4314_v58 = vpop.f32.mrf.mxu0  ;;  %v5338_v36 = vsub.f32 %v3100_v31, %v5332_v53 }
 0xa0c   :  { %v3106_v34 = vmul.f32 %v3103_v59, %v3103_v59  ;;  %v3115_v35 = vmul.f32 %v3112_v0, %v3112_v0  ;;  %v3102_v32 = vmul.f32 0.5, %v3099_v60  ;;  %v3098_v37 = vadd.f32 %v3009_v11, %v2994_v7 }
 0xa0d   :  { %v3018_v9 = vpop.f32.mrf.mxu0  ;;  %v3211_v22 = vmul.f32 %v5338_v36, %v5338_v36 }
 0xa0e   :  { %v5345_v26 = vadd.f32 %v3115_v35, %v3106_v34  ;;  %v3105_v3 = vsub.f32 %v2999_v16, %v3102_v32  ;;  %v3114_v48 = vsub.f32 %v3014_v18, %v3102_v32  ;;  %v3101_v27 = vmul.f32 0.5, %v3098_v37 }
 0xa0f   :  { %v3019_v38 = vadd.f32 %v3018_v9, %v5321_v62  ;;  %v4317_v24 = vpop.f32.mrf.mxu0  ;;  %v3214_v45 = vsel %vm160_vm2, %v3211_v22, 0.0  ;;  %v5352_v61 = vsub.f32 %v3102_v32, %v5341_v42  ;;  %v3024_v16 = vadd.f32 %v4314_v58, %v5321_v62 }
 0xa10   :  { %4368 = vrsqrt.f32 %v5345_v26  ;;  %v3108_v50 = vmul.f32 %v3105_v3, %v3105_v3  ;;  %v3117_v51 = vmul.f32 %v3114_v48, %v3114_v48  ;;  %v3104_v52 = vsub.f32 %v2994_v7, %v3101_v27  ;;  %3215 = vadd.xlane.f32.xlu0 %v3214_v45 }
 0xa11   :  { %v3113_v55 = vsub.f32 %v3009_v11, %v3101_v27  ;;  %v3034_v1 = vadd.f32 %v4317_v24, %v5321_v62  ;;  %v3028_v57 = vpop.f32.mrf.mxu0  ;;  %v3213_v2 = vmul.f32 %v5352_v61, %v5352_v61  ;;  %v5359_v54 = vsub.f32 %v3101_v27, %v5347_v43 }
 0xa12   :  { %v5361_v5 = vadd.f32 %v3117_v51, %v3108_v50  ;;  %v3107_v6 = vmul.f32 %v3104_v52, %v3104_v52  ;;  %v3029_v21 = vadd.f32 %v3028_v57, %v5321_v62  ;;  %vm3123_vm12 = vcmp.eq.f32.partialorder %v5345_v26, inf }
 0xa13   :  { %v3116_v17 = vmul.f32 %v3113_v55, %v3113_v55  ;;  %v3286_v19 = vadd.f32 %v3034_v1, %v3019_v38  ;;  %v4320_v46 = vpop.f32.mrf.mxu0  ;;  %v3220_v56 = vsel %vm160_vm2, %v3213_v2, 0.0  ;;  %v3212_v20 = vmul.f32 %v5359_v54, %v5359_v54 }
 0xa14   :  { %v3044_v23 = vadd.f32 %v4320_v46, %v5321_v62  ;;  %3221 = vadd.xlane.f32.xlu0 %v3220_v56  ;;  %4370 = vrsqrt.f32 %v5361_v5  ;;  %vm3125_vm13 = vcmp.eq.f32.partialorder %v5345_v26, 0.0  ;;  %v3126_v2 = vand.u32 2147483648, %v5345_v26 }
 0xa15   :  { %v5368_v28 = vadd.f32 %v3116_v17, %v3107_v6  ;;  %v3289_v29 = vmul.f32 0.5, %v3286_v19  ;;  %v3038_v30 = vpop.f32.mrf.mxu0  ;;  %v3217_v31 = vsel %vm160_vm2, %v3212_v20, 0.0  ;;  %vm3137_vm14 = vcmp.eq.f32.partialorder %v5361_v5, inf }
 0xa16   :  { %v3288_v18 = vadd.f32 %v3044_v23, %v3029_v21  ;;  %v3039_v7 = vadd.f32 %v3038_v30, %v5321_v62  ;;  %3218 = vadd.xlane.f32.xlu1 %v3217_v31  ;;  %vm3139_vm0 = vcmp.eq.f32.partialorder %v5361_v5, 0.0 }
 0xa17   :  { %4372 = vrsqrt.f32 %v5368_v28  ;;  %v3292_v25 = vsub.f32 %v3019_v38, %v3289_v29  ;;  %v3301_v63 = vsub.f32 %v3034_v1, %v3289_v29  ;;  %v4323_v59 = vpop.f32.mrf.mxu0  ;;  %v5376_v0 = vsub.f32 %v3289_v29, %v5332_v53 }
 0xa18   :  { %v3291_v60 = vmul.f32 0.5, %v3288_v18  ;;  %v3287_v11 = vadd.f32 %v3039_v7, %v3024_v16  ;;  %v3054_v30 = vadd.f32 %v4323_v59, %v5321_v62  ;;  %vm3130_vm15 = vcmp.eq.f32.partialorder %v5368_v28, inf }
 0xa19   :  { %v3295_v8 = vmul.f32 %v3292_v25, %v3292_v25  ;;  %v3304_v33 = vmul.f32 %v3301_v63, %v3301_v63  ;;  %v3048_v34 = vpop.f32.mrf.mxu0  ;;  %v3400_v58 = vmul.f32 %v5376_v0, %v5376_v0  ;;  %vm3132_vm1 = vcmp.eq.f32.partialorder %v5368_v28, 0.0 }
 0xa1a   :  { %v3294_v35 = vsub.f32 %v3029_v21, %v3291_v60  ;;  %v3290_v32 = vmul.f32 0.5, %v3287_v11  ;;  %v5385_v22 = vsub.f32 %v3291_v60, %v5341_v42  ;;  %v3303_v3 = vsub.f32 %v3044_v23, %v3291_v60 }
 0xa1b   :  { %v5381_v37 = vadd.f32 %v3304_v33, %v3295_v8  ;;  %v4326_v39 = vpop.f32.mrf.mxu0  ;;  %v3403_v9 = vsel %vm160_vm2, %v3400_v58, 0.0  ;;  %v3049_v38 = vadd.f32 %v3048_v34, %v5321_v62 }
 0xa1c   :  { %v3293_v48 = vsub.f32 %v3024_v16, %v3290_v32  ;;  %v3302_v27 = vsub.f32 %v3039_v7, %v3290_v32  ;;  %3404 = vadd.xlane.f32.xlu1 %v3403_v9  ;;  %v3064_v45 = vadd.f32 %v4326_v39, %v5321_v62  ;;  %v3402_v51 = vmul.f32 %v5385_v22, %v5385_v22 }
 0xa1d   :  { %v4369_v24 = vpop.eup %4368  ;;  %4374 = vrsqrt.f32 %v5381_v37  ;;  %v3058_v50 = vpop.f32.mrf.mxu0  ;;  %v5394_v52 = vsub.f32 %v3290_v32, %v5347_v43  ;;  %v3297_v55 = vmul.f32 %v3294_v35, %v3294_v35  ;;  %v3306_v20 = vmul.f32 %v3303_v3, %v3303_v3 }
 0xa1e   :  { %v3296_v1 = vmul.f32 %v3293_v48, %v3293_v48  ;;  %v3305_v57 = vmul.f32 %v3302_v27, %v3302_v27  ;;  %v3449_v6 = vadd.f32 %v3064_v45, %v3049_v38  ;;  %v3409_v19 = vsel %vm160_vm2, %v3402_v51, 0.0 }
 0xa1f   :  { %v4329_v17 = vpop.f32.mrf.mxu0  ;;  %v3401_v46 = vmul.f32 %v5394_v52, %v5394_v52  ;;  %v3122_v56 = vmul.f32 %v4369_v24, %v5345_v26  ;;  %v3059_v23 = vadd.f32 %v3058_v50, %v5321_v62  ;;  %v5416_v35 = vadd.f32 %v3306_v20, %v3297_v55 }
 0xa20   :  { %v5401_v21 = vadd.f32 %v3305_v57, %v3296_v1  ;;  %v3074_v29 = vadd.f32 %v4329_v17, %v5321_v62  ;;  %3410 = vadd.xlane.f32.xlu1 %v3409_v19  ;;  %v3452_v31 = vmul.f32 0.5, %v3449_v6  ;;  %v3133_v1 = vand.u32 2147483648, %v5368_v28 }
 0xa21   :  { %v3068_v16 = vpop.f32.mrf.mxu0  ;;  %v3406_v18 = vsel %vm160_vm2, %v3401_v46, 0.0  ;;  %v3124_v7 = vsel %vm3123_vm12, %v5345_v26, %v3122_v56  ;;  %v4371_v11 = vpop.eup %4370  ;;  %vm3312_vm3 = vcmp.eq.f32.partialorder %v5381_v37, inf  ;;  %vm3314_vm4 = vcmp.eq.f32.partialorder %v5381_v37, 0.0 }
 0xa22   :  { %4376 = vrsqrt.f32 %v5401_v21  ;;  %v3451_v25 = vadd.f32 %v3074_v29, %v3059_v23  ;;  %v3069_v63 = vadd.f32 %v3068_v16, %v5321_v62  ;;  %3407 = vadd.xlane.f32.xlu0 %v3406_v18  ;;  %v3127_v60 = vsel %vm3125_vm13, %v3126_v2, %v3124_v7 }
 0xa23   :  { %v3455_v8 = vsub.f32 %v3049_v38, %v3452_v31  ;;  %v3464_v59 = vsub.f32 %v3064_v45, %v3452_v31  ;;  %v3166_v33 = vmul.f32 %v3127_v60, %v5048_v49  ;;  %v3142_v34 = vmul.f32 %v3127_v60, %v3127_v60 }
 0xa24   :  { %v4373_v58 = vpop.eup %4372  ;;  %v3450_v32 = vadd.f32 %v3069_v63, %v3054_v30  ;;  %v5419_v39 = vsub.f32 %v3452_v31, %v5332_v53  ;;  %v3199_v9 = vmul.f32 %v5338_v36, %v3127_v60  ;;  %v5424_v27 = vmul.f32 0.5, %v3451_v25 }
 0xa25   :  { %v3458_v62 = vmul.f32 %v3455_v8, %v3455_v8  ;;  %v3467_v3 = vmul.f32 %v3464_v59, %v3464_v59  ;;  %v3169_v26 = vsel %vm160_vm2, %v3166_v33, 0.0  ;;  %v3145_v48 = vsel %vm160_vm2, %v3142_v34, 0.0 }
 0xa26   :  { %v3453_v38 = vmul.f32 0.5, %v3450_v32  ;;  %3170 = vadd.xlane.f32.xlu0 %v3169_v26  ;;  %3146 = vadd.xlane.f32.xlu1 %v3145_v48  ;;  %v3563_v24 = vmul.f32 %v5419_v39, %v5419_v39  ;;  %v3140_v45 = vand.u32 2147483648, %v5361_v5  ;;  %v3136_v36 = vmul.f32 %v4371_v11, %v5361_v5 }
 0xa27   :  { %v5429_v53 = vadd.f32 %v3467_v3, %v3458_v62  ;;  %v3129_v50 = vmul.f32 %v4373_v58, %v5368_v28  ;;  %4378 = vrsqrt.f32 %v5416_v35  ;;  %v3202_v2 = vsel %vm160_vm2, %v3199_v9, 0.0 }
 0xa28   :  { %v3456_v51 = vsub.f32 %v3054_v30, %v3453_v38  ;;  %v3465_v55 = vsub.f32 %v3069_v63, %v3453_v38  ;;  %v3566_v57 = vsel %vm160_vm2, %v3563_v24, 0.0  ;;  %v3138_v6 = vsel %vm3137_vm14, %v5361_v5, %v3136_v36 }
 0xa29   :  { %v3131_v17 = vsel %vm3130_vm15, %v5368_v28, %v3129_v50  ;;  %v3457_v46 = vsub.f32 %v3059_v23, %v5424_v27  ;;  %v3466_v56 = vsub.f32 %v3074_v29, %v5424_v27  ;;  %4380 = vrsqrt.f32 %v5429_v53 }
 0xa2a   :  { %v4375_v19 = vpop.eup %4374  ;;  %3567 = vadd.xlane.f32.xlu0 %v3566_v57  ;;  %3203 = vadd.xlane.f32.xlu1 %v3202_v2  ;;  %v3459_v20 = vmul.f32 %v3456_v51, %v3456_v51  ;;  %v3141_v30 = vsel %vm3139_vm0, %v3140_v45, %v3138_v6  ;;  %v3134_v31 = vsel %vm3132_vm1, %v3133_v1, %v3131_v17  ;;  %v3315_v58 = vand.u32 2147483648, %v5381_v37 }
 0xa2b   :  { %v3468_v16 = vmul.f32 %v3465_v55, %v3465_v55  ;;  %v3168_v18 = vmul.f32 %v3141_v30, %v5053_v47  ;;  %v3144_v7 = vmul.f32 %v3141_v30, %v3141_v30  ;;  %v3311_v25 = vmul.f32 %v4375_v19, %v5381_v37 }
 0xa2c   :  { %v3143_v63 = vmul.f32 %v3134_v31, %v3134_v31  ;;  %v3201_v5 = vmul.f32 %v5352_v61, %v3141_v30  ;;  %v3460_v28 = vmul.f32 %v3457_v46, %v3457_v46  ;;  %v3469_v11 = vmul.f32 %v3466_v56, %v3466_v56 }
 0xa2d   :  { %v3175_v23 = vsel %vm160_vm2, %v3168_v18, 0.0  ;;  %v3151_v29 = vsel %vm160_vm2, %v3144_v7, 0.0  ;;  %v5453_v8 = vadd.f32 %v3468_v16, %v3459_v20  ;;  %v3313_v59 = vsel %vm3312_vm3, %v5381_v37, %v3311_v25 }
 0xa2e   :  { %3176 = vadd.xlane.f32.xlu0 %v3175_v23  ;;  %3152 = vadd.xlane.f32.xlu1 %v3151_v29  ;;  %v3200_v34 = vmul.f32 %v5359_v54, %v3134_v31  ;;  %v3148_v61 = vsel %vm160_vm2, %v3143_v63, 0.0  ;;  %v3208_v32 = vsel %vm160_vm2, %v3201_v5, 0.0  ;;  %v3167_v9 = vmul.f32 %v3134_v31, %v5042_v41 }
 0xa2f   :  { %v4377_v60 = vpop.eup %4376  ;;  %v5464_v62 = vsub.f32 %v3453_v38, %v5347_v43  ;;  %v3316_v3 = vsel %vm3314_vm4, %v3315_v58, %v3313_v59  ;;  %vm3319_vm5 = vcmp.eq.f32.partialorder %v5401_v21, inf  ;;  %v5467_v26 = vadd.f32 %v3469_v11, %v3460_v28 }
 0xa30   :  { %v3318_v33 = vmul.f32 %v4377_v60, %v5401_v21  ;;  %4382 = vrsqrt.f32 %v5453_v8  ;;  %v3205_v48 = vsel %vm160_vm2, %v3200_v34, 0.0  ;;  %v3322_v24 = vand.u32 2147483648, %v5401_v21 }
 0xa31   :  { %v3172_v45 = vsel %vm160_vm2, %v3167_v9, 0.0  ;;  %v3331_v43 = vmul.f32 %v3316_v3, %v3316_v3  ;;  %v3564_v38 = vmul.f32 %v5464_v62, %v5464_v62  ;;  %vm3321_vm6 = vcmp.eq.f32.partialorder %v5401_v21, 0.0 }
 0xa32   :  { %3149 = vadd.xlane.f32.xlu0 %v3148_v61  ;;  %3209 = vadd.xlane.f32.xlu1 %v3208_v32  ;;  %v3320_v54 = vsel %vm3319_vm5, %v5401_v21, %v3318_v33  ;;  %4384 = vrsqrt.f32 %v5467_v26  ;;  %v3355_v57 = vmul.f32 %v3316_v3, %v5048_v49  ;;  %vm3326_vm7 = vcmp.eq.f32.partialorder %v5416_v35, inf }
 0xa33   :  { %v3323_v36 = vsel %vm3321_vm6, %v3322_v24, %v3320_v54  ;;  %v3334_v55 = vsel %vm160_vm2, %v3331_v43, 0.0  ;;  %v3569_v1 = vsel %vm160_vm2, %v3564_v38, 0.0  ;;  %v3388_v17 = vmul.f32 %v5376_v0, %v3316_v3 }
 0xa34   :  { %v4379_v37 = vpop.eup %4378  ;;  %v3332_v2 = vmul.f32 %v3323_v36, %v3323_v36  ;;  %v3329_v19 = vand.u32 2147483648, %v5416_v35  ;;  %v3358_v46 = vsel %vm160_vm2, %v3355_v57, 0.0  ;;  %v3356_v20 = vmul.f32 %v3323_v36, %v5042_v41 }
 0xa35   :  { %v3325_v51 = vmul.f32 %v4379_v37, %v5416_v35  ;;  %vm3328_vm8 = vcmp.eq.f32.partialorder %v5416_v35, 0.0  ;;  %vm3475_vm9 = vcmp.eq.f32.partialorder %v5429_v53, inf  ;;  %v3391_v0 = vsel %vm160_vm2, %v3388_v17, 0.0  ;;  %v4410_v17 = vld [vmem:[%s5839_s8 + $0x10] sm:$0xff] }
 0xa36   :  { %3206 = vadd.xlane.f32.xlu0 %v3205_v48  ;;  %3173 = vadd.xlane.f32.xlu1 %v3172_v45  ;;  %v4381_v50 = vpop.eup %4380  ;;  %v3337_v56 = vsel %vm160_vm2, %v3332_v2, 0.0  ;;  %v3478_v18 = vand.u32 2147483648, %v5429_v53  ;;  %v3361_v7 = vsel %vm160_vm2, %v3356_v20, 0.0  ;;  %v3389_v23 = vmul.f32 %v5394_v52, %v3323_v36 }
 0xa37   :  { %v3327_v21 = vsel %vm3326_vm7, %v5416_v35, %v3325_v51  ;;  %v3474_v6 = vmul.f32 %v4381_v50, %v5429_v53  ;;  %vm3477_vm10 = vcmp.eq.f32.partialorder %v5429_v53, 0.0  ;;  %vm3482_vm11 = vcmp.eq.f32.partialorder %v5453_v8, inf }
 0xa38   :  { %v3330_v30 = vsel %vm3328_vm8, %v3329_v19, %v3327_v21  ;;  %v3394_v60 = vsel %vm160_vm2, %v3389_v23, 0.0  ;;  %v3485_v33 = vand.u32 2147483648, %v5453_v8  ;;  %vm3484_vm12 = vcmp.eq.f32.partialorder %v5453_v8, 0.0 }
 0xa39   :  { %v3476_v31 = vsel %vm3475_vm9, %v5429_v53, %v3474_v6  ;;  %v3333_v25 = vmul.f32 %v3330_v30, %v3330_v30  ;;  %v3357_v28 = vmul.f32 %v3330_v30, %v5053_v47  ;;  %v3390_v59 = vmul.f32 %v5385_v22, %v3330_v30 }
 0xa3a   :  { %3335 = vadd.xlane.f32.xlu0 %v3334_v55  ;;  %3570 = vadd.xlane.f32.xlu1 %v3569_v1  ;;  %v3479_v35 = vsel %vm3477_vm10, %v3478_v18, %v3476_v31  ;;  %vm3489_vm13 = vcmp.eq.f32.partialorder %v5467_v26, inf  ;;  %v3550_v22 = vsub.f32 %v5424_v27, %v5341_v42  ;;  %v3492_v54 = vand.u32 2147483648, %v5467_v26 }
 0xa3b   :  { %v3340_v5 = vsel %vm160_vm2, %v3333_v25, 0.0  ;;  %v3494_v11 = vmul.f32 %v3479_v35, %v3479_v35  ;;  %v3364_v34 = vsel %vm160_vm2, %v3357_v28, 0.0  ;;  %v3518_v61 = vmul.f32 %v3479_v35, %v5048_v49 }
 0xa3c   :  { %v3397_v3 = vsel %vm160_vm2, %v3390_v59, 0.0  ;;  %v3551_v49 = vmul.f32 %v5419_v39, %v3479_v35  ;;  %vm3491_vm14 = vcmp.eq.f32.partialorder %v5467_v26, 0.0  ;;  %v3565_v43 = vmul.f32 %v3550_v22, %v3550_v22 }
 0xa3d   :  { %v4383_v16 = vpop.eup %4382  ;;  %v3497_v58 = vsel %vm160_vm2, %v3494_v11, 0.0  ;;  %v3521_v37 = vsel %vm160_vm2, %v3518_v61, 0.0 }
 0xa3e   :  { %3359 = vadd.xlane.f32.xlu0 %v3358_v46  ;;  %3338 = vadd.xlane.f32.xlu1 %v3337_v56  ;;  %v3481_v29 = vmul.f32 %v4383_v16, %v5453_v8  ;;  %v3554_v45 = vsel %vm160_vm2, %v3551_v49, 0.0  ;;  %v3572_v42 = vsel %vm160_vm2, %v3565_v43, 0.0 }
 0xa3f   :  { %v4385_v63 = vpop.eup %4384 }
 0xa40   :  { %v3483_v52 = vsel %vm3482_vm11, %v5453_v8, %v3481_v29  ;;  %v3488_v53 = vmul.f32 %v4385_v63, %v5467_v26 }
 0xa41   :  { %v3486_v32 = vsel %vm3484_vm12, %v3485_v33, %v3483_v52 }
 0xa42   :  { %3392 = vadd.xlane.f32.xlu0 %v3391_v0  ;;  %3362 = vadd.xlane.f32.xlu1 %v3361_v7  ;;  %v3490_v9 = vsel %vm3489_vm13, %v5467_v26, %v3488_v53  ;;  %v3495_v48 = vmul.f32 %v3486_v32, %v3486_v32  ;;  %v3519_v36 = vmul.f32 %v3486_v32, %v5042_v41 }
 0xa43   :  { %v3493_v8 = vsel %vm3491_vm14, %v3492_v54, %v3490_v9  ;;  %v1485_v26 = vrot.slane %v5317_v15, %v4869_v14  ;;  %v3552_v55 = vmul.f32 %v5464_v62, %v3486_v32  ;;  %v1581_v14 = vrot.slane %v5317_v15, %v4815_v40 }
 0xa44   :  { %v3500_v24 = vsel %vm160_vm2, %v3495_v48, 0.0  ;;  %v3496_v38 = vmul.f32 %v3493_v8, %v3493_v8  ;;  %v3520_v39 = vmul.f32 %v3493_v8, %v5053_v47  ;;  %v3524_v50 = vsel %vm160_vm2, %v3519_v36, 0.0 }
 0xa45   :  { %v3553_v1 = vmul.f32 %v3550_v22, %v3493_v8  ;;  %v1562_v57 = vadd.f32 %v5160_v13, %v1485_v26  ;;  %v3557_v41 = vsel %vm160_vm2, %v3552_v55, 0.0  ;;  %v1572_v21 = vadd.f32 %v5164_v44, %v1485_v26 }
 0xa46   :  { %3341 = vadd.xlane.f32.xlu0 %v3340_v5  ;;  %3395 = vadd.xlane.f32.xlu1 %v3394_v60  ;;  %v3503_v27 = vsel %vm160_vm2, %v3496_v38, 0.0  ;;  %v3527_v51 = vsel %vm160_vm2, %v3520_v39, 0.0  ;;  %v1567_v6 = vadd.f32 %v5162_v4, %v1485_v26  ;;  %v1588_v13 = vrot.slane %v4410_v17, %v4573_v12 }
 0xa47   :  { %v3560_v47 = vsel %vm160_vm2, %v3553_v1, 0.0  ;;  %v1575_v2 = vmax.f32 %v1562_v57, 0.0  ;;  %v1577_v19 = vmax.f32 %v1572_v21, 0.0 }
 0xa48   :  { %v1576_v46 = vmax.f32 %v1567_v6, 0.0 }
 0xa49   :  { %v1582_v62 = vmul.f32 %v1581_v14, %v1575_v2  ;;  %v1584_v20 = vmul.f32 %v1581_v14, %v1577_v19 }
 0xa4a   :  { %3365 = vadd.xlane.f32.xlu0 %v3364_v34  ;;  %3498 = vadd.xlane.f32.xlu1 %v3497_v58  ;;  %v1583_v30 = vmul.f32 %v1581_v14, %v1576_v46 }
 0xa4b   :  { %v1589_v56 = vadd.f32 %v1588_v13, %v1582_v62  ;;  %v1591_v16 = vadd.f32 %v1588_v13, %v1584_v20 }
 0xa4c   :  { %v1590_v0 = vadd.f32 %v1588_v13, %v1583_v30 }
 0xa4d   :  { %v1592_v31 = vmax.f32 %v1589_v56, 0.0  ;;  %v1594_v40 = vmax.f32 %v1591_v16, 0.0 }
 0xa4e   :  { %3398 = vadd.xlane.f32.xlu0 %v3397_v3  ;;  %3522 = vadd.xlane.f32.xlu1 %v3521_v37  ;;  %v1593_v44 = vmax.f32 %v1590_v0, 0.0 }
 0xa52   :  { %3501 = vadd.xlane.f32.xlu0 %v3500_v24  ;;  %3555 = vadd.xlane.f32.xlu1 %v3554_v45 }
 0xa56   :  { %3573 = vadd.xlane.f32.xlu0 %v3572_v42  ;;  %3504 = vadd.xlane.f32.xlu1 %v3503_v27 }
 0xa5a   :  { %3525 = vadd.xlane.f32.xlu0 %v3524_v50  ;;  %3528 = vadd.xlane.f32.xlu1 %v3527_v51 }
 0xa5e   :  { %3558 = vadd.xlane.f32.xlu0 %v3557_v41  ;;  %3561 = vadd.xlane.f32.xlu1 %v3560_v47 }
 0xa6f   :  { %3260 = vperm.xlu1 %4344, %v1592_v31  }
 0xa73   :  { %3270 = vperm.xlu1 %4344, %v1594_v40  }
 0xa74   :  { %3265 = vperm.xlu0 %4345, %v1593_v44  }
 0xa75   :  { %4442 = shalt.err (!%p4439_p9)
}
 0xa76   :  { %3620 = dma.vmem_to_hbm [thread:$0]  %s3615_s13, 384, %s5840_s9, [#allocation4], %s4456_s20, %s4456_s20, %s4457_s21   ;;  %v5548_v12 = vpop.xlane.xlu0 %3084  ;;  %v5550_v4 = vpop.xlane.xlu1 %3081  ;;  %v5599_v50 = vand.u32 127, %v59_v10  ;;  %vm3279_vm4 = vcmask 64512  }
 0xa77   :  { %v3090_v41 = vadd.f32 1.0, %v5548_v12  ;;  %v3089_v21 = vadd.f32 1.0, %v5550_v4 }
 0xa78   :  { %vm3232_vm2 = vcmp.eq.s32.totalorder %v5599_v50, 0  ;;  %vm3236_vm15 = vcmp.eq.s32.totalorder %v5599_v50, 1  ;;  %vm3250_vm0 = vcmp.eq.s32.totalorder %v5599_v50, 3  ;;  %vm3243_vm1 = vcmp.eq.s32.totalorder %v5599_v50, 2 }
 0xa79   :  { %v5616_v46 = vsel %vm3232_vm2, %v3090_v41, 0.0  ;;  %v5624_v31 = vsel %vm3232_vm2, %v3089_v21, 0.0  ;;  %vm3257_vm3 = vcmp.eq.s32.totalorder %v5599_v50, 4 }
 0xa7a   :  { %v5552_v15 = vpop.xlane.xlu0 %3087 }
 0xa7b   :  { %v3091_v6 = vadd.f32 1.0, %v5552_v15 }
 0xa7d   :  { %v5626_v0 = vsel %vm3232_vm2, %v3091_v6, 0.0 }
 0xa99   :  { %v5554_v18 = vpop.xlane.xlu0 %3215 }
 0xa9d   :  { %v5560_v23 = vpop.xlane.xlu0 %3221 }
 0xa9f   :  { %v5556_v7 = vpop.xlane.xlu1 %3218 }
 0xaa5   :  { %v5558_v25 = vpop.xlane.xlu1 %3404 }
 0xaa9   :  { %v5562_v35 = vpop.xlane.xlu1 %3410 }
 0xaab   :  { %v5564_v29 = vpop.xlane.xlu0 %3407 }
 0xaaf   :  { %v3171_v63 = vpop.xlane.xlu0 %3170  ;;  %v5566_v5 = vpop.xlane.xlu1 %3146 }
 0xab0   :  { %v3154_v60 = vmul.f32 0.5, %v5566_v5 }
 0xab2   :  { %v5569_v28 = vadd.f32 1.0, %v3154_v60 }
 0xab3   :  { %v5571_v11 = vpop.xlane.xlu0 %3567  ;;  %v3204_v52 = vpop.xlane.xlu1 %3203 }
 0xab4   :  { %4386 = vrcp.f32 %v5569_v28 }
 0xab7   :  { %v3177_v53 = vpop.xlane.xlu0 %3176  ;;  %v5574_v59 = vpop.xlane.xlu1 %3152 }
 0xab8   :  { %v3156_v33 = vmul.f32 0.5, %v5574_v59 }
 0xaba   :  { %v3159_v34 = vadd.f32 1.0, %v3156_v33  ;;  %v3237_v33 = vsel %vm3236_vm15, %v5569_v28, 0.0 }
 0xabb   :  { %v5577_v58 = vpop.xlane.xlu0 %3149  ;;  %v5579_v61 = vpop.xlane.xlu1 %3209 }
 0xabc   :  { %v3155_v32 = vmul.f32 0.5, %v5577_v58  ;;  %4388 = vrcp.f32 %v3159_v34 }
 0xabe   :  { %v3158_v9 = vadd.f32 1.0, %v3155_v32 }
 0xabf   :  { %v5582_v3 = vpop.xlane.xlu0 %3206  ;;  %v3174_v22 = vpop.xlane.xlu1 %3173 }
 0xac0   :  { %4390 = vrcp.f32 %v3158_v9 }
 0xac1   :  { %v4387_v54 = vpop.eup %4386 }
 0xac2   :  { %v3163_v49 = vmul.f32 0.5, %v4387_v54 }
 0xac3   :  { %v5584_v37 = vpop.xlane.xlu0 %3335  ;;  %v5586_v48 = vpop.xlane.xlu1 %3570 }
 0xac4   :  { %v3343_v8 = vmul.f32 0.5, %v5584_v37  ;;  %v3178_v38 = vmul.f32 %v3171_v63, %v3163_v49  ;;  %v3223_v47 = vmul.f32 %v3204_v52, %v3163_v49 }
 0xac6   :  { %v3346_v24 = vadd.f32 1.0, %v3343_v8  ;;  %v3181_v51 = vmul.f32 %v3178_v38, %v3171_v63  ;;  %v3226_v19 = vmul.f32 %v3223_v47, %v3204_v52  ;;  %v3190_v52 = vmul.f32 %v3163_v49, %v5566_v5 }
 0xac7   :  { %v3360_v45 = vpop.xlane.xlu0 %3359  ;;  %v5589_v43 = vpop.xlane.xlu1 %3338  ;;  %v3239_v38 = vsel %vm3236_vm15, %v3159_v34, 0.0  ;;  %v3240_v34 = vadd.f32 %v3237_v33, %v5624_v31 }
 0xac8   :  { %4392 = vrcp.f32 %v3346_v24  ;;  %v3344_v42 = vmul.f32 0.5, %v5589_v43  ;;  %v3184_v10 = vsub.f32 %v5550_v4, %v3181_v51  ;;  %v3229_v8 = vsub.f32 %v5554_v18, %v3226_v19 }
 0xac9   :  { %v4389_v27 = vpop.eup %4388 }
 0xaca   :  { %v5592_v36 = vadd.f32 1.0, %v3344_v42  ;;  %v3165_v1 = vmul.f32 0.5, %v4389_v27  ;;  %v3187_v16 = vadd.f32 32.0, %v3184_v10 }
 0xacb   :  { %v5594_v39 = vpop.xlane.xlu0 %3392  ;;  %v5596_v26 = vpop.xlane.xlu1 %3362 }
 0xacc   :  { %4394 = vrcp.f32 %v5592_v36  ;;  %v3180_v62 = vmul.f32 %v3177_v53, %v3165_v1  ;;  %v3193_v49 = vsub.f32 %v3187_v16, %v3190_v52  ;;  %v3225_v28 = vmul.f32 %v5579_v61, %v3165_v1 }
 0xacd   :  { %v4391_v55 = vpop.eup %4390  ;;  %v3192_v21 = vmul.f32 %v3165_v1, %v5574_v59  ;;  %v3422_v33 = vsel %vm3236_vm15, %v5592_v36, 0.0 }
 0xace   :  { %v5602_v57 = vmul.f32 0.5, %v4391_v55  ;;  %v3183_v63 = vmul.f32 %v3180_v62, %v3177_v53  ;;  %v3238_v53 = vsel %vm3236_vm15, %v3158_v9, 0.0  ;;  %v3244_v19 = vsel %vm3243_vm1, %v3193_v49, 0.0 }
 0xacf   :  { %v5605_v2 = vpop.xlane.xlu0 %3341  ;;  %v5607_v14 = vpop.xlane.xlu1 %3395  ;;  %v5658_v55 = vadd.f32 %v3238_v53, %v5616_v46 }
 0xad0   :  { %v3179_v17 = vmul.f32 %v3174_v22, %v5602_v57  ;;  %v3345_v13 = vmul.f32 0.5, %v5605_v2  ;;  %v3186_v9 = vsub.f32 %v5552_v15, %v3183_v63  ;;  %v3224_v6 = vmul.f32 %v5582_v3, %v5602_v57 }
 0xad2   :  { %v5618_v56 = vadd.f32 1.0, %v3345_v13  ;;  %v3182_v60 = vmul.f32 %v3179_v17, %v3174_v22  ;;  %v3421_v22 = vsel %vm3236_vm15, %v3346_v24, 0.0  ;;  %v5655_v24 = vadd.f32 %v3239_v38, %v5626_v0 }
 0xad3   :  { %v5620_v20 = vpop.xlane.xlu0 %3365  ;;  %v5622_v30 = vpop.xlane.xlu1 %3498  ;;  %v3424_v10 = vadd.f32 %v3421_v22, %v5624_v31  ;;  %v3251_v13 = vsel %vm3250_vm0, %v3229_v8, 0.0  ;;  %v3189_v1 = vadd.f32 32.0, %v3186_v9  ;;  %v3227_v38 = vmul.f32 %v3224_v6, %v5582_v3 }
 0xad4   :  { %v3506_v40 = vmul.f32 0.5, %v5622_v30  ;;  %4396 = vrcp.f32 %v5618_v56  ;;  %v3185_v51 = vsub.f32 %v5548_v12, %v3182_v60 }
 0xad5   :  { %v4393_v44 = vpop.eup %4392 }
 0xad6   :  { %v3352_v32 = vmul.f32 0.5, %v4393_v44  ;;  %v5635_v54 = vadd.f32 1.0, %v3506_v40  ;;  %v3188_v40 = vadd.f32 32.0, %v3185_v51  ;;  %v3230_v51 = vsub.f32 %v5556_v7, %v3227_v38 }
 0xad7   :  { %v5644_v42 = vpop.xlane.xlu0 %3398  ;;  %v5646_v5 = vpop.xlane.xlu1 %3522 }
 0xad8   :  { %v3367_v27 = vmul.f32 %v3360_v45, %v3352_v32  ;;  %4398 = vrcp.f32 %v5635_v54  ;;  %v3412_v44 = vmul.f32 %v5594_v39, %v3352_v32  ;;  %v3379_v60 = vmul.f32 %v3352_v32, %v5584_v37 }
 0xad9   :  { %v4395_v18 = vpop.eup %4394 }
 0xada   :  { %v3370_v41 = vmul.f32 %v3367_v27, %v3360_v45  ;;  %v3353_v47 = vmul.f32 0.5, %v4395_v18  ;;  %v3228_v45 = vmul.f32 %v3225_v28, %v5579_v61  ;;  %v3191_v61 = vmul.f32 %v5602_v57, %v5577_v58 }
 0xadb   :  { %v5664_v62 = vpop.xlane.xlu0 %3501  ;;  %v5666_v17 = vpop.xlane.xlu1 %3555  ;;  %v3247_v28 = vadd.f32 %v3244_v19, %v3240_v34  ;;  %v3415_v58 = vmul.f32 %v3412_v44, %v5594_v39 }
 0xadc   :  { %v3373_v16 = vsub.f32 %v5550_v4, %v3370_v41  ;;  %v3368_v59 = vmul.f32 %v5596_v26, %v3353_v47  ;;  %v3507_v63 = vmul.f32 0.5, %v5664_v62  ;;  %v3231_v37 = vsub.f32 %v5560_v23, %v3228_v45 }
 0xadd   :  { %v3194_v18 = vsub.f32 %v3188_v40, %v3191_v61  ;;  %v3380_v57 = vmul.f32 %v3353_v47, %v5589_v43  ;;  %v3413_v34 = vmul.f32 %v5607_v14, %v3353_v47  ;;  %v3425_v41 = vadd.f32 %v3422_v33, %v5616_v46 }
 0xade   :  { %v3376_v52 = vadd.f32 32.0, %v3373_v16  ;;  %v3371_v8 = vmul.f32 %v3368_v59, %v5596_v26  ;;  %v5685_v53 = vadd.f32 1.0, %v3507_v63  ;;  %v3195_v26 = vsub.f32 %v3189_v1, %v3192_v21 }
 0xadf   :  { %v5687_v22 = vpop.xlane.xlu0 %3573  ;;  %v5689_v49 = vpop.xlane.xlu1 %3504  ;;  %v3254_v39 = vadd.f32 %v3251_v13, %v3247_v28  ;;  %v3423_v45 = vsel %vm3236_vm15, %v5618_v56, 0.0  ;;  %v3253_v1 = vsel %vm3250_vm0, %v3231_v37, 0.0  ;;  %v3418_v56 = vsub.f32 %v5558_v25, %v3415_v58 }
 0xae0   :  { %v3382_v32 = vsub.f32 %v3376_v52, %v3379_v60  ;;  %v3374_v27 = vsub.f32 %v5548_v12, %v3371_v8  ;;  %v3508_v36 = vmul.f32 0.5, %v5689_v49  ;;  %4400 = vrcp.f32 %v5685_v53 }
 0xae1   :  { %v4397_v3 = vpop.eup %4396  ;;  %v3246_v7 = vsel %vm3243_vm1, %v3195_v26, 0.0  ;;  %v3416_v40 = vmul.f32 %v3413_v34, %v5607_v14  ;;  %v3245_v63 = vsel %vm3243_vm1, %v3194_v18, 0.0  ;;  %v3426_v60 = vadd.f32 %v3423_v45, %v5626_v0 }
 0xae2   :  { %v3377_v9 = vadd.f32 32.0, %v3374_v27  ;;  %v5699_v23 = vadd.f32 1.0, %v3508_v36  ;;  %v3354_v21 = vmul.f32 0.5, %v4397_v3  ;;  %v3427_v43 = vsel %vm3243_vm1, %v3382_v32, 0.0 }
 0xae3   :  { %v5703_v6 = vpop.xlane.xlu1 %3528  ;;  %v5715_v13 = vpop.xlane.xlu0 %3525  ;;  %v3430_v8 = vadd.f32 %v3427_v43, %v3424_v10  ;;  %v3252_v61 = vsel %vm3250_vm0, %v3230_v51, 0.0  ;;  %v3249_v28 = vadd.f32 %v3246_v7, %v5655_v24  ;;  %v3248_v32 = vadd.f32 %v3245_v63, %v5658_v55 }
 0xae4   :  { %v3383_v19 = vsub.f32 %v3377_v9, %v3380_v57  ;;  %4402 = vrcp.f32 %v5699_v23  ;;  %v3369_v16 = vmul.f32 %v5620_v20, %v3354_v21  ;;  %v3414_v59 = vmul.f32 %v5644_v42, %v3354_v21 }
 0xae5   :  { %v4399_v47 = vpop.eup %4398  ;;  %v3381_v27 = vmul.f32 %v3354_v21, %v5605_v2  ;;  %v3419_v36 = vsub.f32 %v5564_v29, %v3416_v40  ;;  %v3433_v18 = vsel %vm3250_vm0, %v3418_v56, 0.0  ;;  %v3256_v29 = vadd.f32 %v3253_v1, %v3249_v28 }
 0xae6   :  { %v3515_v44 = vmul.f32 0.5, %v4399_v47  ;;  %v3372_v52 = vmul.f32 %v3369_v16, %v5620_v20  ;;  %v3428_v14 = vsel %vm3243_vm1, %v3383_v19, 0.0  ;;  %v3584_v20 = vsel %vm3236_vm15, %v5635_v54, 0.0 }
 0xae7   :  { %v5725_v33 = vpop.xlane.xlu1 %3561  ;;  %v3417_v10 = vmul.f32 %v3414_v59, %v5644_v42  ;;  %v3559_v3 = vpop.xlane.xlu0 %3558  ;;  %v3436_v57 = vadd.f32 %v3433_v18, %v3430_v8  ;;  %v3431_v54 = vadd.f32 %v3428_v14, %v3425_v41  ;;  %v3587_v42 = vadd.f32 %v3584_v20, %v5624_v31 }
 0xae8   :  { %v3530_v38 = vmul.f32 %v5646_v5, %v3515_v44  ;;  %v3575_v25 = vmul.f32 %v5666_v17, %v3515_v44  ;;  %v3375_v37 = vsub.f32 %v5552_v15, %v3372_v52  ;;  %v3255_v43 = vadd.f32 %v3252_v61, %v3248_v32 }
 0xae9   :  { %v3434_v41 = vsel %vm3250_vm0, %v3419_v36, 0.0 }
 0xaea   :  { %v3533_v26 = vmul.f32 %v3530_v38, %v5646_v5  ;;  %v3378_v24 = vadd.f32 32.0, %v3375_v37  ;;  %v3578_v58 = vmul.f32 %v3575_v25, %v5666_v17  ;;  %v3420_v5 = vsub.f32 %v5562_v35, %v3417_v10 }
 0xaeb   :  { %v3261_v9 = vpop.permute.xlu1 %3260  ;;  %v3542_v17 = vmul.f32 %v3515_v44, %v5622_v30  ;;  %v3437_v30 = vadd.f32 %v3434_v41, %v3431_v54 }
 0xaec   :  { %v3536_v55 = vsub.f32 %v5550_v4, %v3533_v26  ;;  %v3273_v2 = vsel %vm3257_vm3, %v3261_v9, 0.0  ;;  %v3384_v34 = vsub.f32 %v3378_v24, %v3381_v27  ;;  %v3581_v4 = vsub.f32 %v5571_v11, %v3578_v58 }
 0xaed   :  { %v3276_v51 = vadd.f32 %v3273_v2, %v3254_v39  ;;  %v3439_v21 = vadd.f32 %v3436_v57, %v3273_v2  ;;  %v4401_v19 = vpop.eup %4400  ;;  %v3435_v63 = vsel %vm3250_vm0, %v3420_v5, 0.0 }
 0xaee   :  { %v3539_v45 = vadd.f32 32.0, %v3536_v55  ;;  %v3516_v31 = vmul.f32 0.5, %v4401_v19  ;;  %v3429_v39 = vsel %vm3243_vm1, %v3384_v34, 0.0  ;;  %v3596_v20 = vsel %vm3250_vm0, %v3581_v4, 0.0 }
 0xaef   :  { %3280 = vst.msk [vmem:[%s5842_s11] sm:$0xff] %vm3279_vm4, %v3276_v51  ;;  %3751 = vst.msk [vmem:[%s5842_s11 + $0x18] sm:$0xff] %vm3279_vm4, %v3439_v21  ;;  %v3266_v35 = vpop.permute.xlu0 %3265  ;;  %v3271_v47 = vpop.permute.xlu1 %3270  ;;  %v3432_v16 = vadd.f32 %v3429_v39, %v3426_v60 }
 0xaf0   :  { %v3545_v7 = vsub.f32 %v3539_v45, %v3542_v17  ;;  %v3274_v11 = vsel %vm3257_vm3, %v3266_v35, 0.0  ;;  %v3275_v59 = vsel %vm3257_vm3, %v3271_v47, 0.0  ;;  %v3531_v56 = vmul.f32 %v5715_v13, %v3516_v31 }
 0xaf1   :  { %v4403_v1 = vpop.eup %4402  ;;  %v3576_v40 = vmul.f32 %v3559_v3, %v3516_v31  ;;  %v3277_v44 = vadd.f32 %v3274_v11, %v3255_v43  ;;  %v3440_v61 = vadd.f32 %v3437_v30, %v3274_v11  ;;  %v3438_v38 = vadd.f32 %v3435_v63, %v3432_v16 }
 0xaf2   :  { %v3517_v52 = vmul.f32 0.5, %v4403_v1  ;;  %v3590_v8 = vsel %vm3243_vm1, %v3545_v7, 0.0  ;;  %v3534_v25 = vmul.f32 %v3531_v56, %v5715_v13  ;;  %v3278_v14 = vadd.f32 %v3275_v59, %v3256_v29 }
 0xaf3   :  { %v3593_v60 = vadd.f32 %v3590_v8, %v3587_v42  ;;  %3281 = vst.msk [vmem:[%s5842_s11 + $0x8] sm:$0xff] %vm3279_vm4, %v3277_v44  ;;  %3752 = vst.msk [vmem:[%s5842_s11 + $0x20] sm:$0xff] %vm3279_vm4, %v3440_v61  ;;  %v3441_v13 = vadd.f32 %v3438_v38, %v3275_v59  ;;  %v3579_v32 = vmul.f32 %v3576_v40, %v3559_v3 }
 0xaf4   :  { %v3532_v28 = vmul.f32 %v5703_v6, %v3517_v52  ;;  %v3577_v37 = vmul.f32 %v5725_v33, %v3517_v52  ;;  %v3537_v10 = vsub.f32 %v5548_v12, %v3534_v25  ;;  %3282 = vst.msk [vmem:[%s5842_s11 + $0x10] sm:$0xff] %vm3279_vm4, %v3278_v14  ;;  %v3543_v26 = vmul.f32 %v3516_v31, %v5664_v62 }
 0xaf5   :  { %v3599_v27 = vadd.f32 %v3596_v20, %v3593_v60  ;;  %3753 = vst.msk [vmem:[%s5842_s11 + $0x28] sm:$0xff] %vm3279_vm4, %v3441_v13  ;;  %v3585_v12 = vsel %vm3236_vm15, %v5685_v53, 0.0  ;;  %v3544_v9 = vmul.f32 %v3517_v52, %v5689_v49  ;;  %v3586_v53 = vsel %vm3236_vm15, %v5699_v23, 0.0 }
 0xaf6   :  { %v3535_v36 = vmul.f32 %v3532_v28, %v5703_v6  ;;  %v3540_v18 = vadd.f32 32.0, %v3537_v10  ;;  %v3580_v3 = vmul.f32 %v3577_v37, %v5725_v33  ;;  %v3582_v6 = vsub.f32 %v5586_v48, %v3579_v32 }
 0xaf7   :  { %v3602_v24 = vadd.f32 %v3599_v27, %v3273_v2  ;;  %v3588_v62 = vadd.f32 %v3585_v12, %v5616_v46  ;;  %v3589_v55 = vadd.f32 %v3586_v53, %v5626_v0 }
 0xaf8   :  { %v3538_v58 = vsub.f32 %v5552_v15, %v3535_v36  ;;  %v3546_v57 = vsub.f32 %v3540_v18, %v3543_v26  ;;  %v3583_v48 = vsub.f32 %v5687_v22, %v3580_v3  ;;  %v3597_v2 = vsel %vm3250_vm0, %v3582_v6, 0.0 }
 0xaf9   :  { %3754 = vst.msk [vmem:[%s5842_s11 + $0x30] sm:$0xff] %vm3279_vm4, %v3602_v24 }
 0xafa   :  { %v3541_v54 = vadd.f32 32.0, %v3538_v58  ;;  %v3591_v15 = vsel %vm3243_vm1, %v3546_v57, 0.0  ;;  %v3598_v23 = vsel %vm3250_vm0, %v3583_v48, 0.0 }
 0xafb   :  { %v3594_v42 = vadd.f32 %v3591_v15, %v3588_v62 }
 0xafc   :  { %v3547_v33 = vsub.f32 %v3541_v54, %v3544_v9 }
 0xafd   :  { %v3600_v46 = vadd.f32 %v3597_v2, %v3594_v42 }
 0xafe   :  { %v3592_v49 = vsel %vm3243_vm1, %v3547_v33, 0.0 }
 0xaff   :  { %v3595_v29 = vadd.f32 %v3592_v49, %v3589_v55  ;;  %v3603_v34 = vadd.f32 %v3600_v46, %v3274_v11 }
 0xb01   :  { %v3601_v5 = vadd.f32 %v3598_v23, %v3595_v29  ;;  %3755 = vst.msk [vmem:[%s5842_s11 + $0x38] sm:$0xff] %vm3279_vm4, %v3603_v34 }
 0xb03   :  { %v3604_v22 = vadd.f32 %v3601_v5, %v3275_v59 }
 0xb05   :  { %3756 = vst.msk [vmem:[%s5842_s11 + $0x40] sm:$0xff] %vm3279_vm4, %v3604_v22 }
 0xb06   :  { %4453 = dma.done.wait [#allocation4], 384  }
 0xb07   :  { %4454 = vsyncadd [#allocation4], 4294966912 }
 0xb08   :  { %3632 = vsyncpa [#allocation3], 1 }
 0xb09   :  { %3633 = vsyncpa [#allocation4], 1 }

</bundles_post_ra>
